<compile_context>
chip_gen: v6e
topology: v6e:2x2x1
jax: 0.10.0
libtpu: 0.0.40
codegen_flags: <defaults>
</compile_context>

<pallas_src>
import functools

import numpy as np
import jax
import jax.numpy as jnp
from jax import lax
from jax.experimental import pallas as pl
from jax.experimental.pallas import tpu as pltpu


# ----------------------------- model config ---------------------------------
B = 2           # batch
S = 16          # seq_length
D = 32          # projection_dim / embed_dim
H = 4           # num_heads  (head_dim = 8)
F = 32          # ff_dim
L = 2           # num_trans_blocks
U = 64          # mlp_units[0]
EPS = 1e-5      # nn.LayerNorm default eps


def _layer_norm(x, g, b):
    mu = jnp.mean(x, axis=-1, keepdims=True)
    var = jnp.mean((x - mu) ** 2, axis=-1, keepdims=True)
    return (x - mu) * lax.rsqrt(var + EPS) * g + b


# ------------------------------- kernel --------------------------------------
def transformer_kernel(
    x_ref,        # (B*S, 1)                flattened input
    lw_ref,       # (L, D+F+2, 4D+F)        packed per-layer weights / vectors
    hb_ref,       # (D+5, U)                packed projection + MLP head params
    o_ref,        # (B, 1)
    *, batch, seq, dim, ffdim, heads, layers,
):
    hd = dim // heads
    scale = jnp.float32(1.0 / np.sqrt(hd))
    n = batch * seq

    lw = lw_ref[...]
    hb = hb_ref[...]

    # ---- head-blob static slices -------------------------------------------
    wproj = hb[0:1, 0:dim]                      # (1, D)
    bproj = hb[1:2, 0:dim]                      # (1, D)
    w1    = hb[2:2 + dim, :]                    # (D, U)
    b1    = hb[2 + dim:3 + dim, :]              # (1, U)
    w2t   = hb[3 + dim:4 + dim, :]              # (1, U)
    b2    = hb[4 + dim:5 + dim, 0:1]            # (1, 1)

    # ---- projection: Linear(1, D) on every (batch, timestep) ----------------
    x = x_ref[...]                              # (B*S, 1)
    h = x * wproj + bproj                       # (B*S, D)

    for l in range(layers):
        blk = lw[l]                             # (D+F+2, 4D+F)
        wqkv = blk[0:dim, 0:3 * dim]            # (D, 3D)
        wo   = blk[0:dim, 3 * dim:4 * dim]      # (D, D)
        wc1  = blk[0:dim, 4 * dim:4 * dim + ffdim]        # (D, F)
        wc2  = blk[dim:dim + ffdim, 0:dim]      # (F, D)
        br1  = blk[dim + ffdim:dim + ffdim + 1, :]        # (1, 4D+F)
        br2  = blk[dim + ffdim + 1:dim + ffdim + 2, :]    # (1, 4D+F)
        bqkv = br1[:, 0:3 * dim]
        bo   = br1[:, 3 * dim:4 * dim]
        bc1  = br1[:, 4 * dim:4 * dim + ffdim]
        g1   = br2[:, 0:dim]
        be1  = br2[:, dim:2 * dim]
        bc2  = br2[:, 2 * dim:3 * dim]
        g2   = br2[:, 3 * dim:4 * dim]
        be2  = br2[:, 4 * dim:5 * dim]

        # -------- fused QKV: one (B*S, D) x (D, 3D) matmul --------------------
        qkv = jnp.dot(h, wqkv, preferred_element_type=jnp.float32) + bqkv
        q = qkv[:, 0:dim].reshape(batch, seq, dim)
        k = qkv[:, dim:2 * dim].reshape(batch, seq, dim)
        v = qkv[:, 2 * dim:3 * dim].reshape(batch, seq, dim)

        # -------- multi-head self-attention, batched over B -------------------
        heads_out = []
        for hh in range(heads):
            lo = hh * hd
            qh = q[:, :, lo:lo + hd] * scale            # (B, S, hd)
            kh = k[:, :, lo:lo + hd]
            vh = v[:, :, lo:lo + hd]
            sc = jnp.einsum('bqd,bkd->bqk', qh, kh,
                            preferred_element_type=jnp.float32)   # (B, S, S)
            m = jnp.max(sc, axis=-1, keepdims=True)
            e = jnp.exp(sc - m)
            p = e / jnp.sum(e, axis=-1, keepdims=True)
            heads_out.append(jnp.einsum('bqk,bkd->bqd', p, vh,
                                        preferred_element_type=jnp.float32))
        attn = jnp.concatenate(heads_out, axis=-1).reshape(n, dim)
        # single full-width output projection (replaces 4 accumulated matmuls)
        attn = jnp.dot(attn, wo, preferred_element_type=jnp.float32) + bo
        h = _layer_norm(h + attn, g1, be1)

        # -------- feed-forward (1x1 convs) + residual + LN --------------------
        f = jnp.dot(h, wc1, preferred_element_type=jnp.float32) + bc1
        f = jnp.maximum(f, 0.0)
        f = jnp.dot(f, wc2, preferred_element_type=jnp.float32) + bc2
        h = _layer_norm(h + f, g2, be2)

    # ---- global average pool over sequence + MLP head ------------------------
    pooled = jnp.mean(h.reshape(batch, seq, dim), axis=1)           # (B, D)
    m1 = jnp.dot(pooled, w1, preferred_element_type=jnp.float32) + b1
    m1 = jnp.maximum(m1, 0.0)
    out = jnp.sum(m1 * w2t, axis=-1, keepdims=True) + b2            # (B, 1)
    o_ref[...] = out                                                # one store


# --------------------------- parameter packing --------------------------------
def pack_params(p):
    """Pack the 22 parameter arrays into 2 contiguous f32 blobs."""
    dim = p["wq"].shape[1]
    ffdim = p["wc1"].shape[2]
    u = p["w1"].shape[1]

    # ----- per-layer blob: (L, D+F+2, W) with W = 4D+F ------------------------
    wqkv = jnp.concatenate([p["wq"], p["wk"], p["wv"]], axis=-1)     # (L, D, 3D)
    top = jnp.concatenate([wqkv, p["wo"], p["wc1"]], axis=-1)        # (L, D, 4D+F)
    w = max(top.shape[-1], 5 * dim)
    top = jnp.pad(top, ((0, 0), (0, 0), (0, w - top.shape[-1])))
    mid = jnp.pad(p["wc2"], ((0, 0), (0, 0), (0, w - dim)))          # (L, F, W)
    brow1 = jnp.concatenate([p["bq"], p["bk"], p["bv"], p["bo"], p["bc1"]], axis=-1)
    brow1 = jnp.pad(brow1, ((0, 0), (0, w - brow1.shape[-1])))[:, None, :]
    brow2 = jnp.concatenate([p["g1"], p["be1"], p["bc2"], p["g2"], p["be2"]], axis=-1)
    brow2 = jnp.pad(brow2, ((0, 0), (0, w - brow2.shape[-1])))[:, None, :]
    lw = jnp.concatenate([top, mid, brow1, brow2], axis=1)           # (L, D+F+2, W)

    # ----- head blob: (D+5, U) -------------------------------------------------
    row_wp = jnp.pad(p["wproj"], ((0, 0), (0, u - dim)))
    row_bp = jnp.pad(p["bproj"], ((0, 0), (0, u - dim)))
    row_w2 = p["w2"].T                                               # (1, U)
    row_b2 = jnp.pad(p["b2"], ((0, 0), (0, u - 1)))
    hb = jnp.concatenate([row_wp, row_bp, p["w1"], p["b1"], row_w2, row_b2], axis=0)
    return lw, hb


# ------------------------------- wrapper --------------------------------------
def time_series_transformer_with_projection(x, params):
    """x: (B, S, 1) float32  ->  (B, 1) float32"""
    b, s, _ = x.shape
    lw, hb = pack_params(params)
    xr = x.reshape(b * s, 1)

    kern = functools.partial(
        transformer_kernel,
        batch=b, seq=s, dim=D, ffdim=F, heads=H, layers=L)

    out = pl.pallas_call(
        kern,
        out_shape=jax.ShapeDtypeStruct((b, 1), jnp.float32),
        grid=(1,),
        in_specs=[
            pl.BlockSpec((b * s, 1), lambda i: (0, 0)),
            pl.BlockSpec(lw.shape, lambda i: (0, 0, 0)),
            pl.BlockSpec(hb.shape, lambda i: (0, 0)),
        ],
        out_specs=pl.BlockSpec((b, 1), lambda i: (0, 0)),
        compiler_params=pltpu.CompilerParams(
            dimension_semantics=("arbitrary",)),
    )(xr, lw, hb)
    return out                                                       # (B, 1)


# --------------------------- deterministic params -----------------------------
def init_params(key):
    ks = iter(jax.random.split(key, 32))

    def rnd(shape, scale=0.1):
        return jax.random.normal(next(ks), shape, jnp.float32) * scale

    p = dict(
        wproj=rnd((1, D)), bproj=rnd((1, D)),
        wq=rnd((L, D, D)), wk=rnd((L, D, D)), wv=rnd((L, D, D)),
        bq=rnd((L, D)), bk=rnd((L, D)), bv=rnd((L, D)),
        wo=rnd((L, D, D)), bo=rnd((L, D)),
        g1=jnp.ones((L, D), jnp.float32), be1=jnp.zeros((L, D), jnp.float32),
        wc1=rnd((L, D, F)), bc1=rnd((L, F)),
        wc2=rnd((L, F, D)), bc2=rnd((L, D)),
        g2=jnp.ones((L, D), jnp.float32), be2=jnp.zeros((L, D), jnp.float32),
        w1=rnd((D, U)), b1=rnd((1, U)),
        w2=rnd((U, 1)), b2=rnd((1, 1)),
    )
    return p


# ------------------------------ pure-JAX reference ----------------------------
def _ref_single(x, p):
    hd = D // H
    scale = 1.0 / np.sqrt(hd)
    h = x * p["wproj"] + p["bproj"]
    for l in range(L):
        q = h @ p["wq"][l] + p["bq"][l]
        k = h @ p["wk"][l] + p["bk"][l]
        v = h @ p["wv"][l] + p["bv"][l]
        heads = []
        for hh in range(H):
            sl = slice(hh * hd, (hh + 1) * hd)
            s = (q[:, sl] * scale) @ k[:, sl].T
            a = jax.nn.softmax(s, axis=-1)
            heads.append(a @ v[:, sl])
        attn = jnp.concatenate(heads, -1) @ p["wo"][l] + p["bo"][l]
        h = _layer_norm(h + attn, p["g1"][l], p["be1"][l])
        f = jnp.maximum(h @ p["wc1"][l] + p["bc1"][l], 0.0)
        f = f @ p["wc2"][l] + p["bc2"][l]
        h = _layer_norm(h + f, p["g2"][l], p["be2"][l])
    pooled = jnp.mean(h, axis=0, keepdims=True)
    m = jnp.maximum(pooled @ p["w1"] + p["b1"], 0.0)
    return (m @ p["w2"] + p["b2"])[0]          # (1,)


def reference(x, p):
    return jax.vmap(lambda xi: _ref_single(xi, p))(x)   # (B, 1)


# ------------------------------------ main -------------------------------------
if __name__ == "__main__":
    key = jax.random.PRNGKey(0)
    kx, kp = jax.random.split(key)
    x = jax.random.normal(kx, (B, S, 1), jnp.float32)
    params = init_params(kp)

    y = time_series_transformer_with_projection(x, params)
    y = jax.block_until_ready(y)

    y_ref = jax.block_until_ready(reference(x, params))
    assert y.shape == (B, 1), y.shape
    np.testing.assert_allclose(np.asarray(y), np.asarray(y_ref),
                               rtol=1e-4, atol=1e-4)
    print("KERNEL_OK")
</pallas_src>

<mosaic_0001>
module attributes {stable_mosaic.version = 11 : i64} {
  func.func @transformer_kernel(%arg0: i32, %arg1: memref<32x1xf32, #tpu.memory_space<vmem>>, %arg2: memref<2x66x160xf32, #tpu.memory_space<vmem>>, %arg3: memref<37x64xf32, #tpu.memory_space<vmem>>, %arg4: memref<2x1xf32, #tpu.memory_space<vmem>>) attributes {dimension_semantics = [#tpu.dimension_semantics<arbitrary>], iteration_bounds = array<i64: 1>, scalar_prefetch = 0 : i64, scratch_operands = 0 : i64, tpu.core_type = #tpu.core_type<tc>, window_params = [{pipeline_mode = #tpu.pipeline_mode<synchronous>, transform_indices = @transform_0, window_bounds = array<i64: 32, 1>}, {pipeline_mode = #tpu.pipeline_mode<synchronous>, transform_indices = @transform_1, window_bounds = array<i64: 2, 66, 160>}, {pipeline_mode = #tpu.pipeline_mode<synchronous>, transform_indices = @transform_2, window_bounds = array<i64: 37, 64>}, {pipeline_mode = #tpu.pipeline_mode<synchronous>, transform_indices = @transform_3, window_bounds = array<i64: 2, 1>}]} {
    %c0 = arith.constant 0 : index
    %c0_0 = arith.constant 0 : index
    %c0_1 = arith.constant 0 : index
    %0 = vector.load %arg2[%c0, %c0_0, %c0_1] : memref<2x66x160xf32, #tpu.memory_space<vmem>>, vector<2x66x160xf32>
    %c0_2 = arith.constant 0 : index
    %c0_3 = arith.constant 0 : index
    %1 = vector.load %arg3[%c0_2, %c0_3] : memref<37x64xf32, #tpu.memory_space<vmem>>, vector<37x64xf32>
    %2 = vector.extract_strided_slice %1 {offsets = [0, 0], sizes = [1, 32], strides = [1, 1]} : vector<37x64xf32> to vector<1x32xf32>
    %3 = vector.extract_strided_slice %1 {offsets = [1, 0], sizes = [1, 32], strides = [1, 1]} : vector<37x64xf32> to vector<1x32xf32>
    %4 = vector.extract_strided_slice %1 {offsets = [2, 0], sizes = [32, 64], strides = [1, 1]} : vector<37x64xf32> to vector<32x64xf32>
    %5 = vector.extract_strided_slice %1 {offsets = [34, 0], sizes = [1, 64], strides = [1, 1]} : vector<37x64xf32> to vector<1x64xf32>
    %6 = vector.extract_strided_slice %1 {offsets = [35, 0], sizes = [1, 64], strides = [1, 1]} : vector<37x64xf32> to vector<1x64xf32>
    %7 = vector.extract_strided_slice %1 {offsets = [36, 0], sizes = [1, 1], strides = [1, 1]} : vector<37x64xf32> to vector<1x1xf32>
    %c0_4 = arith.constant 0 : index
    %c0_5 = arith.constant 0 : index
    %8 = vector.load %arg1[%c0_4, %c0_5] : memref<32x1xf32, #tpu.memory_space<vmem>>, vector<32x1xf32>
    %9 = vector.broadcast %8 : vector<32x1xf32> to vector<32x32xf32>
    %10 = vector.broadcast %2 : vector<1x32xf32> to vector<32x32xf32>
    %11 = arith.mulf %9, %10 : vector<32x32xf32>
    %12 = vector.broadcast %3 : vector<1x32xf32> to vector<32x32xf32>
    %13 = arith.addf %11, %12 : vector<32x32xf32>
    %14 = vector.extract_strided_slice %0 {offsets = [0, 0, 0], sizes = [1, 66, 160], strides = [1, 1, 1]} : vector<2x66x160xf32> to vector<1x66x160xf32>
    %15 = vector.shape_cast %14 : vector<1x66x160xf32> to vector<66x160xf32>
    %16 = vector.extract_strided_slice %15 {offsets = [0, 0], sizes = [32, 96], strides = [1, 1]} : vector<66x160xf32> to vector<32x96xf32>
    %17 = vector.extract_strided_slice %15 {offsets = [0, 96], sizes = [32, 32], strides = [1, 1]} : vector<66x160xf32> to vector<32x32xf32>
    %18 = vector.extract_strided_slice %15 {offsets = [0, 128], sizes = [32, 32], strides = [1, 1]} : vector<66x160xf32> to vector<32x32xf32>
    %19 = vector.extract_strided_slice %15 {offsets = [32, 0], sizes = [32, 32], strides = [1, 1]} : vector<66x160xf32> to vector<32x32xf32>
    %20 = vector.extract_strided_slice %15 {offsets = [64, 0], sizes = [1, 160], strides = [1, 1]} : vector<66x160xf32> to vector<1x160xf32>
    %21 = vector.extract_strided_slice %15 {offsets = [65, 0], sizes = [1, 160], strides = [1, 1]} : vector<66x160xf32> to vector<1x160xf32>
    %22 = vector.extract_strided_slice %20 {offsets = [0, 0], sizes = [1, 96], strides = [1, 1]} : vector<1x160xf32> to vector<1x96xf32>
    %23 = vector.extract_strided_slice %20 {offsets = [0, 96], sizes = [1, 32], strides = [1, 1]} : vector<1x160xf32> to vector<1x32xf32>
    %24 = vector.extract_strided_slice %20 {offsets = [0, 128], sizes = [1, 32], strides = [1, 1]} : vector<1x160xf32> to vector<1x32xf32>
    %25 = vector.extract_strided_slice %21 {offsets = [0, 0], sizes = [1, 32], strides = [1, 1]} : vector<1x160xf32> to vector<1x32xf32>
    %26 = vector.extract_strided_slice %21 {offsets = [0, 32], sizes = [1, 32], strides = [1, 1]} : vector<1x160xf32> to vector<1x32xf32>
    %27 = vector.extract_strided_slice %21 {offsets = [0, 64], sizes = [1, 32], strides = [1, 1]} : vector<1x160xf32> to vector<1x32xf32>
    %28 = vector.extract_strided_slice %21 {offsets = [0, 96], sizes = [1, 32], strides = [1, 1]} : vector<1x160xf32> to vector<1x32xf32>
    %29 = vector.extract_strided_slice %21 {offsets = [0, 128], sizes = [1, 32], strides = [1, 1]} : vector<1x160xf32> to vector<1x32xf32>
    %cst = arith.constant dense<0.000000e+00> : vector<32x96xf32>
    %30 = tpu.matmul %13, %16, %cst {dimension_numbers = #tpu.dot_dimension_numbers<[1], [0], [0], [1], [0, 0, 1, 1], [], []>} : vector<32x32xf32>, vector<32x96xf32>, vector<32x96xf32> -> vector<32x96xf32>
    %31 = vector.broadcast %22 : vector<1x96xf32> to vector<32x96xf32>
    %32 = arith.addf %30, %31 : vector<32x96xf32>
    %33 = vector.extract_strided_slice %32 {offsets = [0, 0], sizes = [32, 32], strides = [1, 1]} : vector<32x96xf32> to vector<32x32xf32>
    %34 = vector.shape_cast %33 : vector<32x32xf32> to vector<2x16x32xf32>
    %35 = vector.extract_strided_slice %32 {offsets = [0, 32], sizes = [32, 32], strides = [1, 1]} : vector<32x96xf32> to vector<32x32xf32>
    %36 = vector.shape_cast %35 : vector<32x32xf32> to vector<2x16x32xf32>
    %37 = vector.extract_strided_slice %32 {offsets = [0, 64], sizes = [32, 32], strides = [1, 1]} : vector<32x96xf32> to vector<32x32xf32>
    %38 = vector.shape_cast %37 : vector<32x32xf32> to vector<2x16x32xf32>
    %39 = vector.extract_strided_slice %34 {offsets = [0, 0, 0], sizes = [2, 16, 8], strides = [1, 1, 1]} : vector<2x16x32xf32> to vector<2x16x8xf32>
    %cst_6 = arith.constant 0.353553385 : f32
    %40 = vector.broadcast %cst_6 : f32 to vector<2x16x8xf32>
    %41 = arith.mulf %39, %40 : vector<2x16x8xf32>
    %42 = vector.extract_strided_slice %36 {offsets = [0, 0, 0], sizes = [2, 16, 8], strides = [1, 1, 1]} : vector<2x16x32xf32> to vector<2x16x8xf32>
    %43 = vector.extract_strided_slice %38 {offsets = [0, 0, 0], sizes = [2, 16, 8], strides = [1, 1, 1]} : vector<2x16x32xf32> to vector<2x16x8xf32>
    "tpu.trace_start"() <{level = 10 : i32, message = "bqd,bkd->bqk"}> : () -> ()
    %cst_7 = arith.constant dense<0.000000e+00> : vector<2x16x16xf32>
    %44 = tpu.matmul %41, %42, %cst_7 {dimension_numbers = #tpu.dot_dimension_numbers<[2], [2], [1], [1], [0, 0, 0, 1, 1, 1], [0], [0]>} : vector<2x16x8xf32>, vector<2x16x8xf32>, vector<2x16x16xf32> -> vector<2x16x16xf32>
    "tpu.trace_stop"() : () -> ()
    %cst_8 = arith.constant dense<0xFF800000> : vector<2x16xf32>
    %45 = vector.multi_reduction <maximumf>, %44, %cst_8 [2] : vector<2x16x16xf32> to vector<2x16xf32>
    %46 = vector.shape_cast %45 : vector<2x16xf32> to vector<2x16x1xf32>
    %47 = vector.broadcast %46 : vector<2x16x1xf32> to vector<2x16x16xf32>
    %48 = arith.subf %44, %47 : vector<2x16x16xf32>
    %49 = math.exp %48 : vector<2x16x16xf32>
    %cst_9 = arith.constant dense<0.000000e+00> : vector<2x16xf32>
    %50 = vector.multi_reduction <add>, %49, %cst_9 [2] : vector<2x16x16xf32> to vector<2x16xf32>
    %51 = vector.shape_cast %50 : vector<2x16xf32> to vector<2x16x1xf32>
    %52 = vector.broadcast %51 : vector<2x16x1xf32> to vector<2x16x16xf32>
    %53 = arith.divf %49, %52 : vector<2x16x16xf32>
    "tpu.trace_start"() <{level = 10 : i32, message = "bqk,bkd->bqd"}> : () -> ()
    %cst_10 = arith.constant dense<0.000000e+00> : vector<2x16x8xf32>
    %54 = tpu.matmul %53, %43, %cst_10 {dimension_numbers = #tpu.dot_dimension_numbers<[2], [1], [1], [2], [0, 0, 0, 1, 1, 2], [0], [0]>} : vector<2x16x16xf32>, vector<2x16x8xf32>, vector<2x16x8xf32> -> vector<2x16x8xf32>
    "tpu.trace_stop"() : () -> ()
    %55 = vector.extract_strided_slice %34 {offsets = [0, 0, 8], sizes = [2, 16, 8], strides = [1, 1, 1]} : vector<2x16x32xf32> to vector<2x16x8xf32>
    %cst_11 = arith.constant 0.353553385 : f32
    %56 = vector.broadcast %cst_11 : f32 to vector<2x16x8xf32>
    %57 = arith.mulf %55, %56 : vector<2x16x8xf32>
    %58 = vector.extract_strided_slice %36 {offsets = [0, 0, 8], sizes = [2, 16, 8], strides = [1, 1, 1]} : vector<2x16x32xf32> to vector<2x16x8xf32>
    %59 = vector.extract_strided_slice %38 {offsets = [0, 0, 8], sizes = [2, 16, 8], strides = [1, 1, 1]} : vector<2x16x32xf32> to vector<2x16x8xf32>
    "tpu.trace_start"() <{level = 10 : i32, message = "bqd,bkd->bqk"}> : () -> ()
    %cst_12 = arith.constant dense<0.000000e+00> : vector<2x16x16xf32>
    %60 = tpu.matmul %57, %58, %cst_12 {dimension_numbers = #tpu.dot_dimension_numbers<[2], [2], [1], [1], [0, 0, 0, 1, 1, 1], [0], [0]>} : vector<2x16x8xf32>, vector<2x16x8xf32>, vector<2x16x16xf32> -> vector<2x16x16xf32>
    "tpu.trace_stop"() : () -> ()
    %cst_13 = arith.constant dense<0xFF800000> : vector<2x16xf32>
    %61 = vector.multi_reduction <maximumf>, %60, %cst_13 [2] : vector<2x16x16xf32> to vector<2x16xf32>
    %62 = vector.shape_cast %61 : vector<2x16xf32> to vector<2x16x1xf32>
    %63 = vector.broadcast %62 : vector<2x16x1xf32> to vector<2x16x16xf32>
    %64 = arith.subf %60, %63 : vector<2x16x16xf32>
    %65 = math.exp %64 : vector<2x16x16xf32>
    %cst_14 = arith.constant dense<0.000000e+00> : vector<2x16xf32>
    %66 = vector.multi_reduction <add>, %65, %cst_14 [2] : vector<2x16x16xf32> to vector<2x16xf32>
    %67 = vector.shape_cast %66 : vector<2x16xf32> to vector<2x16x1xf32>
    %68 = vector.broadcast %67 : vector<2x16x1xf32> to vector<2x16x16xf32>
    %69 = arith.divf %65, %68 : vector<2x16x16xf32>
    "tpu.trace_start"() <{level = 10 : i32, message = "bqk,bkd->bqd"}> : () -> ()
    %cst_15 = arith.constant dense<0.000000e+00> : vector<2x16x8xf32>
    %70 = tpu.matmul %69, %59, %cst_15 {dimension_numbers = #tpu.dot_dimension_numbers<[2], [1], [1], [2], [0, 0, 0, 1, 1, 2], [0], [0]>} : vector<2x16x16xf32>, vector<2x16x8xf32>, vector<2x16x8xf32> -> vector<2x16x8xf32>
    "tpu.trace_stop"() : () -> ()
    %71 = vector.extract_strided_slice %34 {offsets = [0, 0, 16], sizes = [2, 16, 8], strides = [1, 1, 1]} : vector<2x16x32xf32> to vector<2x16x8xf32>
    %cst_16 = arith.constant 0.353553385 : f32
    %72 = vector.broadcast %cst_16 : f32 to vector<2x16x8xf32>
    %73 = arith.mulf %71, %72 : vector<2x16x8xf32>
    %74 = vector.extract_strided_slice %36 {offsets = [0, 0, 16], sizes = [2, 16, 8], strides = [1, 1, 1]} : vector<2x16x32xf32> to vector<2x16x8xf32>
    %75 = vector.extract_strided_slice %38 {offsets = [0, 0, 16], sizes = [2, 16, 8], strides = [1, 1, 1]} : vector<2x16x32xf32> to vector<2x16x8xf32>
    "tpu.trace_start"() <{level = 10 : i32, message = "bqd,bkd->bqk"}> : () -> ()
    %cst_17 = arith.constant dense<0.000000e+00> : vector<2x16x16xf32>
    %76 = tpu.matmul %73, %74, %cst_17 {dimension_numbers = #tpu.dot_dimension_numbers<[2], [2], [1], [1], [0, 0, 0, 1, 1, 1], [0], [0]>} : vector<2x16x8xf32>, vector<2x16x8xf32>, vector<2x16x16xf32> -> vector<2x16x16xf32>
    "tpu.trace_stop"() : () -> ()
    %cst_18 = arith.constant dense<0xFF800000> : vector<2x16xf32>
    %77 = vector.multi_reduction <maximumf>, %76, %cst_18 [2] : vector<2x16x16xf32> to vector<2x16xf32>
    %78 = vector.shape_cast %77 : vector<2x16xf32> to vector<2x16x1xf32>
    %79 = vector.broadcast %78 : vector<2x16x1xf32> to vector<2x16x16xf32>
    %80 = arith.subf %76, %79 : vector<2x16x16xf32>
    %81 = math.exp %80 : vector<2x16x16xf32>
    %cst_19 = arith.constant dense<0.000000e+00> : vector<2x16xf32>
    %82 = vector.multi_reduction <add>, %81, %cst_19 [2] : vector<2x16x16xf32> to vector<2x16xf32>
    %83 = vector.shape_cast %82 : vector<2x16xf32> to vector<2x16x1xf32>
    %84 = vector.broadcast %83 : vector<2x16x1xf32> to vector<2x16x16xf32>
    %85 = arith.divf %81, %84 : vector<2x16x16xf32>
    "tpu.trace_start"() <{level = 10 : i32, message = "bqk,bkd->bqd"}> : () -> ()
    %cst_20 = arith.constant dense<0.000000e+00> : vector<2x16x8xf32>
    %86 = tpu.matmul %85, %75, %cst_20 {dimension_numbers = #tpu.dot_dimension_numbers<[2], [1], [1], [2], [0, 0, 0, 1, 1, 2], [0], [0]>} : vector<2x16x16xf32>, vector<2x16x8xf32>, vector<2x16x8xf32> -> vector<2x16x8xf32>
    "tpu.trace_stop"() : () -> ()
    %87 = vector.extract_strided_slice %34 {offsets = [0, 0, 24], sizes = [2, 16, 8], strides = [1, 1, 1]} : vector<2x16x32xf32> to vector<2x16x8xf32>
    %cst_21 = arith.constant 0.353553385 : f32
    %88 = vector.broadcast %cst_21 : f32 to vector<2x16x8xf32>
    %89 = arith.mulf %87, %88 : vector<2x16x8xf32>
    %90 = vector.extract_strided_slice %36 {offsets = [0, 0, 24], sizes = [2, 16, 8], strides = [1, 1, 1]} : vector<2x16x32xf32> to vector<2x16x8xf32>
    %91 = vector.extract_strided_slice %38 {offsets = [0, 0, 24], sizes = [2, 16, 8], strides = [1, 1, 1]} : vector<2x16x32xf32> to vector<2x16x8xf32>
    "tpu.trace_start"() <{level = 10 : i32, message = "bqd,bkd->bqk"}> : () -> ()
    %cst_22 = arith.constant dense<0.000000e+00> : vector<2x16x16xf32>
    %92 = tpu.matmul %89, %90, %cst_22 {dimension_numbers = #tpu.dot_dimension_numbers<[2], [2], [1], [1], [0, 0, 0, 1, 1, 1], [0], [0]>} : vector<2x16x8xf32>, vector<2x16x8xf32>, vector<2x16x16xf32> -> vector<2x16x16xf32>
    "tpu.trace_stop"() : () -> ()
    %cst_23 = arith.constant dense<0xFF800000> : vector<2x16xf32>
    %93 = vector.multi_reduction <maximumf>, %92, %cst_23 [2] : vector<2x16x16xf32> to vector<2x16xf32>
    %94 = vector.shape_cast %93 : vector<2x16xf32> to vector<2x16x1xf32>
    %95 = vector.broadcast %94 : vector<2x16x1xf32> to vector<2x16x16xf32>
    %96 = arith.subf %92, %95 : vector<2x16x16xf32>
    %97 = math.exp %96 : vector<2x16x16xf32>
    %cst_24 = arith.constant dense<0.000000e+00> : vector<2x16xf32>
    %98 = vector.multi_reduction <add>, %97, %cst_24 [2] : vector<2x16x16xf32> to vector<2x16xf32>
    %99 = vector.shape_cast %98 : vector<2x16xf32> to vector<2x16x1xf32>
    %100 = vector.broadcast %99 : vector<2x16x1xf32> to vector<2x16x16xf32>
    %101 = arith.divf %97, %100 : vector<2x16x16xf32>
    "tpu.trace_start"() <{level = 10 : i32, message = "bqk,bkd->bqd"}> : () -> ()
    %cst_25 = arith.constant dense<0.000000e+00> : vector<2x16x8xf32>
    %102 = tpu.matmul %101, %91, %cst_25 {dimension_numbers = #tpu.dot_dimension_numbers<[2], [1], [1], [2], [0, 0, 0, 1, 1, 2], [0], [0]>} : vector<2x16x16xf32>, vector<2x16x8xf32>, vector<2x16x8xf32> -> vector<2x16x8xf32>
    "tpu.trace_stop"() : () -> ()
    %103 = tpu.concatenate %54, %70, %86, %102 in 2 : vector<2x16x8xf32>, vector<2x16x8xf32>, vector<2x16x8xf32>, vector<2x16x8xf32> -> vector<2x16x32xf32>
    %104 = vector.shape_cast %103 : vector<2x16x32xf32> to vector<32x32xf32>
    %cst_26 = arith.constant dense<0.000000e+00> : vector<32x32xf32>
    %105 = tpu.matmul %104, %17, %cst_26 {dimension_numbers = #tpu.dot_dimension_numbers<[1], [0], [0], [1], [0, 0, 1, 1], [], []>} : vector<32x32xf32>, vector<32x32xf32>, vector<32x32xf32> -> vector<32x32xf32>
    %106 = vector.broadcast %23 : vector<1x32xf32> to vector<32x32xf32>
    %107 = arith.addf %105, %106 : vector<32x32xf32>
    %108 = arith.addf %13, %107 : vector<32x32xf32>
    %cst_27 = arith.constant dense<0.000000e+00> : vector<32xf32>
    %109 = vector.multi_reduction <add>, %108, %cst_27 [1] : vector<32x32xf32> to vector<32xf32>
    %110 = vector.shape_cast %109 : vector<32xf32> to vector<32x1xf32>
    %cst_28 = arith.constant 3.200000e+01 : f32
    %111 = vector.broadcast %cst_28 : f32 to vector<32x1xf32>
    %112 = arith.divf %110, %111 : vector<32x1xf32>
    %113 = vector.broadcast %112 : vector<32x1xf32> to vector<32x32xf32>
    %114 = arith.subf %108, %113 : vector<32x32xf32>
    %115 = arith.mulf %114, %114 : vector<32x32xf32>
    %cst_29 = arith.constant dense<0.000000e+00> : vector<32xf32>
    %116 = vector.multi_reduction <add>, %115, %cst_29 [1] : vector<32x32xf32> to vector<32xf32>
    %117 = vector.shape_cast %116 : vector<32xf32> to vector<32x1xf32>
    %cst_30 = arith.constant 3.200000e+01 : f32
    %118 = vector.broadcast %cst_30 : f32 to vector<32x1xf32>
    %119 = arith.divf %117, %118 : vector<32x1xf32>
    %120 = vector.broadcast %112 : vector<32x1xf32> to vector<32x32xf32>
    %121 = arith.subf %108, %120 : vector<32x32xf32>
    %cst_31 = arith.constant 9.99999974E-6 : f32
    %122 = vector.broadcast %cst_31 : f32 to vector<32x1xf32>
    %123 = arith.addf %119, %122 : vector<32x1xf32>
    %124 = math.rsqrt %123 : vector<32x1xf32>
    %125 = vector.broadcast %124 : vector<32x1xf32> to vector<32x32xf32>
    %126 = arith.mulf %121, %125 : vector<32x32xf32>
    %127 = vector.broadcast %25 : vector<1x32xf32> to vector<32x32xf32>
    %128 = arith.mulf %126, %127 : vector<32x32xf32>
    %129 = vector.broadcast %26 : vector<1x32xf32> to vector<32x32xf32>
    %130 = arith.addf %128, %129 : vector<32x32xf32>
    %cst_32 = arith.constant dense<0.000000e+00> : vector<32x32xf32>
    %131 = tpu.matmul %130, %18, %cst_32 {dimension_numbers = #tpu.dot_dimension_numbers<[1], [0], [0], [1], [0, 0, 1, 1], [], []>} : vector<32x32xf32>, vector<32x32xf32>, vector<32x32xf32> -> vector<32x32xf32>
    %132 = vector.broadcast %24 : vector<1x32xf32> to vector<32x32xf32>
    %133 = arith.addf %131, %132 : vector<32x32xf32>
    %cst_33 = arith.constant 0.000000e+00 : f32
    %134 = vector.broadcast %cst_33 : f32 to vector<32x32xf32>
    %135 = arith.maximumf %133, %134 : vector<32x32xf32>
    %cst_34 = arith.constant dense<0.000000e+00> : vector<32x32xf32>
    %136 = tpu.matmul %135, %19, %cst_34 {dimension_numbers = #tpu.dot_dimension_numbers<[1], [0], [0], [1], [0, 0, 1, 1], [], []>} : vector<32x32xf32>, vector<32x32xf32>, vector<32x32xf32> -> vector<32x32xf32>
    %137 = vector.broadcast %27 : vector<1x32xf32> to vector<32x32xf32>
    %138 = arith.addf %136, %137 : vector<32x32xf32>
    %139 = arith.addf %130, %138 : vector<32x32xf32>
    %cst_35 = arith.constant dense<0.000000e+00> : vector<32xf32>
    %140 = vector.multi_reduction <add>, %139, %cst_35 [1] : vector<32x32xf32> to vector<32xf32>
    %141 = vector.shape_cast %140 : vector<32xf32> to vector<32x1xf32>
    %cst_36 = arith.constant 3.200000e+01 : f32
    %142 = vector.broadcast %cst_36 : f32 to vector<32x1xf32>
    %143 = arith.divf %141, %142 : vector<32x1xf32>
    %144 = vector.broadcast %143 : vector<32x1xf32> to vector<32x32xf32>
    %145 = arith.subf %139, %144 : vector<32x32xf32>
    %146 = arith.mulf %145, %145 : vector<32x32xf32>
    %cst_37 = arith.constant dense<0.000000e+00> : vector<32xf32>
    %147 = vector.multi_reduction <add>, %146, %cst_37 [1] : vector<32x32xf32> to vector<32xf32>
    %148 = vector.shape_cast %147 : vector<32xf32> to vector<32x1xf32>
    %cst_38 = arith.constant 3.200000e+01 : f32
    %149 = vector.broadcast %cst_38 : f32 to vector<32x1xf32>
    %150 = arith.divf %148, %149 : vector<32x1xf32>
    %151 = vector.broadcast %143 : vector<32x1xf32> to vector<32x32xf32>
    %152 = arith.subf %139, %151 : vector<32x32xf32>
    %cst_39 = arith.constant 9.99999974E-6 : f32
    %153 = vector.broadcast %cst_39 : f32 to vector<32x1xf32>
    %154 = arith.addf %150, %153 : vector<32x1xf32>
    %155 = math.rsqrt %154 : vector<32x1xf32>
    %156 = vector.broadcast %155 : vector<32x1xf32> to vector<32x32xf32>
    %157 = arith.mulf %152, %156 : vector<32x32xf32>
    %158 = vector.broadcast %28 : vector<1x32xf32> to vector<32x32xf32>
    %159 = arith.mulf %157, %158 : vector<32x32xf32>
    %160 = vector.broadcast %29 : vector<1x32xf32> to vector<32x32xf32>
    %161 = arith.addf %159, %160 : vector<32x32xf32>
    %162 = vector.extract_strided_slice %0 {offsets = [1, 0, 0], sizes = [1, 66, 160], strides = [1, 1, 1]} : vector<2x66x160xf32> to vector<1x66x160xf32>
    %163 = vector.shape_cast %162 : vector<1x66x160xf32> to vector<66x160xf32>
    %164 = vector.extract_strided_slice %163 {offsets = [0, 0], sizes = [32, 96], strides = [1, 1]} : vector<66x160xf32> to vector<32x96xf32>
    %165 = vector.extract_strided_slice %163 {offsets = [0, 96], sizes = [32, 32], strides = [1, 1]} : vector<66x160xf32> to vector<32x32xf32>
    %166 = vector.extract_strided_slice %163 {offsets = [0, 128], sizes = [32, 32], strides = [1, 1]} : vector<66x160xf32> to vector<32x32xf32>
    %167 = vector.extract_strided_slice %163 {offsets = [32, 0], sizes = [32, 32], strides = [1, 1]} : vector<66x160xf32> to vector<32x32xf32>
    %168 = vector.extract_strided_slice %163 {offsets = [64, 0], sizes = [1, 160], strides = [1, 1]} : vector<66x160xf32> to vector<1x160xf32>
    %169 = vector.extract_strided_slice %163 {offsets = [65, 0], sizes = [1, 160], strides = [1, 1]} : vector<66x160xf32> to vector<1x160xf32>
    %170 = vector.extract_strided_slice %168 {offsets = [0, 0], sizes = [1, 96], strides = [1, 1]} : vector<1x160xf32> to vector<1x96xf32>
    %171 = vector.extract_strided_slice %168 {offsets = [0, 96], sizes = [1, 32], strides = [1, 1]} : vector<1x160xf32> to vector<1x32xf32>
    %172 = vector.extract_strided_slice %168 {offsets = [0, 128], sizes = [1, 32], strides = [1, 1]} : vector<1x160xf32> to vector<1x32xf32>
    %173 = vector.extract_strided_slice %169 {offsets = [0, 0], sizes = [1, 32], strides = [1, 1]} : vector<1x160xf32> to vector<1x32xf32>
    %174 = vector.extract_strided_slice %169 {offsets = [0, 32], sizes = [1, 32], strides = [1, 1]} : vector<1x160xf32> to vector<1x32xf32>
    %175 = vector.extract_strided_slice %169 {offsets = [0, 64], sizes = [1, 32], strides = [1, 1]} : vector<1x160xf32> to vector<1x32xf32>
    %176 = vector.extract_strided_slice %169 {offsets = [0, 96], sizes = [1, 32], strides = [1, 1]} : vector<1x160xf32> to vector<1x32xf32>
    %177 = vector.extract_strided_slice %169 {offsets = [0, 128], sizes = [1, 32], strides = [1, 1]} : vector<1x160xf32> to vector<1x32xf32>
    %cst_40 = arith.constant dense<0.000000e+00> : vector<32x96xf32>
    %178 = tpu.matmul %161, %164, %cst_40 {dimension_numbers = #tpu.dot_dimension_numbers<[1], [0], [0], [1], [0, 0, 1, 1], [], []>} : vector<32x32xf32>, vector<32x96xf32>, vector<32x96xf32> -> vector<32x96xf32>
    %179 = vector.broadcast %170 : vector<1x96xf32> to vector<32x96xf32>
    %180 = arith.addf %178, %179 : vector<32x96xf32>
    %181 = vector.extract_strided_slice %180 {offsets = [0, 0], sizes = [32, 32], strides = [1, 1]} : vector<32x96xf32> to vector<32x32xf32>
    %182 = vector.shape_cast %181 : vector<32x32xf32> to vector<2x16x32xf32>
    %183 = vector.extract_strided_slice %180 {offsets = [0, 32], sizes = [32, 32], strides = [1, 1]} : vector<32x96xf32> to vector<32x32xf32>
    %184 = vector.shape_cast %183 : vector<32x32xf32> to vector<2x16x32xf32>
    %185 = vector.extract_strided_slice %180 {offsets = [0, 64], sizes = [32, 32], strides = [1, 1]} : vector<32x96xf32> to vector<32x32xf32>
    %186 = vector.shape_cast %185 : vector<32x32xf32> to vector<2x16x32xf32>
    %187 = vector.extract_strided_slice %182 {offsets = [0, 0, 0], sizes = [2, 16, 8], strides = [1, 1, 1]} : vector<2x16x32xf32> to vector<2x16x8xf32>
    %cst_41 = arith.constant 0.353553385 : f32
    %188 = vector.broadcast %cst_41 : f32 to vector<2x16x8xf32>
    %189 = arith.mulf %187, %188 : vector<2x16x8xf32>
    %190 = vector.extract_strided_slice %184 {offsets = [0, 0, 0], sizes = [2, 16, 8], strides = [1, 1, 1]} : vector<2x16x32xf32> to vector<2x16x8xf32>
    %191 = vector.extract_strided_slice %186 {offsets = [0, 0, 0], sizes = [2, 16, 8], strides = [1, 1, 1]} : vector<2x16x32xf32> to vector<2x16x8xf32>
    "tpu.trace_start"() <{level = 10 : i32, message = "bqd,bkd->bqk"}> : () -> ()
    %cst_42 = arith.constant dense<0.000000e+00> : vector<2x16x16xf32>
    %192 = tpu.matmul %189, %190, %cst_42 {dimension_numbers = #tpu.dot_dimension_numbers<[2], [2], [1], [1], [0, 0, 0, 1, 1, 1], [0], [0]>} : vector<2x16x8xf32>, vector<2x16x8xf32>, vector<2x16x16xf32> -> vector<2x16x16xf32>
    "tpu.trace_stop"() : () -> ()
    %cst_43 = arith.constant dense<0xFF800000> : vector<2x16xf32>
    %193 = vector.multi_reduction <maximumf>, %192, %cst_43 [2] : vector<2x16x16xf32> to vector<2x16xf32>
    %194 = vector.shape_cast %193 : vector<2x16xf32> to vector<2x16x1xf32>
    %195 = vector.broadcast %194 : vector<2x16x1xf32> to vector<2x16x16xf32>
    %196 = arith.subf %192, %195 : vector<2x16x16xf32>
    %197 = math.exp %196 : vector<2x16x16xf32>
    %cst_44 = arith.constant dense<0.000000e+00> : vector<2x16xf32>
    %198 = vector.multi_reduction <add>, %197, %cst_44 [2] : vector<2x16x16xf32> to vector<2x16xf32>
    %199 = vector.shape_cast %198 : vector<2x16xf32> to vector<2x16x1xf32>
    %200 = vector.broadcast %199 : vector<2x16x1xf32> to vector<2x16x16xf32>
    %201 = arith.divf %197, %200 : vector<2x16x16xf32>
    "tpu.trace_start"() <{level = 10 : i32, message = "bqk,bkd->bqd"}> : () -> ()
    %cst_45 = arith.constant dense<0.000000e+00> : vector<2x16x8xf32>
    %202 = tpu.matmul %201, %191, %cst_45 {dimension_numbers = #tpu.dot_dimension_numbers<[2], [1], [1], [2], [0, 0, 0, 1, 1, 2], [0], [0]>} : vector<2x16x16xf32>, vector<2x16x8xf32>, vector<2x16x8xf32> -> vector<2x16x8xf32>
    "tpu.trace_stop"() : () -> ()
    %203 = vector.extract_strided_slice %182 {offsets = [0, 0, 8], sizes = [2, 16, 8], strides = [1, 1, 1]} : vector<2x16x32xf32> to vector<2x16x8xf32>
    %cst_46 = arith.constant 0.353553385 : f32
    %204 = vector.broadcast %cst_46 : f32 to vector<2x16x8xf32>
    %205 = arith.mulf %203, %204 : vector<2x16x8xf32>
    %206 = vector.extract_strided_slice %184 {offsets = [0, 0, 8], sizes = [2, 16, 8], strides = [1, 1, 1]} : vector<2x16x32xf32> to vector<2x16x8xf32>
    %207 = vector.extract_strided_slice %186 {offsets = [0, 0, 8], sizes = [2, 16, 8], strides = [1, 1, 1]} : vector<2x16x32xf32> to vector<2x16x8xf32>
    "tpu.trace_start"() <{level = 10 : i32, message = "bqd,bkd->bqk"}> : () -> ()
    %cst_47 = arith.constant dense<0.000000e+00> : vector<2x16x16xf32>
    %208 = tpu.matmul %205, %206, %cst_47 {dimension_numbers = #tpu.dot_dimension_numbers<[2], [2], [1], [1], [0, 0, 0, 1, 1, 1], [0], [0]>} : vector<2x16x8xf32>, vector<2x16x8xf32>, vector<2x16x16xf32> -> vector<2x16x16xf32>
    "tpu.trace_stop"() : () -> ()
    %cst_48 = arith.constant dense<0xFF800000> : vector<2x16xf32>
    %209 = vector.multi_reduction <maximumf>, %208, %cst_48 [2] : vector<2x16x16xf32> to vector<2x16xf32>
    %210 = vector.shape_cast %209 : vector<2x16xf32> to vector<2x16x1xf32>
    %211 = vector.broadcast %210 : vector<2x16x1xf32> to vector<2x16x16xf32>
    %212 = arith.subf %208, %211 : vector<2x16x16xf32>
    %213 = math.exp %212 : vector<2x16x16xf32>
    %cst_49 = arith.constant dense<0.000000e+00> : vector<2x16xf32>
    %214 = vector.multi_reduction <add>, %213, %cst_49 [2] : vector<2x16x16xf32> to vector<2x16xf32>
    %215 = vector.shape_cast %214 : vector<2x16xf32> to vector<2x16x1xf32>
    %216 = vector.broadcast %215 : vector<2x16x1xf32> to vector<2x16x16xf32>
    %217 = arith.divf %213, %216 : vector<2x16x16xf32>
    "tpu.trace_start"() <{level = 10 : i32, message = "bqk,bkd->bqd"}> : () -> ()
    %cst_50 = arith.constant dense<0.000000e+00> : vector<2x16x8xf32>
    %218 = tpu.matmul %217, %207, %cst_50 {dimension_numbers = #tpu.dot_dimension_numbers<[2], [1], [1], [2], [0, 0, 0, 1, 1, 2], [0], [0]>} : vector<2x16x16xf32>, vector<2x16x8xf32>, vector<2x16x8xf32> -> vector<2x16x8xf32>
    "tpu.trace_stop"() : () -> ()
    %219 = vector.extract_strided_slice %182 {offsets = [0, 0, 16], sizes = [2, 16, 8], strides = [1, 1, 1]} : vector<2x16x32xf32> to vector<2x16x8xf32>
    %cst_51 = arith.constant 0.353553385 : f32
    %220 = vector.broadcast %cst_51 : f32 to vector<2x16x8xf32>
    %221 = arith.mulf %219, %220 : vector<2x16x8xf32>
    %222 = vector.extract_strided_slice %184 {offsets = [0, 0, 16], sizes = [2, 16, 8], strides = [1, 1, 1]} : vector<2x16x32xf32> to vector<2x16x8xf32>
    %223 = vector.extract_strided_slice %186 {offsets = [0, 0, 16], sizes = [2, 16, 8], strides = [1, 1, 1]} : vector<2x16x32xf32> to vector<2x16x8xf32>
    "tpu.trace_start"() <{level = 10 : i32, message = "bqd,bkd->bqk"}> : () -> ()
    %cst_52 = arith.constant dense<0.000000e+00> : vector<2x16x16xf32>
    %224 = tpu.matmul %221, %222, %cst_52 {dimension_numbers = #tpu.dot_dimension_numbers<[2], [2], [1], [1], [0, 0, 0, 1, 1, 1], [0], [0]>} : vector<2x16x8xf32>, vector<2x16x8xf32>, vector<2x16x16xf32> -> vector<2x16x16xf32>
    "tpu.trace_stop"() : () -> ()
    %cst_53 = arith.constant dense<0xFF800000> : vector<2x16xf32>
    %225 = vector.multi_reduction <maximumf>, %224, %cst_53 [2] : vector<2x16x16xf32> to vector<2x16xf32>
    %226 = vector.shape_cast %225 : vector<2x16xf32> to vector<2x16x1xf32>
    %227 = vector.broadcast %226 : vector<2x16x1xf32> to vector<2x16x16xf32>
    %228 = arith.subf %224, %227 : vector<2x16x16xf32>
    %229 = math.exp %228 : vector<2x16x16xf32>
    %cst_54 = arith.constant dense<0.000000e+00> : vector<2x16xf32>
    %230 = vector.multi_reduction <add>, %229, %cst_54 [2] : vector<2x16x16xf32> to vector<2x16xf32>
    %231 = vector.shape_cast %230 : vector<2x16xf32> to vector<2x16x1xf32>
    %232 = vector.broadcast %231 : vector<2x16x1xf32> to vector<2x16x16xf32>
    %233 = arith.divf %229, %232 : vector<2x16x16xf32>
    "tpu.trace_start"() <{level = 10 : i32, message = "bqk,bkd->bqd"}> : () -> ()
    %cst_55 = arith.constant dense<0.000000e+00> : vector<2x16x8xf32>
    %234 = tpu.matmul %233, %223, %cst_55 {dimension_numbers = #tpu.dot_dimension_numbers<[2], [1], [1], [2], [0, 0, 0, 1, 1, 2], [0], [0]>} : vector<2x16x16xf32>, vector<2x16x8xf32>, vector<2x16x8xf32> -> vector<2x16x8xf32>
    "tpu.trace_stop"() : () -> ()
    %235 = vector.extract_strided_slice %182 {offsets = [0, 0, 24], sizes = [2, 16, 8], strides = [1, 1, 1]} : vector<2x16x32xf32> to vector<2x16x8xf32>
    %cst_56 = arith.constant 0.353553385 : f32
    %236 = vector.broadcast %cst_56 : f32 to vector<2x16x8xf32>
    %237 = arith.mulf %235, %236 : vector<2x16x8xf32>
    %238 = vector.extract_strided_slice %184 {offsets = [0, 0, 24], sizes = [2, 16, 8], strides = [1, 1, 1]} : vector<2x16x32xf32> to vector<2x16x8xf32>
    %239 = vector.extract_strided_slice %186 {offsets = [0, 0, 24], sizes = [2, 16, 8], strides = [1, 1, 1]} : vector<2x16x32xf32> to vector<2x16x8xf32>
    "tpu.trace_start"() <{level = 10 : i32, message = "bqd,bkd->bqk"}> : () -> ()
    %cst_57 = arith.constant dense<0.000000e+00> : vector<2x16x16xf32>
    %240 = tpu.matmul %237, %238, %cst_57 {dimension_numbers = #tpu.dot_dimension_numbers<[2], [2], [1], [1], [0, 0, 0, 1, 1, 1], [0], [0]>} : vector<2x16x8xf32>, vector<2x16x8xf32>, vector<2x16x16xf32> -> vector<2x16x16xf32>
    "tpu.trace_stop"() : () -> ()
    %cst_58 = arith.constant dense<0xFF800000> : vector<2x16xf32>
    %241 = vector.multi_reduction <maximumf>, %240, %cst_58 [2] : vector<2x16x16xf32> to vector<2x16xf32>
    %242 = vector.shape_cast %241 : vector<2x16xf32> to vector<2x16x1xf32>
    %243 = vector.broadcast %242 : vector<2x16x1xf32> to vector<2x16x16xf32>
    %244 = arith.subf %240, %243 : vector<2x16x16xf32>
    %245 = math.exp %244 : vector<2x16x16xf32>
    %cst_59 = arith.constant dense<0.000000e+00> : vector<2x16xf32>
    %246 = vector.multi_reduction <add>, %245, %cst_59 [2] : vector<2x16x16xf32> to vector<2x16xf32>
    %247 = vector.shape_cast %246 : vector<2x16xf32> to vector<2x16x1xf32>
    %248 = vector.broadcast %247 : vector<2x16x1xf32> to vector<2x16x16xf32>
    %249 = arith.divf %245, %248 : vector<2x16x16xf32>
    "tpu.trace_start"() <{level = 10 : i32, message = "bqk,bkd->bqd"}> : () -> ()
    %cst_60 = arith.constant dense<0.000000e+00> : vector<2x16x8xf32>
    %250 = tpu.matmul %249, %239, %cst_60 {dimension_numbers = #tpu.dot_dimension_numbers<[2], [1], [1], [2], [0, 0, 0, 1, 1, 2], [0], [0]>} : vector<2x16x16xf32>, vector<2x16x8xf32>, vector<2x16x8xf32> -> vector<2x16x8xf32>
    "tpu.trace_stop"() : () -> ()
    %251 = tpu.concatenate %202, %218, %234, %250 in 2 : vector<2x16x8xf32>, vector<2x16x8xf32>, vector<2x16x8xf32>, vector<2x16x8xf32> -> vector<2x16x32xf32>
    %252 = vector.shape_cast %251 : vector<2x16x32xf32> to vector<32x32xf32>
    %cst_61 = arith.constant dense<0.000000e+00> : vector<32x32xf32>
    %253 = tpu.matmul %252, %165, %cst_61 {dimension_numbers = #tpu.dot_dimension_numbers<[1], [0], [0], [1], [0, 0, 1, 1], [], []>} : vector<32x32xf32>, vector<32x32xf32>, vector<32x32xf32> -> vector<32x32xf32>
    %254 = vector.broadcast %171 : vector<1x32xf32> to vector<32x32xf32>
    %255 = arith.addf %253, %254 : vector<32x32xf32>
    %256 = arith.addf %161, %255 : vector<32x32xf32>
    %cst_62 = arith.constant dense<0.000000e+00> : vector<32xf32>
    %257 = vector.multi_reduction <add>, %256, %cst_62 [1] : vector<32x32xf32> to vector<32xf32>
    %258 = vector.shape_cast %257 : vector<32xf32> to vector<32x1xf32>
    %cst_63 = arith.constant 3.200000e+01 : f32
    %259 = vector.broadcast %cst_63 : f32 to vector<32x1xf32>
    %260 = arith.divf %258, %259 : vector<32x1xf32>
    %261 = vector.broadcast %260 : vector<32x1xf32> to vector<32x32xf32>
    %262 = arith.subf %256, %261 : vector<32x32xf32>
    %263 = arith.mulf %262, %262 : vector<32x32xf32>
    %cst_64 = arith.constant dense<0.000000e+00> : vector<32xf32>
    %264 = vector.multi_reduction <add>, %263, %cst_64 [1] : vector<32x32xf32> to vector<32xf32>
    %265 = vector.shape_cast %264 : vector<32xf32> to vector<32x1xf32>
    %cst_65 = arith.constant 3.200000e+01 : f32
    %266 = vector.broadcast %cst_65 : f32 to vector<32x1xf32>
    %267 = arith.divf %265, %266 : vector<32x1xf32>
    %268 = vector.broadcast %260 : vector<32x1xf32> to vector<32x32xf32>
    %269 = arith.subf %256, %268 : vector<32x32xf32>
    %cst_66 = arith.constant 9.99999974E-6 : f32
    %270 = vector.broadcast %cst_66 : f32 to vector<32x1xf32>
    %271 = arith.addf %267, %270 : vector<32x1xf32>
    %272 = math.rsqrt %271 : vector<32x1xf32>
    %273 = vector.broadcast %272 : vector<32x1xf32> to vector<32x32xf32>
    %274 = arith.mulf %269, %273 : vector<32x32xf32>
    %275 = vector.broadcast %173 : vector<1x32xf32> to vector<32x32xf32>
    %276 = arith.mulf %274, %275 : vector<32x32xf32>
    %277 = vector.broadcast %174 : vector<1x32xf32> to vector<32x32xf32>
    %278 = arith.addf %276, %277 : vector<32x32xf32>
    %cst_67 = arith.constant dense<0.000000e+00> : vector<32x32xf32>
    %279 = tpu.matmul %278, %166, %cst_67 {dimension_numbers = #tpu.dot_dimension_numbers<[1], [0], [0], [1], [0, 0, 1, 1], [], []>} : vector<32x32xf32>, vector<32x32xf32>, vector<32x32xf32> -> vector<32x32xf32>
    %280 = vector.broadcast %172 : vector<1x32xf32> to vector<32x32xf32>
    %281 = arith.addf %279, %280 : vector<32x32xf32>
    %cst_68 = arith.constant 0.000000e+00 : f32
    %282 = vector.broadcast %cst_68 : f32 to vector<32x32xf32>
    %283 = arith.maximumf %281, %282 : vector<32x32xf32>
    %cst_69 = arith.constant dense<0.000000e+00> : vector<32x32xf32>
    %284 = tpu.matmul %283, %167, %cst_69 {dimension_numbers = #tpu.dot_dimension_numbers<[1], [0], [0], [1], [0, 0, 1, 1], [], []>} : vector<32x32xf32>, vector<32x32xf32>, vector<32x32xf32> -> vector<32x32xf32>
    %285 = vector.broadcast %175 : vector<1x32xf32> to vector<32x32xf32>
    %286 = arith.addf %284, %285 : vector<32x32xf32>
    %287 = arith.addf %278, %286 : vector<32x32xf32>
    %cst_70 = arith.constant dense<0.000000e+00> : vector<32xf32>
    %288 = vector.multi_reduction <add>, %287, %cst_70 [1] : vector<32x32xf32> to vector<32xf32>
    %289 = vector.shape_cast %288 : vector<32xf32> to vector<32x1xf32>
    %cst_71 = arith.constant 3.200000e+01 : f32
    %290 = vector.broadcast %cst_71 : f32 to vector<32x1xf32>
    %291 = arith.divf %289, %290 : vector<32x1xf32>
    %292 = vector.broadcast %291 : vector<32x1xf32> to vector<32x32xf32>
    %293 = arith.subf %287, %292 : vector<32x32xf32>
    %294 = arith.mulf %293, %293 : vector<32x32xf32>
    %cst_72 = arith.constant dense<0.000000e+00> : vector<32xf32>
    %295 = vector.multi_reduction <add>, %294, %cst_72 [1] : vector<32x32xf32> to vector<32xf32>
    %296 = vector.shape_cast %295 : vector<32xf32> to vector<32x1xf32>
    %cst_73 = arith.constant 3.200000e+01 : f32
    %297 = vector.broadcast %cst_73 : f32 to vector<32x1xf32>
    %298 = arith.divf %296, %297 : vector<32x1xf32>
    %299 = vector.broadcast %291 : vector<32x1xf32> to vector<32x32xf32>
    %300 = arith.subf %287, %299 : vector<32x32xf32>
    %cst_74 = arith.constant 9.99999974E-6 : f32
    %301 = vector.broadcast %cst_74 : f32 to vector<32x1xf32>
    %302 = arith.addf %298, %301 : vector<32x1xf32>
    %303 = math.rsqrt %302 : vector<32x1xf32>
    %304 = vector.broadcast %303 : vector<32x1xf32> to vector<32x32xf32>
    %305 = arith.mulf %300, %304 : vector<32x32xf32>
    %306 = vector.broadcast %176 : vector<1x32xf32> to vector<32x32xf32>
    %307 = arith.mulf %305, %306 : vector<32x32xf32>
    %308 = vector.broadcast %177 : vector<1x32xf32> to vector<32x32xf32>
    %309 = arith.addf %307, %308 : vector<32x32xf32>
    %310 = vector.shape_cast %309 : vector<32x32xf32> to vector<2x16x32xf32>
    %cst_75 = arith.constant dense<0.000000e+00> : vector<2x32xf32>
    %311 = vector.multi_reduction <add>, %310, %cst_75 [1] : vector<2x16x32xf32> to vector<2x32xf32>
    %cst_76 = arith.constant 1.600000e+01 : f32
    %312 = vector.broadcast %cst_76 : f32 to vector<2x32xf32>
    %313 = arith.divf %311, %312 : vector<2x32xf32>
    %cst_77 = arith.constant dense<0.000000e+00> : vector<2x64xf32>
    %314 = tpu.matmul %313, %4, %cst_77 {dimension_numbers = #tpu.dot_dimension_numbers<[1], [0], [0], [1], [0, 0, 1, 1], [], []>} : vector<2x32xf32>, vector<32x64xf32>, vector<2x64xf32> -> vector<2x64xf32>
    %315 = vector.broadcast %5 : vector<1x64xf32> to vector<2x64xf32>
    %316 = arith.addf %314, %315 : vector<2x64xf32>
    %cst_78 = arith.constant 0.000000e+00 : f32
    %317 = vector.broadcast %cst_78 : f32 to vector<2x64xf32>
    %318 = arith.maximumf %316, %317 : vector<2x64xf32>
    %319 = vector.broadcast %6 : vector<1x64xf32> to vector<2x64xf32>
    %320 = arith.mulf %318, %319 : vector<2x64xf32>
    %cst_79 = arith.constant dense<0.000000e+00> : vector<2xf32>
    %321 = vector.multi_reduction <add>, %320, %cst_79 [1] : vector<2x64xf32> to vector<2xf32>
    %322 = vector.shape_cast %321 : vector<2xf32> to vector<2x1xf32>
    %323 = vector.broadcast %7 : vector<1x1xf32> to vector<2x1xf32>
    %324 = arith.addf %322, %323 : vector<2x1xf32>
    %c0_80 = arith.constant 0 : index
    %c0_81 = arith.constant 0 : index
    %325 = vector.load %arg4[%c0_80, %c0_81] : memref<2x1xf32, #tpu.memory_space<vmem>>, vector<2x1xf32>
    tpu.vector_store %arg4[%c0_80, %c0_81], %324 {strides = array<i32>} : memref<2x1xf32, #tpu.memory_space<vmem>>, vector<2x1xf32>,
    return
  }
  func.func @transform_0(%arg0: i32) -> (i32, i32) {
    %c0_i32 = arith.constant 0 : i32
    %c0_i32_0 = arith.constant 0 : i32
    %c0_i32_1 = arith.constant 0 : i32
    return %c0_i32, %c0_i32_0 : i32, i32
  }
  func.func @transform_1(%arg0: i32) -> (i32, i32, i32) {
    %c0_i32 = arith.constant 0 : i32
    %c0_i32_0 = arith.constant 0 : i32
    %c0_i32_1 = arith.constant 0 : i32
    %c0_i32_2 = arith.constant 0 : i32
    return %c0_i32, %c0_i32_0, %c0_i32_1 : i32, i32, i32
  }
  func.func @transform_2(%arg0: i32) -> (i32, i32) {
    %c0_i32 = arith.constant 0 : i32
    %c0_i32_0 = arith.constant 0 : i32
    %c0_i32_1 = arith.constant 0 : i32
    return %c0_i32, %c0_i32_0 : i32, i32
  }
  func.func @transform_3(%arg0: i32) -> (i32, i32) {
    %c0_i32 = arith.constant 0 : i32
    %c0_i32_0 = arith.constant 0 : i32
    %c0_i32_1 = arith.constant 0 : i32
    return %c0_i32, %c0_i32_0 : i32, i32
  }
}

</mosaic_0001>

<bundles_post_ra>
// kernel: tpu_custom_call.1
= control target key start
LH: loop header
LB: loop body
LE: loop exit
PB: predicated region body
PF: predicated region fallthrough
CT: control target
= control target key end

     0   :  { %v5549_v0 = vmov 0   ;;  %v71_v9 = vlaneseq  ;;  %vm91_vm0 = vcmask 261120   ;;  %s5550_s4 = smov 96   ;;  %vm199_vm1 = vcmask 64512   ;;  %s5551_s5 = smov 64   ;;  %s6484_s0 = inlined_call_operand.vmem [shape: f32[32,1], index: 0, kind: input, shape index: {}]   ;;  %s6485_s1 = inlined_call_operand.vmem [shape: f32[2,66,160], index: 1, kind: input, shape index: {}]   ;;  %s6486_s2 = inlined_call_operand.vmem [shape: f32[37,64], index: 2, kind: input, shape index: {}]   ;;  %s6487_s3 = inlined_call_operand.vmem [shape: f32[2,1], index: 3, kind: output, shape index: {}]  }
   0x1   :  { %5384 = vset.pattern.permute.xlu0 %v5549_v0  ;;  %v47_v1 = vld [vmem:[%s6484_s0] sm:$0xff]  ;;  %5385 = vset.pattern.permute.xlu1 %v5549_v0  ;;  %v49_v2 = vld [vmem:[%s6484_s0 + $0x10] sm:$0xff]  ;;  %v48_v4 = vld [vmem:[%s6484_s0 + $0x8] sm:$0xff]  ;;  %vm376_vm2 = vcmask 130048   ;;  %s5552_s6 = smov 88   ;;  %s5553_s7 = smov 120  }
   0x2   :  { %53 = vperm.xlu0 %5384, %v47_v1   ;;  %63 = vperm.xlu1 %5385, %v49_v2   ;;  %v5596_v3 = vld [vmem:[%s6485_s1 + $0x30] sm:$0xff]  ;;  %v50_v5 = vld [vmem:[%s6484_s0 + $0x18] sm:$0xff]  ;;  %v5608_v6 = vld [vmem:[%s6485_s1 + $0x20] sm:$0xff]  ;;  %v5627_v10 = vshrl.u32 %v71_v9, 7  ;;  %s5554_s8 = smov 56   ;;  %s5555_s9 = smov 80  }
   0x3   :  { %5019 = vmatprep.subr.mxu0 %v5596_v3  ;;  %v5615_v7 = vld [vmem:[%s6485_s1 + $0x10] sm:$0xff]  ;;  %v5621_v8 = vld [vmem:[%s6485_s1] sm:$0xff]  ;;  %s5556_s10 = smov 112   ;;  %s5557_s11 = smov 48   ;;  %vm1851_vm3 = vcmask 195584   ;;  %vm4586_vm4 = vcmask 1045504  }
   0x4   :  { %5020 = vmatpush3.msra.mxu0 %v5596_v3  ;;  %v5630_v11 = vsub.s32 0, %v5627_v10  ;;  %v42_v12 = vld [vmem:[%s6486_s2] sm:$0xff]  ;;  %v5636_v13 = vsub.s32 1, %v5627_v10  ;;  %s5558_s12 = smov 72   ;;  %s5559_s13 = smov 104   ;;  %vm5566_vm5 = vmmov 0  }
   0x5   :  { %5021 = vmatprep.subr.mxu0 %v5608_v6  ;;  %v26_v28 = vld [vmem:[%s6485_s1 + $0x80] sm:$0x3]  ;;  %s5560_s14 = smov 40   ;;  %s5561_s15 = smov 32   ;;  %vm4579_vm6 = vcmask 1041409   ;;  %vm4678_vm7 = vcmask 517120  }
   0x6   :  { %58 = vperm.xlu0 %5384, %v48_v4   ;;  %68 = vperm.xlu1 %5385, %v50_v5   ;;  %v74_v14 = vrot.slane %v42_v12, %v5630_v11  ;;  %v82_v15 = vrot.slane %v42_v12, %v5636_v13  ;;  %v5660_v29 = vrot.slane %v26_v28, %v5630_v11  ;;  %s5562_s16 = smov 8   ;;  %s5563_s17 = smov 16   ;;  %vm4687_vm8 = vcmask 1024  }
   0x7   :  { %5022 = vmatpush3.msra.mxu0 %v5608_v6  ;;  %s5564_s18 = smov 24  }
   0x8   :  { %5023 = vmatprep.subr.mxu0 %v5615_v7 }
   0x9   :  { %5024 = vmatpush3.msra.mxu0 %v5615_v7 }
   0xa   :  { %5025 = vmatprep.subr.mxu0 %v5621_v8 }
   0xb   :  { %5026 = vmatpush3.msra.mxu0 %v5621_v8 }
  0x7d   :  { %v54_v16 = vpop.permute.xlu0 %53  ;;  %v64_v17 = vpop.permute.xlu1 %63 }
  0x7e   :  { %v75_v18 = vmul.f32 %v74_v14, %v54_v16  ;;  %v77_v19 = vmul.f32 %v74_v14, %v64_v17 }
  0x80   :  { %v5640_v20 = vadd.f32 %v82_v15, %v75_v18  ;;  %v5644_v25 = vadd.f32 %v82_v15, %v77_v19 }
  0x81   :  { %v59_v21 = vpop.permute.xlu0 %58  ;;  %v69_v22 = vpop.permute.xlu1 %68 }
  0x82   :  { %v76_v23 = vmul.f32 %v74_v14, %v59_v21  ;;  %5027 = vmatprep.mubr.msk.f32.mxu0 %vm91_vm0, %v5640_v20  ;;  %v78_v24 = vmul.f32 %v74_v14, %v69_v22 }
  0x84   :  { %v5646_v26 = vadd.f32 %v82_v15, %v76_v23  ;;  %v5648_v27 = vadd.f32 %v82_v15, %v78_v24 }
  0x86   :  { %5028 = vmatmul.mubr.msk.f32.vlgmr.msra.gmra.mxu0 %vm91_vm0, %v5646_v26 }
  0x87   :  { %5030 = vmatprep.mubr.msk.f32.mxu0 %vm91_vm0, %v5644_v25 }
  0x8a   :  { %5031 = vmatmul.mubr.msk.f32.gmra.mxu0 %vm91_vm0, %v5648_v27 }
 0x146   :  { %v5029_v30 = vpop.f32.mrf.mxu0 }
 0x147   :  { %v5663_v31 = vadd.f32 %v5029_v30, %v5660_v29 }
 0x148   :  { %v170_v32 = vpop.f32.mrf.mxu0 }
 0x149   :  { %v5666_v33 = vadd.f32 %v170_v32, %v5660_v29  ;;  %197 = vrot.lane.b32.xlu0 %v5663_v31, %s5550_s4  ;;  %v5699_v44 = vmul.f32 0.35355338, %v5663_v31 }
 0x14a   :  { %v5032_v34 = vpop.f32.mrf.mxu0 }
 0x14b   :  { %v5671_v35 = vadd.f32 %v5032_v34, %v5660_v29  ;;  %195 = vrot.lane.b32.xlu1 %v5666_v33, %s5550_s4  ;;  %v5676_v36 = vmul.f32 0.35355338, %v5666_v33 }
 0x14c   :  { %v180_v37 = vpop.f32.mrf.mxu0 }
 0x14d   :  { %289 = vrot.lane.b32.xlu0 %v5671_v35, %s5550_s4  ;;  %5037 = vmatprep.mubr.msk.f32.mxu1 %vm199_vm1, %v5676_v36  ;;  %v5683_v38 = vadd.f32 %v180_v37, %v5660_v29  ;;  %v5706_v45 = vmul.f32 0.35355338, %v5671_v35 }
 0x14f   :  { %287 = vrot.lane.b32.xlu1 %v5683_v38, %s5550_s4  ;;  %v5688_v39 = vmul.f32 0.35355338, %v5683_v38 }
 0x151   :  { %5044 = vmatprep.mubr.msk.f32.mxu0 %vm199_vm1, %v5688_v39 }
 0x1bb   :  { %v198_v40 = vpop.permute.xlu0 %197 }
 0x1bc   :  { %5033 = vmatprep.subr.msk.mxu1 %vm199_vm1, %v198_v40 }
 0x1bd   :  { %5034 = vmatpush3.xpose.msk.msra.mxu1 %vm199_vm1, %v198_v40  ;;  %v196_v41 = vpop.permute.xlu1 %195 }
 0x1be   :  { %5035 = vmatprep.subr.msk.mxu1 %vm199_vm1, %v196_v41 }
 0x1bf   :  { %v290_v42 = vpop.permute.xlu0 %289 }
 0x1c0   :  { %5040 = vmatprep.subr.msk.mxu0 %vm199_vm1, %v290_v42 }
 0x1c1   :  { %5036 = vmatpush3.xpose.msk.msra.mxu1 %vm199_vm1, %v196_v41  ;;  %5041 = vmatpush3.xpose.msk.msra.mxu0 %vm199_vm1, %v290_v42  ;;  %v288_v43 = vpop.permute.xlu1 %287 }
 0x1c2   :  { %5042 = vmatprep.subr.msk.mxu0 %vm199_vm1, %v288_v43 }
 0x1c4   :  { %5038 = vmatmul.mubr.msk.f32.vlgmr.msra.gmra.mxu1 %vm199_vm1, %v5699_v44 }
 0x1c5   :  { %5043 = vmatpush3.xpose.msk.msra.mxu0 %vm199_vm1, %v288_v43 }
 0x1c8   :  { %5045 = vmatmul.mubr.msk.f32.vlgmr.msra.gmra.mxu0 %vm199_vm1, %v5706_v45 }
 0x284   :  { %v5039_v46 = vpop.f32.mrf.mxu1 }
 0x285   :  { %v380_v47 = vsel %vm376_vm2, %v5039_v46, -inf }
 0x286   :  { %381 = vmax.xlane.f32.xlu1 %v380_v47  ;;  %v276_v48 = vpop.f32.mrf.mxu1 }
 0x287   :  { %v377_v49 = vsel %vm376_vm2, %v276_v48, -inf }
 0x288   :  { %v5046_v50 = vpop.f32.mrf.mxu0  ;;  %378 = vmax.xlane.f32.xlu0 %v377_v49 }
 0x289   :  { %v386_v53 = vsel %vm376_vm2, %v5046_v50, -inf }
 0x28a   :  { %v367_v51 = vpop.f32.mrf.mxu0 }
 0x28b   :  { %v383_v52 = vsel %vm376_vm2, %v367_v51, -inf }
 0x28c   :  { %384 = vmax.xlane.f32.xlu0 %v383_v52 }
 0x290   :  { %387 = vmax.xlane.f32.xlu0 %v386_v53 }
 0x297   :  { %423 = vrot.lane.b32.xlu1 %v5663_v31, %s5551_s5 }
 0x29b   :  { %510 = vrot.lane.b32.xlu1 %v5671_v35, %s5551_s5 }
 0x29f   :  { %601 = vrot.lane.b32.xlu1 %v5663_v31, %s5552_s6 }
 0x2a3   :  { %599 = vrot.lane.b32.xlu1 %v5666_v33, %s5552_s6 }
 0x2a6   :  { %421 = vrot.lane.b32.xlu0 %v5666_v33, %s5551_s5 }
 0x2a7   :  { %595 = vrot.lane.b32.xlu1 %v5676_v36, %s5553_s7 }
 0x2aa   :  { %508 = vrot.lane.b32.xlu0 %v5683_v38, %s5551_s5 }
 0x2ae   :  { %692 = vrot.lane.b32.xlu0 %v5671_v35, %s5552_s6 }
 0x30f   :  { %v382_v54 = vpop.xlane.xlu1 %381 }
 0x310   :  { %v390_v55 = vsub.f32 %v5039_v46, %v382_v54 }
 0x311   :  { %v379_v56 = vpop.xlane.xlu0 %378 }
 0x312   :  { %v395_v57 = vmul.f32 1.442695, %v390_v55  ;;  %v389_v58 = vsub.f32 %v276_v48, %v379_v56 }
 0x313   :  { %v424_v59 = vpop.permute.xlu1 %423 }
 0x314   :  { %5386 = vpow2.f32 %v395_v57  ;;  %v393_v60 = vmul.f32 1.442695, %v389_v58  ;;  %5047 = vmatprep.subr.mxu1 %v424_v59 }
 0x315   :  { %5048 = vmatpush3.msra.mxu1 %v424_v59  ;;  %v385_v61 = vpop.xlane.xlu0 %384 }
 0x316   :  { %5388 = vpow2.f32 %v393_v60  ;;  %v391_v19 = vsub.f32 %v367_v51, %v385_v61 }
 0x317   :  { %v511_v62 = vpop.permute.xlu1 %510 }
 0x318   :  { %v397_v21 = vmul.f32 1.442695, %v391_v19 }
 0x319   :  { %v388_v63 = vpop.xlane.xlu0 %387 }
 0x31a   :  { %v392_v0 = vsub.f32 %v5046_v50, %v388_v63 }
 0x31b   :  { %v602_v1 = vpop.permute.xlu1 %601 }
 0x31c   :  { %v399_v2 = vmul.f32 1.442695, %v392_v0  ;;  %5061 = vmatprep.subr.msk.mxu0 %vm199_vm1, %v602_v1 }
 0x31d   :  { %5062 = vmatpush3.xpose.msk.msra.mxu0 %vm199_vm1, %v602_v1  ;;  %v422_v4 = vpop.permute.xlu0 %421 }
 0x31e   :  { %5390 = vpow2.f32 %v399_v2  ;;  %5049 = vmatprep.subr.mxu1 %v422_v4 }
 0x31f   :  { %v600_v5 = vpop.permute.xlu1 %599  ;;  %5050 = vmatpush3.msra.mxu1 %v422_v4  ;;  %5392 = vpow2.f32 %v397_v21 }
 0x320   :  { %5054 = vmatprep.subr.mxu1 %v511_v62  ;;  %5063 = vmatprep.subr.msk.mxu0 %vm199_vm1, %v600_v5 }
 0x321   :  { %v5387_v9 = vpop.eup %5386  ;;  %5064 = vmatpush3.xpose.msk.msra.mxu0 %vm199_vm1, %v600_v5  ;;  %v509_v24 = vpop.permute.xlu0 %508 }
 0x322   :  { %v404_v12 = vsel %vm376_vm2, %v5387_v9, 0.0 }
 0x323   :  { %v5389_v14 = vpop.eup %5388  ;;  %v596_v15 = vpop.permute.xlu1 %595  ;;  %405 = vadd.xlane.f32.xlu0 %v404_v12 }
 0x324   :  { %5065 = vmatprep.mubr.msk.f32.mxu0 %vm199_vm1, %v596_v15  ;;  %v401_v16 = vsel %vm376_vm2, %v5389_v14, 0.0 }
 0x325   :  { %402 = vadd.xlane.f32.xlu1 %v401_v16  ;;  %v693_v28 = vpop.permute.xlu0 %692 }
 0x32b   :  { %v5391_v17 = vpop.eup %5390 }
 0x32c   :  { %v410_v18 = vsel %vm376_vm2, %v5391_v17, 0.0  ;;  %v5393_v22 = vpop.eup %5392 }
 0x32d   :  { %411 = vadd.xlane.f32.xlu0 %v410_v18  ;;  %v407_v23 = vsel %vm376_vm2, %v5393_v22, 0.0 }
 0x336   :  { %690 = vrot.lane.b32.xlu1 %v5683_v38, %s5552_s6 }
 0x343   :  { %597 = vrot.lane.b32.xlu0 %v5699_v44, %s5553_s7 }
 0x347   :  { %686 = vrot.lane.b32.xlu0 %v5688_v39, %s5553_s7 }
 0x35a   :  { %408 = vadd.xlane.f32.xlu1 %v407_v23 }
 0x36b   :  { %688 = vrot.lane.b32.xlu1 %v5706_v45, %s5553_s7 }
 0x3ac   :  { %v406_v30 = vpop.xlane.xlu0 %405 }
 0x3ad   :  { %5394 = vrcp.f32 %v406_v30 }
 0x3ae   :  { %v403_v32 = vpop.xlane.xlu1 %402 }
 0x3af   :  { %5396 = vrcp.f32 %v403_v32 }
 0x3b2   :  { %v691_v46 = vpop.permute.xlu1 %690 }
 0x3b6   :  { %v412_v34 = vpop.xlane.xlu0 %411 }
 0x3b7   :  { %5398 = vrcp.f32 %v412_v34 }
 0x3ba   :  { %v598_v37 = vpop.permute.xlu0 %597  ;;  %v5395_v40 = vpop.eup %5394 }
 0x3bb   :  { %5066 = vmatmul.mubr.msk.f32.vlgmr.msra.gmra.mxu0 %vm199_vm1, %v598_v37  ;;  %v416_v43 = vmul.f32 %v5395_v40, %v5387_v9 }
 0x3bc   :  { %v5397_v41 = vpop.eup %5396 }
 0x3bd   :  { %v414_v42 = vmul.f32 %v5397_v41, %v5389_v14 }
 0x3be   :  { %v687_v52 = vpop.permute.xlu0 %686 }
 0x3bf   :  { %5051 = vmatprep.mubr.msk.f32.mxu1 %vm376_vm2, %v414_v42 }
 0x3c0   :  { %5052 = vmatmul.mubr.msk.f32.vlgmr.msra.gmra.mxu1 %vm376_vm2, %v416_v43 }
 0x3c1   :  { %5055 = vmatpush3.msra.mxu1 %v511_v62 }
 0x3c2   :  { %5056 = vmatprep.subr.mxu1 %v509_v24 }
 0x3c3   :  { %5057 = vmatpush3.msra.mxu1 %v509_v24 }
 0x3c4   :  { %5068 = vmatprep.subr.msk.mxu1 %vm199_vm1, %v693_v28  ;;  %v5399_v48 = vpop.eup %5398 }
 0x3c5   :  { %v420_v51 = vmul.f32 %v5399_v48, %v5391_v17 }
 0x3e3   :  { %v409_v47 = vpop.xlane.xlu1 %408 }
 0x3e4   :  { %5400 = vrcp.f32 %v409_v47 }
 0x3e7   :  { %v689_v53 = vpop.permute.xlu1 %688 }
 0x3f1   :  { %v5401_v49 = vpop.eup %5400 }
 0x3f2   :  { %v418_v50 = vmul.f32 %v5401_v49, %v5393_v22 }
 0x3f4   :  { %5058 = vmatprep.mubr.msk.f32.mxu1 %vm376_vm2, %v418_v50 }
 0x3f5   :  { %5059 = vmatmul.mubr.msk.f32.vlgmr.msra.gmra.mxu1 %vm376_vm2, %v420_v51 }
 0x3f6   :  { %5069 = vmatpush3.xpose.msk.msra.mxu1 %vm199_vm1, %v693_v28  ;;  %5072 = vmatprep.mubr.msk.f32.mxu1 %vm199_vm1, %v687_v52 }
 0x3f7   :  { %5070 = vmatprep.subr.msk.mxu1 %vm199_vm1, %v691_v46 }
 0x3fa   :  { %5071 = vmatpush3.xpose.msk.msra.mxu1 %vm199_vm1, %v691_v46 }
 0x3fd   :  { %5073 = vmatmul.mubr.msk.f32.vlgmr.msra.gmra.mxu1 %vm199_vm1, %v689_v53 }
 0x47b   :  { %v5067_v54 = vpop.f32.mrf.mxu0 }
 0x47c   :  { %v780_v55 = vsel %vm376_vm2, %v5067_v54, -inf }
 0x47d   :  { %781 = vmax.xlane.f32.xlu1 %v780_v55  ;;  %v677_v56 = vpop.f32.mrf.mxu0 }
 0x47e   :  { %v777_v57 = vsel %vm376_vm2, %v677_v56, -inf }
 0x47f   :  { %778 = vmax.xlane.f32.xlu0 %v777_v57 }
 0x480   :  { %v5760_v58 = vpop.f32.mrf.mxu1 }
 0x482   :  { %v5762_v59 = vpop.f32.mrf.mxu1 }
 0x4b5   :  { %v5764_v60 = vpop.f32.mrf.mxu1 }
 0x4b7   :  { %v5766_v61 = vpop.f32.mrf.mxu1 }
 0x4bd   :  { %v5074_v62 = vpop.f32.mrf.mxu1 }
 0x4be   :  { %v786_v1 = vsel %vm376_vm2, %v5074_v62, -inf }
 0x4bf   :  { %v768_v63 = vpop.f32.mrf.mxu1 }
 0x4c0   :  { %v783_v0 = vsel %vm376_vm2, %v768_v63, -inf }
 0x4c1   :  { %784 = vmax.xlane.f32.xlu0 %v783_v0 }
 0x4c5   :  { %787 = vmax.xlane.f32.xlu0 %v786_v1 }
 0x506   :  { %v782_v2 = vpop.xlane.xlu1 %781 }
 0x507   :  { %v790_v4 = vsub.f32 %v5067_v54, %v782_v2 }
 0x508   :  { %v779_v5 = vpop.xlane.xlu0 %778 }
 0x509   :  { %v795_v9 = vmul.f32 1.442695, %v790_v4  ;;  %v789_v12 = vsub.f32 %v677_v56, %v779_v5 }
 0x50b   :  { %5402 = vpow2.f32 %v795_v9  ;;  %v793_v14 = vmul.f32 1.442695, %v789_v12 }
 0x50d   :  { %5404 = vpow2.f32 %v793_v14 }
 0x518   :  { %v5403_v15 = vpop.eup %5402 }
 0x519   :  { %v804_v16 = vsel %vm376_vm2, %v5403_v15, 0.0 }
 0x51a   :  { %v5405_v17 = vpop.eup %5404  ;;  %805 = vadd.xlane.f32.xlu0 %v804_v16 }
 0x51b   :  { %v801_v18 = vsel %vm376_vm2, %v5405_v17, 0.0 }
 0x51c   :  { %802 = vadd.xlane.f32.xlu1 %v801_v18 }
 0x52d   :  { %823 = vrot.lane.b32.xlu1 %v5663_v31, %s5554_s8 }
 0x530   :  { %821 = vrot.lane.b32.xlu0 %v5666_v33, %s5554_s8 }
 0x531   :  { %910 = vrot.lane.b32.xlu1 %v5671_v35, %s5554_s8 }
 0x534   :  { %908 = vrot.lane.b32.xlu0 %v5683_v38, %s5554_s8 }
 0x535   :  { %1001 = vrot.lane.b32.xlu1 %v5663_v31, %s5555_s9 }
 0x538   :  { %1092 = vrot.lane.b32.xlu0 %v5671_v35, %s5555_s9 }
 0x539   :  { %999 = vrot.lane.b32.xlu1 %v5666_v33, %s5555_s9 }
 0x53d   :  { %995 = vrot.lane.b32.xlu1 %v5676_v36, %s5556_s10 }
 0x541   :  { %1090 = vrot.lane.b32.xlu1 %v5683_v38, %s5555_s9 }
 0x54a   :  { %v785_v19 = vpop.xlane.xlu0 %784 }
 0x54b   :  { %v791_v21 = vsub.f32 %v768_v63, %v785_v19 }
 0x54d   :  { %v797_v24 = vmul.f32 1.442695, %v791_v21 }
 0x54e   :  { %v788_v22 = vpop.xlane.xlu0 %787 }
 0x54f   :  { %v792_v23 = vsub.f32 %v5074_v62, %v788_v22 }
 0x551   :  { %v799_v28 = vmul.f32 1.442695, %v792_v23 }
 0x553   :  { %5406 = vpow2.f32 %v799_v28 }
 0x554   :  { %5408 = vpow2.f32 %v797_v24 }
 0x560   :  { %v5407_v30 = vpop.eup %5406 }
 0x561   :  { %v5409_v32 = vpop.eup %5408  ;;  %v810_v34 = vsel %vm376_vm2, %v5407_v30, 0.0 }
 0x562   :  { %811 = vadd.xlane.f32.xlu0 %v810_v34  ;;  %v807_v37 = vsel %vm376_vm2, %v5409_v32, 0.0 }
 0x565   :  { %808 = vadd.xlane.f32.xlu1 %v807_v37 }
 0x576   :  { %1088 = vrot.lane.b32.xlu1 %v5706_v45, %s5556_s10 }
 0x578   :  { %997 = vrot.lane.b32.xlu0 %v5699_v44, %s5556_s10 }
 0x57c   :  { %1086 = vrot.lane.b32.xlu0 %v5688_v39, %s5556_s10 }
 0x5a3   :  { %v806_v40 = vpop.xlane.xlu0 %805 }
 0x5a4   :  { %5410 = vrcp.f32 %v806_v40 }
 0x5a5   :  { %v803_v41 = vpop.xlane.xlu1 %802 }
 0x5a6   :  { %5412 = vrcp.f32 %v803_v41 }
 0x5a7   :  { %v822_v42 = vpop.permute.xlu0 %821 }
 0x5a9   :  { %v824_v43 = vpop.permute.xlu1 %823 }
 0x5aa   :  { %5075 = vmatprep.subr.mxu0 %v824_v43 }
 0x5ab   :  { %5076 = vmatpush3.msra.mxu0 %v824_v43  ;;  %v909_v46 = vpop.permute.xlu0 %908 }
 0x5ac   :  { %5077 = vmatprep.subr.mxu0 %v822_v42 }
 0x5ad   :  { %v911_v47 = vpop.permute.xlu1 %910  ;;  %5078 = vmatpush3.msra.mxu0 %v822_v42 }
 0x5ae   :  { %5082 = vmatprep.subr.mxu1 %v911_v47 }
 0x5af   :  { %5083 = vmatpush3.msra.mxu1 %v911_v47  ;;  %v1093_v48 = vpop.permute.xlu0 %1092 }
 0x5b0   :  { %5084 = vmatprep.subr.mxu1 %v909_v46 }
 0x5b1   :  { %v1002_v49 = vpop.permute.xlu1 %1001  ;;  %5085 = vmatpush3.msra.mxu1 %v909_v46  ;;  %v5411_v50 = vpop.eup %5410 }
 0x5b2   :  { %5089 = vmatprep.subr.msk.mxu0 %vm199_vm1, %v1002_v49  ;;  %5096 = vmatprep.subr.msk.mxu1 %vm199_vm1, %v1093_v48  ;;  %v816_v54 = vmul.f32 %v5411_v50, %v5403_v15 }
 0x5b3   :  { %v5413_v51 = vpop.eup %5412 }
 0x5b4   :  { %v814_v52 = vmul.f32 %v5413_v51, %v5405_v17 }
 0x5b5   :  { %v1000_v53 = vpop.permute.xlu1 %999 }
 0x5b6   :  { %5079 = vmatprep.mubr.msk.f32.mxu0 %vm376_vm2, %v814_v52 }
 0x5b7   :  { %5080 = vmatmul.mubr.msk.f32.vlgmr.msra.gmra.mxu0 %vm376_vm2, %v816_v54 }
 0x5b8   :  { %5090 = vmatpush3.xpose.msk.msra.mxu0 %vm199_vm1, %v1002_v49 }
 0x5b9   :  { %5091 = vmatprep.subr.msk.mxu0 %vm199_vm1, %v1000_v53  ;;  %v996_v55 = vpop.permute.xlu1 %995 }
 0x5ba   :  { %5093 = vmatprep.mubr.msk.f32.mxu0 %vm199_vm1, %v996_v55 }
 0x5bc   :  { %5092 = vmatpush3.xpose.msk.msra.mxu0 %vm199_vm1, %v1000_v53 }
 0x5bd   :  { %v1091_v56 = vpop.permute.xlu1 %1090 }
 0x5eb   :  { %v812_v57 = vpop.xlane.xlu0 %811 }
 0x5ec   :  { %5414 = vrcp.f32 %v812_v57 }
 0x5ee   :  { %v809_v62 = vpop.xlane.xlu1 %808 }
 0x5ef   :  { %5416 = vrcp.f32 %v809_v62  ;;  %v998_v63 = vpop.permute.xlu0 %997 }
 0x5f0   :  { %5094 = vmatmul.mubr.msk.f32.vlgmr.msra.gmra.mxu0 %vm199_vm1, %v998_v63 }
 0x5f2   :  { %v1089_v9 = vpop.permute.xlu1 %1088 }
 0x5f3   :  { %v1087_v5 = vpop.permute.xlu0 %1086 }
 0x5f9   :  { %v5415_v0 = vpop.eup %5414 }
 0x5fa   :  { %v820_v4 = vmul.f32 %v5415_v0, %v5407_v30 }
 0x5fc   :  { %v5417_v1 = vpop.eup %5416 }
 0x5fd   :  { %v818_v2 = vmul.f32 %v5417_v1, %v5409_v32 }
 0x5ff   :  { %5086 = vmatprep.mubr.msk.f32.mxu1 %vm376_vm2, %v818_v2 }
 0x600   :  { %5087 = vmatmul.mubr.msk.f32.vlgmr.msra.gmra.mxu1 %vm376_vm2, %v820_v4 }
 0x601   :  { %5097 = vmatpush3.xpose.msk.msra.mxu1 %vm199_vm1, %v1093_v48  ;;  %5100 = vmatprep.mubr.msk.f32.mxu1 %vm199_vm1, %v1087_v5 }
 0x602   :  { %5098 = vmatprep.subr.msk.mxu1 %vm199_vm1, %v1091_v56 }
 0x605   :  { %5099 = vmatpush3.xpose.msk.msra.mxu1 %vm199_vm1, %v1091_v56 }
 0x608   :  { %5101 = vmatmul.mubr.msk.f32.vlgmr.msra.gmra.mxu1 %vm199_vm1, %v1089_v9 }
 0x677   :  { %v5814_v12 = vpop.f32.mrf.mxu0 }
 0x679   :  { %v5816_v14 = vpop.f32.mrf.mxu0 }
 0x6b0   :  { %v5095_v15 = vpop.f32.mrf.mxu0 }
 0x6b1   :  { %v1180_v16 = vsel %vm376_vm2, %v5095_v15, -inf }
 0x6b2   :  { %1181 = vmax.xlane.f32.xlu1 %v1180_v16  ;;  %v1077_v17 = vpop.f32.mrf.mxu0 }
 0x6b3   :  { %v1177_v18 = vsel %vm376_vm2, %v1077_v17, -inf }
 0x6b4   :  { %1178 = vmax.xlane.f32.xlu0 %v1177_v18 }
 0x6c0   :  { %v5820_v19 = vpop.f32.mrf.mxu1 }
 0x6c2   :  { %v5822_v21 = vpop.f32.mrf.mxu1 }
 0x6c8   :  { %v5102_v22 = vpop.f32.mrf.mxu1 }
 0x6c9   :  { %v1186_v28 = vsel %vm376_vm2, %v5102_v22, -inf }
 0x6ca   :  { %v1168_v23 = vpop.f32.mrf.mxu1 }
 0x6cb   :  { %v1183_v24 = vsel %vm376_vm2, %v1168_v23, -inf }
 0x6cc   :  { %1184 = vmax.xlane.f32.xlu0 %v1183_v24 }
 0x6d0   :  { %1187 = vmax.xlane.f32.xlu0 %v1186_v28 }
 0x73b   :  { %v1182_v30 = vpop.xlane.xlu1 %1181 }
 0x73c   :  { %v1190_v32 = vsub.f32 %v5095_v15, %v1182_v30 }
 0x73d   :  { %v1179_v34 = vpop.xlane.xlu0 %1178 }
 0x73e   :  { %v1195_v37 = vmul.f32 1.442695, %v1190_v32  ;;  %v1189_v40 = vsub.f32 %v1077_v17, %v1179_v34 }
 0x740   :  { %5418 = vpow2.f32 %v1195_v37  ;;  %v1193_v41 = vmul.f32 1.442695, %v1189_v40 }
 0x742   :  { %5420 = vpow2.f32 %v1193_v41 }
 0x74d   :  { %v5419_v42 = vpop.eup %5418 }
 0x74e   :  { %v1204_v43 = vsel %vm376_vm2, %v5419_v42, 0.0 }
 0x74f   :  { %v5421_v46 = vpop.eup %5420  ;;  %1205 = vadd.xlane.f32.xlu0 %v1204_v43 }
 0x750   :  { %v1201_v47 = vsel %vm376_vm2, %v5421_v46, 0.0 }
 0x751   :  { %1202 = vadd.xlane.f32.xlu1 %v1201_v47 }
 0x755   :  { %v1185_v48 = vpop.xlane.xlu0 %1184 }
 0x756   :  { %v1191_v52 = vsub.f32 %v1168_v23, %v1185_v48 }
 0x758   :  { %v1197_v53 = vmul.f32 1.442695, %v1191_v52 }
 0x759   :  { %v1188_v49 = vpop.xlane.xlu0 %1187 }
 0x75a   :  { %v1192_v50 = vsub.f32 %v5102_v22, %v1188_v49 }
 0x75c   :  { %v1199_v51 = vmul.f32 1.442695, %v1192_v50 }
 0x75e   :  { %5422 = vpow2.f32 %v1199_v51 }
 0x75f   :  { %5424 = vpow2.f32 %v1197_v53 }
 0x762   :  { %1223 = vrot.lane.b32.xlu1 %v5663_v31, %s5557_s11 }
 0x765   :  { %1221 = vrot.lane.b32.xlu0 %v5666_v33, %s5557_s11 }
 0x766   :  { %1310 = vrot.lane.b32.xlu1 %v5671_v35, %s5557_s11 }
 0x769   :  { %1308 = vrot.lane.b32.xlu0 %v5683_v38, %s5557_s11 }
 0x76a   :  { %1401 = vrot.lane.b32.xlu1 %v5663_v31, %s5558_s12 }
 0x76b   :  { %v5423_v54 = vpop.eup %5422 }
 0x76c   :  { %v1210_v55 = vsel %vm376_vm2, %v5423_v54, 0.0  ;;  %v5425_v56 = vpop.eup %5424 }
 0x76d   :  { %1492 = vrot.lane.b32.xlu0 %v5671_v35, %s5558_s12  ;;  %v1207_v57 = vsel %vm376_vm2, %v5425_v56, 0.0 }
 0x76e   :  { %1399 = vrot.lane.b32.xlu1 %v5666_v33, %s5558_s12 }
 0x772   :  { %1395 = vrot.lane.b32.xlu1 %v5676_v36, %s5559_s13 }
 0x776   :  { %1490 = vrot.lane.b32.xlu1 %v5683_v38, %s5558_s12 }
 0x78c   :  { %1211 = vadd.xlane.f32.xlu0 %v1210_v55 }
 0x79a   :  { %1208 = vadd.xlane.f32.xlu1 %v1207_v57 }
 0x7a2   :  { %1397 = vrot.lane.b32.xlu0 %v5699_v44, %s5559_s13 }
 0x7a6   :  { %1486 = vrot.lane.b32.xlu0 %v5688_v39, %s5559_s13 }
 0x7ab   :  { %1488 = vrot.lane.b32.xlu1 %v5706_v45, %s5559_s13 }
 0x7d8   :  { %v1206_v36 = vpop.xlane.xlu0 %1205 }
 0x7d9   :  { %5426 = vrcp.f32 %v1206_v36 }
 0x7da   :  { %v1203_v62 = vpop.xlane.xlu1 %1202 }
 0x7db   :  { %5428 = vrcp.f32 %v1203_v62 }
 0x7dc   :  { %v1222_v63 = vpop.permute.xlu0 %1221 }
 0x7de   :  { %v1224_v0 = vpop.permute.xlu1 %1223 }
 0x7df   :  { %5103 = vmatprep.subr.mxu0 %v1224_v0 }
 0x7e0   :  { %5104 = vmatpush3.msra.mxu0 %v1224_v0  ;;  %v1309_v1 = vpop.permute.xlu0 %1308 }
 0x7e1   :  { %5105 = vmatprep.subr.mxu0 %v1222_v63 }
 0x7e2   :  { %v1311_v2 = vpop.permute.xlu1 %1310  ;;  %5106 = vmatpush3.msra.mxu0 %v1222_v63 }
 0x7e3   :  { %5110 = vmatprep.subr.mxu1 %v1311_v2 }
 0x7e4   :  { %5111 = vmatpush3.msra.mxu1 %v1311_v2  ;;  %v1493_v44 = vpop.permute.xlu0 %1492 }
 0x7e5   :  { %5112 = vmatprep.subr.mxu1 %v1309_v1 }
 0x7e6   :  { %v1402_v39 = vpop.permute.xlu1 %1401  ;;  %5113 = vmatpush3.msra.mxu1 %v1309_v1  ;;  %v5427_v4 = vpop.eup %5426 }
 0x7e7   :  { %5117 = vmatprep.subr.msk.mxu0 %vm199_vm1, %v1402_v39  ;;  %5124 = vmatprep.subr.msk.mxu1 %vm199_vm1, %v1493_v44  ;;  %v1216_v15 = vmul.f32 %v5427_v4, %v5419_v42 }
 0x7e8   :  { %v5429_v45 = vpop.eup %5428 }
 0x7e9   :  { %v1214_v5 = vmul.f32 %v5429_v45, %v5421_v46 }
 0x7ea   :  { %v1400_v9 = vpop.permute.xlu1 %1399 }
 0x7eb   :  { %5107 = vmatprep.mubr.msk.f32.mxu0 %vm376_vm2, %v1214_v5 }
 0x7ec   :  { %5108 = vmatmul.mubr.msk.f32.vlgmr.msra.gmra.mxu0 %vm376_vm2, %v1216_v15 }
 0x7ed   :  { %5118 = vmatpush3.xpose.msk.msra.mxu0 %vm199_vm1, %v1402_v39 }
 0x7ee   :  { %5119 = vmatprep.subr.msk.mxu0 %vm199_vm1, %v1400_v9  ;;  %v1396_v16 = vpop.permute.xlu1 %1395 }
 0x7ef   :  { %5121 = vmatprep.mubr.msk.f32.mxu0 %vm199_vm1, %v1396_v16 }
 0x7f1   :  { %5120 = vmatpush3.xpose.msk.msra.mxu0 %vm199_vm1, %v1400_v9 }
 0x7f2   :  { %v1491_v22 = vpop.permute.xlu1 %1490 }
 0x815   :  { %v1212_v17 = vpop.xlane.xlu0 %1211 }
 0x816   :  { %5430 = vrcp.f32 %v1212_v17 }
 0x819   :  { %v1398_v18 = vpop.permute.xlu0 %1397 }
 0x81a   :  { %5122 = vmatmul.mubr.msk.f32.vlgmr.msra.gmra.mxu0 %vm199_vm1, %v1398_v18 }
 0x81d   :  { %v1487_v34 = vpop.permute.xlu0 %1486 }
 0x823   :  { %v1209_v23 = vpop.xlane.xlu1 %1208  ;;  %v5431_v24 = vpop.eup %5430 }
 0x824   :  { %5432 = vrcp.f32 %v1209_v23  ;;  %v1220_v32 = vmul.f32 %v5431_v24, %v5423_v54 }
 0x827   :  { %v1489_v37 = vpop.permute.xlu1 %1488 }
 0x831   :  { %v5433_v28 = vpop.eup %5432 }
 0x832   :  { %v1218_v30 = vmul.f32 %v5433_v28, %v5425_v56 }
 0x834   :  { %5114 = vmatprep.mubr.msk.f32.mxu1 %vm376_vm2, %v1218_v30 }
 0x835   :  { %5115 = vmatmul.mubr.msk.f32.vlgmr.msra.gmra.mxu1 %vm376_vm2, %v1220_v32 }
 0x836   :  { %5125 = vmatpush3.xpose.msk.msra.mxu1 %vm199_vm1, %v1493_v44  ;;  %5128 = vmatprep.mubr.msk.f32.mxu1 %vm199_vm1, %v1487_v34 }
 0x837   :  { %5126 = vmatprep.subr.msk.mxu1 %vm199_vm1, %v1491_v22 }
 0x83a   :  { %5127 = vmatpush3.xpose.msk.msra.mxu1 %vm199_vm1, %v1491_v22 }
 0x83d   :  { %5129 = vmatmul.mubr.msk.f32.vlgmr.msra.gmra.mxu1 %vm199_vm1, %v1489_v37 }
 0x8ac   :  { %v5109_v40 = vpop.f32.mrf.mxu0 }
 0x8ae   :  { %v1299_v41 = vpop.f32.mrf.mxu0 }
 0x8da   :  { %v5123_v42 = vpop.f32.mrf.mxu0 }
 0x8db   :  { %v1580_v43 = vsel %vm376_vm2, %v5123_v42, -inf }
 0x8dc   :  { %1581 = vmax.xlane.f32.xlu1 %v1580_v43  ;;  %v1477_v46 = vpop.f32.mrf.mxu0 }
 0x8dd   :  { %v1577_v47 = vsel %vm376_vm2, %v1477_v46, -inf }
 0x8de   :  { %1578 = vmax.xlane.f32.xlu0 %v1577_v47 }
 0x8f5   :  { %v5872_v48 = vpop.f32.mrf.mxu1 }
 0x8f7   :  { %v1386_v49 = vpop.f32.mrf.mxu1 }
 0x8fd   :  { %v5130_v50 = vpop.f32.mrf.mxu1 }
 0x8fe   :  { %v1586_v53 = vsel %vm376_vm2, %v5130_v50, -inf }
 0x8ff   :  { %v1568_v51 = vpop.f32.mrf.mxu1 }
 0x900   :  { %v1583_v52 = vsel %vm376_vm2, %v1568_v51, -inf }
 0x901   :  { %1584 = vmax.xlane.f32.xlu0 %v1583_v52 }
 0x905   :  { %1587 = vmax.xlane.f32.xlu0 %v1586_v53 }
 0x965   :  { %v1582_v54 = vpop.xlane.xlu1 %1581 }
 0x966   :  { %v1590_v55 = vsub.f32 %v5123_v42, %v1582_v54 }
 0x967   :  { %v1579_v56 = vpop.xlane.xlu0 %1578 }
 0x968   :  { %v1595_v57 = vmul.f32 1.442695, %v1590_v55  ;;  %v1589_v36 = vsub.f32 %v1477_v46, %v1579_v56 }
 0x96a   :  { %5434 = vpow2.f32 %v1595_v57  ;;  %v1593_v62 = vmul.f32 1.442695, %v1589_v36 }
 0x96c   :  { %5436 = vpow2.f32 %v1593_v62 }
 0x977   :  { %v5435_v63 = vpop.eup %5434 }
 0x978   :  { %v1604_v0 = vsel %vm376_vm2, %v5435_v63, 0.0 }
 0x979   :  { %v5437_v1 = vpop.eup %5436  ;;  %1605 = vadd.xlane.f32.xlu0 %v1604_v0 }
 0x97a   :  { %v1601_v2 = vsel %vm376_vm2, %v5437_v1, 0.0 }
 0x97b   :  { %1602 = vadd.xlane.f32.xlu1 %v1601_v2 }
 0x98a   :  { %v1585_v44 = vpop.xlane.xlu0 %1584 }
 0x98b   :  { %v1591_v5 = vsub.f32 %v1568_v51, %v1585_v44 }
 0x98c   :  { %1623 = vrot.lane.b32.xlu1 %v5663_v31, %s5560_s14 }
 0x98d   :  { %v1597_v9 = vmul.f32 1.442695, %v1591_v5 }
 0x98e   :  { %v1588_v39 = vpop.xlane.xlu0 %1587 }
 0x98f   :  { %v1592_v4 = vsub.f32 %v5130_v50, %v1588_v39 }
 0x990   :  { %1710 = vrot.lane.b32.xlu1 %v5671_v35, %s5560_s14 }
 0x991   :  { %v1599_v45 = vmul.f32 1.442695, %v1592_v4 }
 0x993   :  { %5438 = vpow2.f32 %v1599_v45 }
 0x994   :  { %5440 = vpow2.f32 %v1597_v9 }
 0x9a0   :  { %v5882_v15 = vpop.eup %5438 }
 0x9a1   :  { %v1610_v16 = vsel %vm376_vm2, %v5882_v15, 0.0  ;;  %v5441_v17 = vpop.eup %5440 }
 0x9a2   :  { %1611 = vadd.xlane.f32.xlu0 %v1610_v16  ;;  %v1607_v18 = vsel %vm376_vm2, %v5441_v17, 0.0 }
 0x9b4   :  { %1608 = vadd.xlane.f32.xlu1 %v1607_v18 }
 0x9b8   :  { %1621 = vrot.lane.b32.xlu0 %v5666_v33, %s5560_s14 }
 0x9bc   :  { %1866 = vrot.lane.b32.xlu0 %v5596_v3, %s5561_s15 }
 0x9c0   :  { %1799 = vrot.lane.b32.xlu0 %v5816_v14, %s5562_s16 }
 0x9c4   :  { %1801 = vrot.lane.b32.xlu0 %v5814_v12, %s5562_s16 }
 0x9c5   :  { %1708 = vrot.lane.b32.xlu1 %v5683_v38, %s5560_s14 }
 0x9c8   :  { %1817 = vrot.lane.b32.xlu0 %v5109_v40, %s5563_s17 }
 0x9c9   :  { %1864 = vrot.lane.b32.xlu1 %v5608_v6, %s5561_s15 }
 0x9cc   :  { %1860 = vrot.lane.b32.xlu0 %v5621_v8, %s5561_s15 }
 0x9cd   :  { %1862 = vrot.lane.b32.xlu1 %v5615_v7, %s5561_s15 }
 0x9d0   :  { %1803 = vrot.lane.b32.xlu0 %v5822_v21, %s5562_s16 }
 0x9d1   :  { %1815 = vrot.lane.b32.xlu1 %v1299_v41, %s5563_s17 }
 0x9d4   :  { %1819 = vrot.lane.b32.xlu0 %v1386_v49, %s5563_s17 }
 0xa02   :  { %v1606_v7 = vpop.xlane.xlu0 %1605 }
 0xa04   :  { %v1603_v3 = vpop.xlane.xlu1 %1602 }
 0xa05   :  { %5442 = vrcp.f32 %v1603_v3 }
 0xa06   :  { %5444 = vrcp.f32 %v1606_v7 }
 0xa08   :  { %v1624_v31 = vpop.permute.xlu1 %1623 }
 0xa09   :  { %5131 = vmatprep.subr.mxu0 %v1624_v31 }
 0xa0a   :  { %5132 = vmatpush3.msra.mxu0 %v1624_v31 }
 0xa0c   :  { %v1711_v33 = vpop.permute.xlu1 %1710 }
 0xa0d   :  { %5138 = vmatprep.subr.mxu1 %v1711_v33 }
 0xa0e   :  { %5139 = vmatpush3.msra.mxu1 %v1711_v33 }
 0xa12   :  { %v5443_v6 = vpop.eup %5442 }
 0xa13   :  { %v1614_v8 = vmul.f32 %v5443_v6, %v5437_v1  ;;  %v5445_v38 = vpop.eup %5444 }
 0xa14   :  { %v1616_v14 = vmul.f32 %v5445_v38, %v5435_v63 }
 0xa15   :  { %5135 = vmatprep.mubr.msk.f32.mxu0 %vm376_vm2, %v1614_v8 }
 0xa2b   :  { %v1612_v35 = vpop.xlane.xlu0 %1611 }
 0xa2c   :  { %5446 = vrcp.f32 %v1612_v35 }
 0xa2f   :  { %v1622_v12 = vpop.permute.xlu0 %1621 }
 0xa30   :  { %5133 = vmatprep.subr.mxu0 %v1622_v12 }
 0xa31   :  { %5134 = vmatpush3.msra.mxu0 %v1622_v12 }
 0xa32   :  { %5136 = vmatmul.mubr.msk.f32.vlgmr.msra.gmra.mxu0 %vm376_vm2, %v1616_v14 }
 0xa33   :  { %v1867_v21 = vpop.permute.xlu0 %1866 }
 0xa34   :  { %5145 = vmatprep.subr.mxu0 %v1867_v21 }
 0xa35   :  { %5146 = vmatpush3.msra.mxu0 %v1867_v21 }
 0xa37   :  { %v1800_v22 = vpop.permute.xlu0 %1799 }
 0xa38   :  { %v1843_v52 = vsel %vm199_vm1, %v5762_v59, %v1800_v22 }
 0xa39   :  { %v5447_v37 = vpop.eup %5446 }
 0xa3a   :  { %v1620_v43 = vmul.f32 %v5447_v37, %v5882_v15 }
 0xa3b   :  { %v1802_v24 = vpop.permute.xlu0 %1801 }
 0xa3d   :  { %v1609_v23 = vpop.xlane.xlu1 %1608 }
 0xa3e   :  { %5448 = vrcp.f32 %v1609_v23 }
 0xa3f   :  { %v1818_v30 = vpop.permute.xlu0 %1817 }
 0xa41   :  { %v1709_v28 = vpop.permute.xlu1 %1708 }
 0xa42   :  { %5140 = vmatprep.subr.mxu1 %v1709_v28 }
 0xa43   :  { %5141 = vmatpush3.msra.mxu1 %v1709_v28  ;;  %v1861_v41 = vpop.permute.xlu0 %1860 }
 0xa45   :  { %v1865_v32 = vpop.permute.xlu1 %1864 }
 0xa46   :  { %5147 = vmatprep.subr.mxu0 %v1865_v32 }
 0xa47   :  { %5148 = vmatpush3.msra.mxu0 %v1865_v32  ;;  %v1804_v36 = vpop.permute.xlu0 %1803 }
 0xa48   :  { %v1845_v63 = vsel %vm199_vm1, %v5766_v61, %v1804_v36 }
 0xa49   :  { %v1863_v34 = vpop.permute.xlu1 %1862 }
 0xa4a   :  { %5149 = vmatprep.subr.mxu0 %v1863_v34 }
 0xa4b   :  { %v5449_v40 = vpop.eup %5448  ;;  %5150 = vmatpush3.msra.mxu0 %v1863_v34  ;;  %v1820_v62 = vpop.permute.xlu0 %1819 }
 0xa4c   :  { %v1618_v42 = vmul.f32 %v5449_v40, %v5441_v17  ;;  %5151 = vmatprep.subr.mxu0 %v1861_v41  ;;  %v1849_v1 = vsel %vm376_vm2, %v1845_v63, %v1820_v62 }
 0xa4d   :  { %5152 = vmatpush3.msra.mxu0 %v1861_v41  ;;  %v1816_v51 = vpop.permute.xlu1 %1815 }
 0xa4e   :  { %5142 = vmatprep.mubr.msk.f32.mxu1 %vm376_vm2, %v1618_v42  ;;  %v1847_v53 = vsel %vm376_vm2, %v1843_v52, %v1816_v51  ;;  %v17_v52 = vld [vmem:[%s6485_s1 + $0x18] sm:$0xff] }
 0xa4f   :  { %5143 = vmatmul.mubr.msk.f32.vlgmr.msra.gmra.mxu1 %vm376_vm2, %v1620_v43 }
 0xaf2   :  { %v5137_v46 = vpop.f32.mrf.mxu0 }
 0xaf4   :  { %v1699_v47 = vpop.f32.mrf.mxu0 }
 0xaf5   :  { %1831 = vrot.lane.b32.xlu1 %v1699_v47, %s5564_s18  ;;  %v21_v47 = vld [vmem:[%s6485_s1 + $0x38] sm:$0xff] }
 0xaf6   :  { %5159 = vmatprep.subr.mxu1 %v21_v47 }
 0xaf7   :  { %5160 = vmatpush3.msra.mxu1 %v21_v47 }
 0xaf9   :  { %1833 = vrot.lane.b32.xlu1 %v5137_v46, %s5564_s18 }
 0xafd   :  { %1805 = vrot.lane.b32.xlu1 %v5820_v19, %s5562_s16 }
 0xb01   :  { %1821 = vrot.lane.b32.xlu1 %v5872_v48, %s5563_s17  ;;  %v1844_v48 = vsel %vm199_vm1, %v5760_v58, %v1802_v24 }
 0xb02   :  { %v1848_v55 = vsel %vm376_vm2, %v1844_v48, %v1818_v30 }
 0xb0f   :  { %v5144_v49 = vpop.f32.mrf.mxu1 }
 0xb10   :  { %1837 = vrot.lane.b32.xlu1 %v5144_v49, %s5564_s18  ;;  %v19_v49 = vld [vmem:[%s6485_s1 + $0x28] sm:$0xff] }
 0xb11   :  { %v1786_v50 = vpop.f32.mrf.mxu1  ;;  %5161 = vmatprep.subr.mxu1 %v19_v49 }
 0xb12   :  { %1835 = vrot.lane.b32.xlu0 %v1786_v50, %s5564_s18  ;;  %v5546_v50 = vld [vmem:[%s6485_s1 + $0x80] sm:$0x3]  ;;  %5162 = vmatpush3.msra.mxu1 %v19_v49 }
 0xb13   :  { %v5965_v51 = vrot.slane %v5546_v50, %v5636_v13  ;;  %5163 = vmatprep.subr.mxu1 %v17_v52 }
 0xb14   :  { %5164 = vmatpush3.msra.mxu1 %v17_v52 }
 0xb16   :  { %1873 = vrot.lane.b32.xlu0 %v5660_v29, %s5561_s15 }
 0xb67   :  { %v1832_v19 = vpop.permute.xlu1 %1831 }
 0xb68   :  { %v1852_v54 = vsel %vm1851_vm3, %v1847_v53, %v1832_v19  ;;  %v15_v53 = vld [vmem:[%s6485_s1 + $0x8] sm:$0xff] }
 0xb69   :  { %5153 = vmatprep.mubr.msk.f32.mxu0 %vm91_vm0, %v1852_v54  ;;  %5165 = vmatprep.subr.mxu1 %v15_v53 }
 0xb6a   :  { %5166 = vmatpush3.msra.mxu1 %v15_v53 }
 0xb6b   :  { %v1834_v56 = vpop.permute.xlu1 %1833 }
 0xb6c   :  { %v1853_v29 = vsel %vm1851_vm3, %v1848_v55, %v1834_v56 }
 0xb6d   :  { %5154 = vmatmul.mubr.msk.f32.vlgmr.msra.gmra.mxu0 %vm91_vm0, %v1853_v29 }
 0xb6f   :  { %v1806_v57 = vpop.permute.xlu1 %1805 }
 0xb70   :  { %v1846_v58 = vsel %vm199_vm1, %v5764_v60, %v1806_v57 }
 0xb73   :  { %v1822_v59 = vpop.permute.xlu1 %1821 }
 0xb74   :  { %v1850_v44 = vsel %vm376_vm2, %v1846_v58, %v1822_v59 }
 0xb82   :  { %v1838_v0 = vpop.permute.xlu1 %1837 }
 0xb83   :  { %v1855_v4 = vsel %vm1851_vm3, %v1850_v44, %v1838_v0 }
 0xb84   :  { %v1836_v2 = vpop.permute.xlu0 %1835 }
 0xb85   :  { %v1854_v39 = vsel %vm1851_vm3, %v1849_v1, %v1836_v2 }
 0xb86   :  { %5156 = vmatprep.mubr.msk.f32.mxu0 %vm91_vm0, %v1854_v39 }
 0xb87   :  { %5157 = vmatmul.mubr.msk.f32.gmra.mxu0 %vm91_vm0, %v1855_v4 }
 0xb88   :  { %v1874_v45 = vpop.permute.xlu0 %1873 }
 0xc2d   :  { %v5155_v5 = vpop.f32.mrf.mxu0 }
 0xc2e   :  { %v1960_v61 = vadd.f32 %v5155_v5, %v1874_v45 }
 0xc2f   :  { %v1954_v9 = vpop.f32.mrf.mxu0 }
 0xc30   :  { %v1955_v15 = vadd.f32 %v1954_v9, %v1874_v45  ;;  %v1974_v16 = vadd.f32 %v1960_v61, %v5646_v26 }
 0xc32   :  { %v1980_v60 = vsel %vm91_vm0, %v1974_v16, 0.0  ;;  %v1973_v17 = vadd.f32 %v1955_v15, %v5640_v20 }
 0xc33   :  { %1981 = vadd.xlane.f32.xlu0 %v1980_v60 }
 0xc34   :  { %v1977_v18 = vsel %vm91_vm0, %v1973_v17, 0.0 }
 0xc35   :  { %1978 = vadd.xlane.f32.xlu1 %v1977_v18 }
 0xc47   :  { %v5158_v3 = vpop.f32.mrf.mxu0 }
 0xc48   :  { %v1970_v31 = vadd.f32 %v5158_v3, %v1874_v45 }
 0xc49   :  { %v1964_v33 = vpop.f32.mrf.mxu0 }
 0xc4a   :  { %v1976_v6 = vadd.f32 %v1970_v31, %v5648_v27  ;;  %v1965_v8 = vadd.f32 %v1964_v33, %v1874_v45  ;;  %v25_v33 = vld [vmem:[%s6485_s1 + $0x70] sm:$0xff] }
 0xc4b   :  { %5173 = vmatprep.subr.mxu0 %v25_v33 }
 0xc4c   :  { %v1975_v7 = vadd.f32 %v1965_v8, %v5644_v25  ;;  %v1986_v35 = vsel %vm91_vm0, %v1976_v6, 0.0  ;;  %5174 = vmatpush3.msra.mxu0 %v25_v33  ;;  %v23_v8 = vld [vmem:[%s6485_s1 + $0x50] sm:$0xff] }
 0xc4d   :  { %1987 = vadd.xlane.f32.xlu1 %v1986_v35  ;;  %v6000_v35 = vld [vmem:[%s6485_s1 + $0x88] sm:$0x3] }
 0xc4e   :  { %v1983_v26 = vsel %vm91_vm0, %v1975_v7, 0.0 }
 0xc4f   :  { %1984 = vadd.xlane.f32.xlu0 %v1983_v26  ;;  %v2049_v26 = vrot.slane %v6000_v35, %v5630_v11 }
 0xcbc   :  { %v1982_v38 = vpop.xlane.xlu0 %1981 }
 0xcbd   :  { %v1991_v20 = vmul.f32 0.03125, %v1982_v38 }
 0xcbe   :  { %v1979_v12 = vpop.xlane.xlu1 %1978 }
 0xcbf   :  { %v1995_v14 = vsub.f32 %v1974_v16, %v1991_v20  ;;  %v1990_v21 = vmul.f32 0.03125, %v1979_v12 }
 0xcc1   :  { %v1994_v22 = vsub.f32 %v1973_v17, %v1990_v21  ;;  %v1999_v23 = vmul.f32 %v1995_v14, %v1995_v14 }
 0xcc3   :  { %v2005_v24 = vsel %vm91_vm0, %v1999_v23, 0.0  ;;  %v1998_v28 = vmul.f32 %v1994_v22, %v1994_v22 }
 0xcc4   :  { %2006 = vadd.xlane.f32.xlu1 %v2005_v24 }
 0xcc5   :  { %v2002_v27 = vsel %vm91_vm0, %v1998_v28, 0.0 }
 0xcc6   :  { %2003 = vadd.xlane.f32.xlu0 %v2002_v27 }
 0xcd6   :  { %v1988_v25 = vpop.xlane.xlu1 %1987 }
 0xcd7   :  { %v1993_v30 = vmul.f32 0.03125, %v1988_v25 }
 0xcd8   :  { %v1985_v32 = vpop.xlane.xlu0 %1984 }
 0xcd9   :  { %v1997_v34 = vsub.f32 %v1976_v6, %v1993_v30  ;;  %v1992_v37 = vmul.f32 0.03125, %v1985_v32  ;;  %v24_v6 = vld [vmem:[%s6485_s1 + $0x60] sm:$0xff] }
 0xcda   :  { %5175 = vmatprep.subr.mxu0 %v24_v6 }
 0xcdb   :  { %v1996_v40 = vsub.f32 %v1975_v7, %v1992_v37  ;;  %v2001_v41 = vmul.f32 %v1997_v34, %v1997_v34  ;;  %5176 = vmatpush3.msra.mxu0 %v24_v6  ;;  %v22_v7 = vld [vmem:[%s6485_s1 + $0x40] sm:$0xff] }
 0xcdc   :  { %5177 = vmatprep.subr.mxu0 %v23_v8 }
 0xcdd   :  { %v2011_v42 = vsel %vm91_vm0, %v2001_v41, 0.0  ;;  %v2000_v43 = vmul.f32 %v1996_v40, %v1996_v40  ;;  %5178 = vmatpush3.msra.mxu0 %v23_v8 }
 0xcde   :  { %2012 = vadd.xlane.f32.xlu1 %v2011_v42  ;;  %5179 = vmatprep.subr.mxu0 %v22_v7 }
 0xcdf   :  { %v2008_v46 = vsel %vm91_vm0, %v2000_v43, 0.0  ;;  %5180 = vmatpush3.msra.mxu0 %v22_v7 }
 0xce0   :  { %2009 = vadd.xlane.f32.xlu0 %v2008_v46 }
 0xcef   :  { %2151 = vrot.lane.b32.xlu1 %v5965_v51, %s5551_s5 }
 0xcf6   :  { %2039 = vrot.lane.b32.xlu0 %v5965_v51, %s5550_s4 }
 0xd4d   :  { %v2007_v19 = vpop.xlane.xlu1 %2006 }
 0xd4e   :  { %v2015_v54 = vmul.f32 0.03125, %v2007_v19 }
 0xd4f   :  { %v2004_v48 = vpop.xlane.xlu0 %2003 }
 0xd50   :  { %v2014_v55 = vmul.f32 0.03125, %v2004_v48  ;;  %v2019_v56 = vadd.f32 1e-05, %v2015_v54 }
 0xd52   :  { %v2018_v29 = vadd.f32 1e-05, %v2014_v55  ;;  %5450 = vrsqrt.f32 %v2019_v56 }
 0xd54   :  { %5452 = vrsqrt.f32 %v2018_v29 }
 0xd5f   :  { %v5451_v57 = vpop.eup %5450 }
 0xd60   :  { %v2027_v63 = vmul.f32 %v5451_v57, %v1995_v14 }
 0xd61   :  { %v5453_v36 = vpop.eup %5452 }
 0xd62   :  { %v2026_v0 = vmul.f32 %v5453_v36, %v1994_v22  ;;  %v2035_v39 = vmul.f32 %v5965_v51, %v2027_v63 }
 0xd64   :  { %v2034_v4 = vmul.f32 %v5965_v51, %v2026_v0 }
 0xd67   :  { %v2013_v59 = vpop.xlane.xlu1 %2012 }
 0xd68   :  { %v2017_v62 = vmul.f32 0.03125, %v2013_v59 }
 0xd69   :  { %v2010_v1 = vpop.xlane.xlu0 %2009 }
 0xd6a   :  { %v2021_v58 = vadd.f32 1e-05, %v2017_v62  ;;  %v2016_v2 = vmul.f32 0.03125, %v2010_v1 }
 0xd6b   :  { %v2152_v32 = vpop.permute.xlu1 %2151 }
 0xd6c   :  { %5454 = vrsqrt.f32 %v2021_v58  ;;  %v2020_v44 = vadd.f32 1e-05, %v2016_v2 }
 0xd6d   :  { %v2040_v45 = vpop.permute.xlu0 %2039 }
 0xd6e   :  { %5456 = vrsqrt.f32 %v2020_v44  ;;  %v2043_v5 = vadd.f32 %v2040_v45, %v2035_v39  ;;  %v2042_v61 = vadd.f32 %v2040_v45, %v2034_v4 }
 0xd70   :  { %5167 = vmatprep.mubr.msk.f32.mxu1 %vm91_vm0, %v2042_v61 }
 0xd71   :  { %5168 = vmatmul.mubr.msk.f32.vlgmr.msra.gmra.mxu1 %vm91_vm0, %v2043_v5 }
 0xd79   :  { %v5455_v9 = vpop.eup %5454 }
 0xd7a   :  { %v2029_v15 = vmul.f32 %v5455_v9, %v1997_v34 }
 0xd7b   :  { %v5457_v16 = vpop.eup %5456 }
 0xd7c   :  { %v2028_v60 = vmul.f32 %v5457_v16, %v1996_v40  ;;  %v2037_v17 = vmul.f32 %v5965_v51, %v2029_v15 }
 0xd7e   :  { %v2036_v18 = vmul.f32 %v5965_v51, %v2028_v60  ;;  %v2045_v31 = vadd.f32 %v2040_v45, %v2037_v17  ;;  %v6019_v60 = vld [vmem:[%s6485_s1 + $0xc0] sm:$0xff]  ;;  %v6026_v17 = vld [vmem:[%s6485_s1 + $0xb0] sm:$0xff] }
 0xd7f   :  { %5187 = vmatprep.subr.mxu1 %v6019_v60 }
 0xd80   :  { %v2044_v3 = vadd.f32 %v2040_v45, %v2036_v18  ;;  %5188 = vmatpush3.msra.mxu1 %v6019_v60  ;;  %v6033_v18 = vld [vmem:[%s6485_s1 + $0xa0] sm:$0xff] }
 0xd81   :  { %5189 = vmatprep.subr.mxu1 %v6026_v17 }
 0xd82   :  { %5170 = vmatprep.mubr.msk.f32.mxu1 %vm91_vm0, %v2044_v3  ;;  %5190 = vmatpush3.msra.mxu1 %v6026_v17 }
 0xd83   :  { %5171 = vmatmul.mubr.msk.f32.gmra.mxu1 %vm91_vm0, %v2045_v31  ;;  %5191 = vmatprep.subr.mxu1 %v6033_v18 }
 0xd84   :  { %5192 = vmatpush3.msra.mxu1 %v6033_v18 }
 0xe31   :  { %v5169_v38 = vpop.f32.mrf.mxu1 }
 0xe32   :  { %v2134_v20 = vadd.f32 %v5169_v38, %v2049_v26 }
 0xe33   :  { %v2128_v12 = vpop.f32.mrf.mxu1 }
 0xe34   :  { %v2129_v14 = vadd.f32 %v2128_v12, %v2049_v26  ;;  %v2148_v22 = vmax.f32 %v2134_v20, 0.0 }
 0xe36   :  { %v2147_v21 = vmax.f32 %v2129_v14, 0.0 }
 0xe38   :  { %5181 = vmatprep.mubr.msk.f32.mxu0 %vm91_vm0, %v2147_v21 }
 0xe39   :  { %5182 = vmatmul.mubr.msk.f32.vlgmr.msra.gmra.mxu0 %vm91_vm0, %v2148_v22 }
 0xe43   :  { %v5172_v23 = vpop.f32.mrf.mxu1 }
 0xe44   :  { %v2144_v24 = vadd.f32 %v5172_v23, %v2049_v26 }
 0xe45   :  { %v2138_v28 = vpop.f32.mrf.mxu1 }
 0xe46   :  { %v2139_v27 = vadd.f32 %v2138_v28, %v2049_v26  ;;  %v2150_v30 = vmax.f32 %v2144_v24, 0.0  ;;  %v2317_v24 = vrot.slane %v6000_v35, %v5636_v13 }
 0xe48   :  { %v2149_v25 = vmax.f32 %v2139_v27, 0.0 }
 0xe4a   :  { %5184 = vmatprep.mubr.msk.f32.mxu0 %vm91_vm0, %v2149_v25 }
 0xe4b   :  { %5185 = vmatmul.mubr.msk.f32.gmra.mxu0 %vm91_vm0, %v2150_v30 }
 0xef9   :  { %v5183_v34 = vpop.f32.mrf.mxu0 }
 0xefa   :  { %v2238_v37 = vadd.f32 %v5183_v34, %v2152_v32 }
 0xefb   :  { %v2232_v40 = vpop.f32.mrf.mxu0 }
 0xefc   :  { %v2233_v41 = vadd.f32 %v2232_v40, %v2152_v32  ;;  %v2252_v42 = vadd.f32 %v2238_v37, %v2043_v5 }
 0xefe   :  { %v2251_v43 = vadd.f32 %v2233_v41, %v2042_v61  ;;  %v2258_v46 = vsel %vm91_vm0, %v2252_v42, 0.0 }
 0xeff   :  { %2259 = vadd.xlane.f32.xlu0 %v2258_v46 }
 0xf00   :  { %v2255_v47 = vsel %vm91_vm0, %v2251_v43, 0.0 }
 0xf01   :  { %2256 = vadd.xlane.f32.xlu1 %v2255_v47 }
 0xf0b   :  { %v5186_v49 = vpop.f32.mrf.mxu0 }
 0xf0c   :  { %v2248_v50 = vadd.f32 %v5186_v49, %v2152_v32 }
 0xf0d   :  { %v2242_v52 = vpop.f32.mrf.mxu0 }
 0xf0e   :  { %v2254_v53 = vadd.f32 %v2248_v50, %v2045_v31  ;;  %v2243_v19 = vadd.f32 %v2242_v52, %v2152_v32  ;;  %v40_v50 = vld [vmem:[%s6485_s1 + $0x110] sm:$0x3] }
 0xf0f   :  { %v6068_v52 = vrot.slane %v40_v50, %v5630_v11 }
 0xf10   :  { %v2253_v54 = vadd.f32 %v2243_v19, %v2044_v3  ;;  %v2264_v48 = vsel %vm91_vm0, %v2254_v53, 0.0  ;;  %v6040_v3 = vld [vmem:[%s6485_s1 + $0x90] sm:$0xff] }
 0xf11   :  { %2265 = vadd.xlane.f32.xlu1 %v2264_v48  ;;  %5193 = vmatprep.subr.mxu1 %v6040_v3 }
 0xf12   :  { %v2261_v55 = vsel %vm91_vm0, %v2253_v54, 0.0  ;;  %5194 = vmatpush3.msra.mxu1 %v6040_v3 }
 0xf13   :  { %2262 = vadd.xlane.f32.xlu0 %v2261_v55 }
 0xf88   :  { %v2260_v56 = vpop.xlane.xlu0 %2259 }
 0xf89   :  { %v2268_v29 = vmul.f32 0.03125, %v2260_v56 }
 0xf8a   :  { %v2257_v57 = vpop.xlane.xlu1 %2256 }
 0xf8b   :  { %v2272_v36 = vsub.f32 %v2252_v42, %v2268_v29  ;;  %v2267_v59 = vmul.f32 0.03125, %v2257_v57 }
 0xf8d   :  { %v2271_v62 = vsub.f32 %v2251_v43, %v2267_v59  ;;  %v2276_v63 = vmul.f32 %v2272_v36, %v2272_v36 }
 0xf8f   :  { %v2282_v0 = vsel %vm91_vm0, %v2276_v63, 0.0  ;;  %v2275_v1 = vmul.f32 %v2271_v62, %v2271_v62 }
 0xf90   :  { %2283 = vadd.xlane.f32.xlu1 %v2282_v0 }
 0xf91   :  { %v2279_v58 = vsel %vm91_vm0, %v2275_v1, 0.0 }
 0xf92   :  { %2280 = vadd.xlane.f32.xlu0 %v2279_v58 }
 0xf9a   :  { %v2266_v2 = vpop.xlane.xlu1 %2265 }
 0xf9b   :  { %v2270_v44 = vmul.f32 0.03125, %v2266_v2 }
 0xf9c   :  { %v2263_v39 = vpop.xlane.xlu0 %2262 }
 0xf9d   :  { %v2274_v4 = vsub.f32 %v2254_v53, %v2270_v44  ;;  %v2269_v45 = vmul.f32 0.03125, %v2263_v39 }
 0xf9f   :  { %v2273_v5 = vsub.f32 %v2253_v54, %v2269_v45  ;;  %v2278_v61 = vmul.f32 %v2274_v4, %v2274_v4 }
 0xfa1   :  { %v2288_v9 = vsel %vm91_vm0, %v2278_v61, 0.0  ;;  %v2277_v15 = vmul.f32 %v2273_v5, %v2273_v5 }
 0xfa2   :  { %2289 = vadd.xlane.f32.xlu1 %v2288_v9 }
 0xfa3   :  { %v2285_v16 = vsel %vm91_vm0, %v2277_v15, 0.0 }
 0xfa4   :  { %2286 = vadd.xlane.f32.xlu0 %v2285_v16 }
 0xfba   :  { %2307 = vrot.lane.b32.xlu0 %v5965_v51, %s5561_s15 }
0x1019   :  { %v2284_v31 = vpop.xlane.xlu1 %2283 }
0x101a   :  { %v2292_v33 = vmul.f32 0.03125, %v2284_v31 }
0x101b   :  { %v2281_v6 = vpop.xlane.xlu0 %2280 }
0x101c   :  { %v2296_v8 = vadd.f32 1e-05, %v2292_v33  ;;  %v2291_v7 = vmul.f32 0.03125, %v2281_v6 }
0x101e   :  { %v2295_v26 = vadd.f32 1e-05, %v2291_v7  ;;  %5458 = vrsqrt.f32 %v2296_v8 }
0x1020   :  { %5460 = vrsqrt.f32 %v2295_v26 }
0x102b   :  { %v2290_v38 = vpop.xlane.xlu1 %2289  ;;  %v5459_v20 = vpop.eup %5458 }
0x102c   :  { %v2294_v12 = vmul.f32 0.03125, %v2290_v38  ;;  %v2304_v27 = vmul.f32 %v5459_v20, %v2272_v36 }
0x102d   :  { %v5461_v14 = vpop.eup %5460  ;;  %v2287_v21 = vpop.xlane.xlu0 %2286 }
0x102e   :  { %v2298_v22 = vadd.f32 1e-05, %v2294_v12  ;;  %v2293_v23 = vmul.f32 0.03125, %v2287_v21  ;;  %v2303_v28 = vmul.f32 %v5461_v14, %v2271_v62 }
0x1030   :  { %5462 = vrsqrt.f32 %v2298_v22  ;;  %v2297_v51 = vadd.f32 1e-05, %v2293_v23 }
0x1031   :  { %v2308_v25 = vpop.permute.xlu0 %2307 }
0x1032   :  { %5464 = vrsqrt.f32 %v2297_v51  ;;  %v2310_v30 = vmul.f32 %v2308_v25, %v2303_v28  ;;  %v2311_v32 = vmul.f32 %v2308_v25, %v2304_v27 }
0x1034   :  { %v6048_v34 = vadd.f32 %v2317_v24, %v2311_v32  ;;  %v6050_v37 = vadd.f32 %v2317_v24, %v2310_v30 }
0x1036   :  { %5195 = vmatprep.mubr.msk.f32.mxu1 %vm91_vm0, %v6050_v37 }
0x1037   :  { %5196 = vmatmul.mubr.msk.f32.vlgmr.msra.gmra.mxu1 %vm91_vm0, %v6048_v34 }
0x103d   :  { %v5463_v40 = vpop.eup %5462 }
0x103e   :  { %v2306_v35 = vmul.f32 %v5463_v40, %v2274_v4 }
0x103f   :  { %v5465_v41 = vpop.eup %5464 }
0x1040   :  { %v2305_v42 = vmul.f32 %v5465_v41, %v2273_v5  ;;  %v2313_v43 = vmul.f32 %v2308_v25, %v2306_v35 }
0x1042   :  { %v2312_v46 = vmul.f32 %v2308_v25, %v2305_v42  ;;  %v6058_v49 = vadd.f32 %v2317_v24, %v2313_v43 }
0x1044   :  { %v6056_v47 = vadd.f32 %v2317_v24, %v2312_v46 }
0x1046   :  { %5198 = vmatprep.mubr.msk.f32.mxu1 %vm91_vm0, %v6056_v47 }
0x1047   :  { %5199 = vmatmul.mubr.msk.f32.gmra.mxu1 %vm91_vm0, %v6058_v49 }
0x10f7   :  { %v5197_v53 = vpop.f32.mrf.mxu1 }
0x10f8   :  { %v6071_v19 = vadd.f32 %v5197_v53, %v6068_v52 }
0x10f9   :  { %v2404_v54 = vpop.f32.mrf.mxu1 }
0x10fa   :  { %v6074_v48 = vadd.f32 %v2404_v54, %v6068_v52  ;;  %2431 = vrot.lane.b32.xlu1 %v6071_v19, %s5550_s4  ;;  %v6105_v0 = vmul.f32 0.35355338, %v6071_v19 }
0x10fc   :  { %v6079_v55 = vmul.f32 0.35355338, %v6074_v48 }
0x10fe   :  { %2429 = vrot.lane.b32.xlu1 %v6074_v48, %s5550_s4  ;;  %5205 = vmatprep.mubr.msk.f32.mxu0 %vm199_vm1, %v6079_v55 }
0x1107   :  { %v5200_v56 = vpop.f32.mrf.mxu1 }
0x1108   :  { %v6086_v29 = vadd.f32 %v5200_v56, %v6068_v52 }
0x1109   :  { %v2414_v57 = vpop.f32.mrf.mxu1 }
0x110a   :  { %v6089_v36 = vadd.f32 %v2414_v57, %v6068_v52  ;;  %2522 = vrot.lane.b32.xlu0 %v6086_v29, %s5550_s4  ;;  %v6114_v2 = vmul.f32 0.35355338, %v6086_v29 }
0x110c   :  { %2520 = vrot.lane.b32.xlu1 %v6089_v36, %s5550_s4  ;;  %v6096_v59 = vmul.f32 0.35355338, %v6089_v36 }
0x110e   :  { %5212 = vmatprep.mubr.msk.f32.mxu1 %vm199_vm1, %v6096_v59 }
0x116c   :  { %v2432_v62 = vpop.permute.xlu1 %2431 }
0x116d   :  { %5201 = vmatprep.subr.msk.mxu0 %vm199_vm1, %v2432_v62 }
0x116e   :  { %5202 = vmatpush3.xpose.msk.msra.mxu0 %vm199_vm1, %v2432_v62 }
0x1170   :  { %v2430_v63 = vpop.permute.xlu1 %2429 }
0x1171   :  { %5203 = vmatprep.subr.msk.mxu0 %vm199_vm1, %v2430_v63 }
0x1172   :  { %5204 = vmatpush3.xpose.msk.msra.mxu0 %vm199_vm1, %v2430_v63 }
0x1175   :  { %5206 = vmatmul.mubr.msk.f32.vlgmr.msra.gmra.mxu0 %vm199_vm1, %v6105_v0 }
0x117c   :  { %v2523_v1 = vpop.permute.xlu0 %2522 }
0x117d   :  { %5208 = vmatprep.subr.msk.mxu1 %vm199_vm1, %v2523_v1 }
0x117e   :  { %5209 = vmatpush3.xpose.msk.msra.mxu1 %vm199_vm1, %v2523_v1  ;;  %v2521_v58 = vpop.permute.xlu1 %2520 }
0x117f   :  { %5210 = vmatprep.subr.msk.mxu1 %vm199_vm1, %v2521_v58 }
0x1182   :  { %5211 = vmatpush3.xpose.msk.msra.mxu1 %vm199_vm1, %v2521_v58 }
0x1185   :  { %5213 = vmatmul.mubr.msk.f32.vlgmr.msra.gmra.mxu1 %vm199_vm1, %v6114_v2 }
0x1235   :  { %v5207_v44 = vpop.f32.mrf.mxu0 }
0x1236   :  { %v2612_v39 = vsel %vm376_vm2, %v5207_v44, -inf }
0x1237   :  { %2613 = vmax.xlane.f32.xlu1 %v2612_v39  ;;  %v2509_v4 = vpop.f32.mrf.mxu0 }
0x1238   :  { %v2609_v45 = vsel %vm376_vm2, %v2509_v4, -inf }
0x1239   :  { %2610 = vmax.xlane.f32.xlu0 %v2609_v45 }
0x1245   :  { %v5214_v5 = vpop.f32.mrf.mxu1 }
0x1246   :  { %v2618_v15 = vsel %vm376_vm2, %v5214_v5, -inf }
0x1247   :  { %v2600_v61 = vpop.f32.mrf.mxu1 }
0x1248   :  { %v2615_v9 = vsel %vm376_vm2, %v2600_v61, -inf }
0x1249   :  { %2616 = vmax.xlane.f32.xlu0 %v2615_v9 }
0x124d   :  { %2619 = vmax.xlane.f32.xlu0 %v2618_v15 }
0x12c0   :  { %v2614_v16 = vpop.xlane.xlu1 %2613 }
0x12c1   :  { %v2622_v31 = vsub.f32 %v5207_v44, %v2614_v16 }
0x12c2   :  { %v2611_v33 = vpop.xlane.xlu0 %2610 }
0x12c3   :  { %v2627_v6 = vmul.f32 1.442695, %v2622_v31  ;;  %v2621_v8 = vsub.f32 %v2509_v4, %v2611_v33 }
0x12c5   :  { %5466 = vpow2.f32 %v2627_v6  ;;  %v2625_v7 = vmul.f32 1.442695, %v2621_v8 }
0x12c7   :  { %5468 = vpow2.f32 %v2625_v7 }
0x12d2   :  { %v5467_v26 = vpop.eup %5466  ;;  %v2617_v14 = vpop.xlane.xlu0 %2616 }
0x12d3   :  { %v2636_v38 = vsel %vm376_vm2, %v5467_v26, 0.0  ;;  %v2623_v24 = vsub.f32 %v2600_v61, %v2617_v14 }
0x12d4   :  { %v5469_v20 = vpop.eup %5468  ;;  %2637 = vadd.xlane.f32.xlu0 %v2636_v38 }
0x12d5   :  { %v2633_v12 = vsel %vm376_vm2, %v5469_v20, 0.0  ;;  %v2629_v51 = vmul.f32 1.442695, %v2623_v24 }
0x12d6   :  { %2634 = vadd.xlane.f32.xlu1 %v2633_v12  ;;  %v2620_v21 = vpop.xlane.xlu0 %2619 }
0x12d7   :  { %v2624_v22 = vsub.f32 %v5214_v5, %v2620_v21 }
0x12d9   :  { %v2631_v23 = vmul.f32 1.442695, %v2624_v22 }
0x12db   :  { %5470 = vpow2.f32 %v2631_v23 }
0x12dc   :  { %5472 = vpow2.f32 %v2629_v51 }
0x12e7   :  { %2655 = vrot.lane.b32.xlu1 %v6071_v19, %s5551_s5 }
0x12e8   :  { %v5471_v28 = vpop.eup %5470 }
0x12e9   :  { %v2642_v27 = vsel %vm376_vm2, %v5471_v28, 0.0  ;;  %v5473_v25 = vpop.eup %5472 }
0x12ea   :  { %2653 = vrot.lane.b32.xlu0 %v6074_v48, %s5551_s5  ;;  %v2639_v30 = vsel %vm376_vm2, %v5473_v25, 0.0 }
0x12eb   :  { %2742 = vrot.lane.b32.xlu1 %v6086_v29, %s5551_s5 }
0x12ee   :  { %2740 = vrot.lane.b32.xlu0 %v6089_v36, %s5551_s5 }
0x12ef   :  { %2833 = vrot.lane.b32.xlu1 %v6071_v19, %s5552_s6 }
0x12f2   :  { %2924 = vrot.lane.b32.xlu0 %v6086_v29, %s5552_s6 }
0x12f3   :  { %2831 = vrot.lane.b32.xlu1 %v6074_v48, %s5552_s6 }
0x12f7   :  { %2827 = vrot.lane.b32.xlu1 %v6079_v55, %s5553_s7 }
0x12fb   :  { %2922 = vrot.lane.b32.xlu1 %v6089_v36, %s5552_s6 }
0x1311   :  { %2643 = vadd.xlane.f32.xlu0 %v2642_v27 }
0x131f   :  { %2640 = vadd.xlane.f32.xlu1 %v2639_v30 }
0x1327   :  { %2829 = vrot.lane.b32.xlu0 %v6105_v0, %s5553_s7 }
0x132b   :  { %2918 = vrot.lane.b32.xlu0 %v6096_v59, %s5553_s7 }
0x1330   :  { %2920 = vrot.lane.b32.xlu1 %v6114_v2, %s5553_s7 }
0x135d   :  { %v2638_v32 = vpop.xlane.xlu0 %2637 }
0x135e   :  { %5474 = vrcp.f32 %v2638_v32 }
0x135f   :  { %v2635_v40 = vpop.xlane.xlu1 %2634 }
0x1360   :  { %5476 = vrcp.f32 %v2635_v40 }
0x1361   :  { %v2654_v35 = vpop.permute.xlu0 %2653 }
0x1363   :  { %v2656_v41 = vpop.permute.xlu1 %2655 }
0x1364   :  { %5215 = vmatprep.subr.mxu0 %v2656_v41 }
0x1365   :  { %v2741_v42 = vpop.permute.xlu0 %2740  ;;  %5216 = vmatpush3.msra.mxu0 %v2656_v41 }
0x1366   :  { %5217 = vmatprep.subr.mxu0 %v2654_v35 }
0x1367   :  { %5218 = vmatpush3.msra.mxu0 %v2654_v35  ;;  %v2743_v43 = vpop.permute.xlu1 %2742 }
0x1368   :  { %5222 = vmatprep.subr.mxu1 %v2743_v43 }
0x1369   :  { %5223 = vmatpush3.msra.mxu1 %v2743_v43  ;;  %v2925_v46 = vpop.permute.xlu0 %2924 }
0x136a   :  { %5224 = vmatprep.subr.mxu1 %v2741_v42 }
0x136b   :  { %5225 = vmatpush3.msra.mxu1 %v2741_v42  ;;  %v2834_v50 = vpop.permute.xlu1 %2833  ;;  %v5475_v53 = vpop.eup %5474 }
0x136c   :  { %5229 = vmatprep.subr.msk.mxu0 %vm199_vm1, %v2834_v50  ;;  %5236 = vmatprep.subr.msk.mxu1 %vm199_vm1, %v2925_v46  ;;  %v2648_v62 = vmul.f32 %v5475_v53, %v5467_v26 }
0x136d   :  { %v5477_v54 = vpop.eup %5476 }
0x136e   :  { %v2646_v56 = vmul.f32 %v5477_v54, %v5469_v20 }
0x136f   :  { %v2832_v57 = vpop.permute.xlu1 %2831 }
0x1370   :  { %5219 = vmatprep.mubr.msk.f32.mxu0 %vm376_vm2, %v2646_v56 }
0x1371   :  { %5220 = vmatmul.mubr.msk.f32.vlgmr.msra.gmra.mxu0 %vm376_vm2, %v2648_v62 }
0x1372   :  { %5230 = vmatpush3.xpose.msk.msra.mxu0 %vm199_vm1, %v2834_v50 }
0x1373   :  { %5231 = vmatprep.subr.msk.mxu0 %vm199_vm1, %v2832_v57  ;;  %v2828_v63 = vpop.permute.xlu1 %2827 }
0x1374   :  { %5233 = vmatprep.mubr.msk.f32.mxu0 %vm199_vm1, %v2828_v63 }
0x1376   :  { %5232 = vmatpush3.xpose.msk.msra.mxu0 %vm199_vm1, %v2832_v57 }
0x1377   :  { %v2923_v44 = vpop.permute.xlu1 %2922 }
0x139a   :  { %v2644_v1 = vpop.xlane.xlu0 %2643 }
0x139b   :  { %5478 = vrcp.f32 %v2644_v1 }
0x139e   :  { %v2830_v58 = vpop.permute.xlu0 %2829 }
0x139f   :  { %5234 = vmatmul.mubr.msk.f32.vlgmr.msra.gmra.mxu0 %vm199_vm1, %v2830_v58 }
0x13a2   :  { %v2919_v9 = vpop.permute.xlu0 %2918 }
0x13a8   :  { %v2641_v39 = vpop.xlane.xlu1 %2640  ;;  %v5479_v4 = vpop.eup %5478 }
0x13a9   :  { %5480 = vrcp.f32 %v2641_v39  ;;  %v2652_v61 = vmul.f32 %v5479_v4, %v5471_v28 }
0x13ac   :  { %v2921_v15 = vpop.permute.xlu1 %2920 }
0x13b6   :  { %v5481_v45 = vpop.eup %5480 }
0x13b7   :  { %v2650_v5 = vmul.f32 %v5481_v45, %v5473_v25 }
0x13b9   :  { %5226 = vmatprep.mubr.msk.f32.mxu1 %vm376_vm2, %v2650_v5 }
0x13ba   :  { %5227 = vmatmul.mubr.msk.f32.vlgmr.msra.gmra.mxu1 %vm376_vm2, %v2652_v61 }
0x13bb   :  { %5237 = vmatpush3.xpose.msk.msra.mxu1 %vm199_vm1, %v2925_v46  ;;  %5240 = vmatprep.mubr.msk.f32.mxu1 %vm199_vm1, %v2919_v9 }
0x13bc   :  { %5238 = vmatprep.subr.msk.mxu1 %vm199_vm1, %v2923_v44 }
0x13bf   :  { %5239 = vmatpush3.xpose.msk.msra.mxu1 %vm199_vm1, %v2923_v44 }
0x13c2   :  { %5241 = vmatmul.mubr.msk.f32.vlgmr.msra.gmra.mxu1 %vm199_vm1, %v2921_v15 }
0x1431   :  { %v6166_v16 = vpop.f32.mrf.mxu0 }
0x1433   :  { %v6168_v31 = vpop.f32.mrf.mxu0 }
0x145f   :  { %v5235_v33 = vpop.f32.mrf.mxu0 }
0x1460   :  { %v3012_v6 = vsel %vm376_vm2, %v5235_v33, -inf }
0x1461   :  { %3013 = vmax.xlane.f32.xlu1 %v3012_v6  ;;  %v2909_v8 = vpop.f32.mrf.mxu0 }
0x1462   :  { %v3009_v7 = vsel %vm376_vm2, %v2909_v8, -inf }
0x1463   :  { %3010 = vmax.xlane.f32.xlu0 %v3009_v7 }
0x147a   :  { %v6172_v26 = vpop.f32.mrf.mxu1 }
0x147c   :  { %v6174_v38 = vpop.f32.mrf.mxu1 }
0x1482   :  { %v5242_v20 = vpop.f32.mrf.mxu1 }
0x1483   :  { %v3018_v21 = vsel %vm376_vm2, %v5242_v20, -inf }
0x1484   :  { %v3000_v12 = vpop.f32.mrf.mxu1 }
0x1485   :  { %v3015_v14 = vsel %vm376_vm2, %v3000_v12, -inf }
0x1486   :  { %3016 = vmax.xlane.f32.xlu0 %v3015_v14 }
0x148a   :  { %3019 = vmax.xlane.f32.xlu0 %v3018_v21 }
0x14ea   :  { %v3014_v22 = vpop.xlane.xlu1 %3013 }
0x14eb   :  { %v3022_v23 = vsub.f32 %v5235_v33, %v3014_v22 }
0x14ec   :  { %v3011_v24 = vpop.xlane.xlu0 %3010 }
0x14ed   :  { %v3027_v51 = vmul.f32 1.442695, %v3022_v23  ;;  %v3021_v28 = vsub.f32 %v2909_v8, %v3011_v24 }
0x14ef   :  { %5482 = vpow2.f32 %v3027_v51  ;;  %v3025_v27 = vmul.f32 1.442695, %v3021_v28 }
0x14f1   :  { %5484 = vpow2.f32 %v3025_v27 }
0x14fc   :  { %v5483_v25 = vpop.eup %5482 }
0x14fd   :  { %v3036_v30 = vsel %vm376_vm2, %v5483_v25, 0.0 }
0x14fe   :  { %v5485_v32 = vpop.eup %5484  ;;  %3037 = vadd.xlane.f32.xlu0 %v3036_v30 }
0x14ff   :  { %v3033_v40 = vsel %vm376_vm2, %v5485_v32, 0.0 }
0x1500   :  { %3034 = vadd.xlane.f32.xlu1 %v3033_v40 }
0x150f   :  { %v3017_v35 = vpop.xlane.xlu0 %3016 }
0x1510   :  { %v3023_v46 = vsub.f32 %v3000_v12, %v3017_v35 }
0x1511   :  { %3055 = vrot.lane.b32.xlu1 %v6071_v19, %s5554_s8 }
0x1512   :  { %v3029_v50 = vmul.f32 1.442695, %v3023_v46 }
0x1513   :  { %v3020_v41 = vpop.xlane.xlu0 %3019 }
0x1514   :  { %3053 = vrot.lane.b32.xlu0 %v6074_v48, %s5554_s8  ;;  %v3024_v42 = vsub.f32 %v5242_v20, %v3020_v41 }
0x1515   :  { %3142 = vrot.lane.b32.xlu1 %v6086_v29, %s5554_s8 }
0x1516   :  { %v3031_v43 = vmul.f32 1.442695, %v3024_v42 }
0x1518   :  { %3140 = vrot.lane.b32.xlu0 %v6089_v36, %s5554_s8  ;;  %5486 = vpow2.f32 %v3031_v43 }
0x1519   :  { %3233 = vrot.lane.b32.xlu1 %v6071_v19, %s5555_s9  ;;  %5488 = vpow2.f32 %v3029_v50 }
0x151c   :  { %3324 = vrot.lane.b32.xlu0 %v6086_v29, %s5555_s9 }
0x151d   :  { %3231 = vrot.lane.b32.xlu1 %v6074_v48, %s5555_s9 }
0x1521   :  { %3227 = vrot.lane.b32.xlu1 %v6079_v55, %s5556_s10 }
0x1525   :  { %3322 = vrot.lane.b32.xlu1 %v6089_v36, %s5555_s9  ;;  %v5487_v53 = vpop.eup %5486 }
0x1526   :  { %v3042_v54 = vsel %vm376_vm2, %v5487_v53, 0.0  ;;  %v5489_v56 = vpop.eup %5488 }
0x1527   :  { %v3039_v57 = vsel %vm376_vm2, %v5489_v56, 0.0 }
0x153b   :  { %3043 = vadd.xlane.f32.xlu0 %v3042_v54 }
0x1549   :  { %3040 = vadd.xlane.f32.xlu1 %v3039_v57 }
0x1551   :  { %3229 = vrot.lane.b32.xlu0 %v6105_v0, %s5556_s10 }
0x1555   :  { %3318 = vrot.lane.b32.xlu0 %v6096_v59, %s5556_s10 }
0x155a   :  { %3320 = vrot.lane.b32.xlu1 %v6114_v2, %s5556_s10 }
0x1587   :  { %v3038_v62 = vpop.xlane.xlu0 %3037 }
0x1588   :  { %5490 = vrcp.f32 %v3038_v62 }
0x1589   :  { %v3035_v63 = vpop.xlane.xlu1 %3034 }
0x158a   :  { %5492 = vrcp.f32 %v3035_v63 }
0x158b   :  { %v3054_v1 = vpop.permute.xlu0 %3053 }
0x158d   :  { %v3056_v58 = vpop.permute.xlu1 %3055 }
0x158e   :  { %5243 = vmatprep.subr.mxu0 %v3056_v58 }
0x158f   :  { %v3141_v44 = vpop.permute.xlu0 %3140  ;;  %5244 = vmatpush3.msra.mxu0 %v3056_v58 }
0x1590   :  { %5245 = vmatprep.subr.mxu0 %v3054_v1 }
0x1591   :  { %5246 = vmatpush3.msra.mxu0 %v3054_v1  ;;  %v3143_v39 = vpop.permute.xlu1 %3142 }
0x1592   :  { %5250 = vmatprep.subr.mxu1 %v3143_v39 }
0x1593   :  { %5251 = vmatpush3.msra.mxu1 %v3143_v39  ;;  %v3325_v4 = vpop.permute.xlu0 %3324 }
0x1594   :  { %5252 = vmatprep.subr.mxu1 %v3141_v44 }
0x1595   :  { %5253 = vmatpush3.msra.mxu1 %v3141_v44  ;;  %v3234_v45 = vpop.permute.xlu1 %3233  ;;  %v5491_v5 = vpop.eup %5490 }
0x1596   :  { %5257 = vmatprep.subr.msk.mxu0 %vm199_vm1, %v3234_v45  ;;  %5264 = vmatprep.subr.msk.mxu1 %vm199_vm1, %v3325_v4  ;;  %v3048_v33 = vmul.f32 %v5491_v5, %v5483_v25 }
0x1597   :  { %v5493_v61 = vpop.eup %5492 }
0x1598   :  { %v3046_v9 = vmul.f32 %v5493_v61, %v5485_v32 }
0x1599   :  { %v3232_v15 = vpop.permute.xlu1 %3231 }
0x159a   :  { %5247 = vmatprep.mubr.msk.f32.mxu0 %vm376_vm2, %v3046_v9 }
0x159b   :  { %5248 = vmatmul.mubr.msk.f32.vlgmr.msra.gmra.mxu0 %vm376_vm2, %v3048_v33 }
0x159c   :  { %5258 = vmatpush3.xpose.msk.msra.mxu0 %vm199_vm1, %v3234_v45 }
0x159d   :  { %5259 = vmatprep.subr.msk.mxu0 %vm199_vm1, %v3232_v15  ;;  %v3228_v6 = vpop.permute.xlu1 %3227 }
0x159e   :  { %5261 = vmatprep.mubr.msk.f32.mxu0 %vm199_vm1, %v3228_v6 }
0x15a0   :  { %5260 = vmatpush3.xpose.msk.msra.mxu0 %vm199_vm1, %v3232_v15 }
0x15a1   :  { %v3323_v20 = vpop.permute.xlu1 %3322 }
0x15c4   :  { %v3044_v8 = vpop.xlane.xlu0 %3043 }
0x15c5   :  { %5494 = vrcp.f32 %v3044_v8 }
0x15c8   :  { %v3230_v7 = vpop.permute.xlu0 %3229 }
0x15c9   :  { %5262 = vmatmul.mubr.msk.f32.vlgmr.msra.gmra.mxu0 %vm199_vm1, %v3230_v7 }
0x15cc   :  { %v3319_v24 = vpop.permute.xlu0 %3318 }
0x15d2   :  { %v3041_v12 = vpop.xlane.xlu1 %3040  ;;  %v5495_v14 = vpop.eup %5494 }
0x15d3   :  { %5496 = vrcp.f32 %v3041_v12  ;;  %v3052_v23 = vmul.f32 %v5495_v14, %v5487_v53 }
0x15d6   :  { %v3321_v51 = vpop.permute.xlu1 %3320 }
0x15e0   :  { %v5497_v21 = vpop.eup %5496 }
0x15e1   :  { %v3050_v22 = vmul.f32 %v5497_v21, %v5489_v56 }
0x15e3   :  { %5254 = vmatprep.mubr.msk.f32.mxu1 %vm376_vm2, %v3050_v22 }
0x15e4   :  { %5255 = vmatmul.mubr.msk.f32.vlgmr.msra.gmra.mxu1 %vm376_vm2, %v3052_v23 }
0x15e5   :  { %5265 = vmatpush3.xpose.msk.msra.mxu1 %vm199_vm1, %v3325_v4  ;;  %5268 = vmatprep.mubr.msk.f32.mxu1 %vm199_vm1, %v3319_v24 }
0x15e6   :  { %5266 = vmatprep.subr.msk.mxu1 %vm199_vm1, %v3323_v20 }
0x15e9   :  { %5267 = vmatpush3.xpose.msk.msra.mxu1 %vm199_vm1, %v3323_v20 }
0x15ec   :  { %5269 = vmatmul.mubr.msk.f32.vlgmr.msra.gmra.mxu1 %vm199_vm1, %v3321_v51 }
0x165b   :  { %v6222_v28 = vpop.f32.mrf.mxu0 }
0x165d   :  { %v6224_v27 = vpop.f32.mrf.mxu0 }
0x1689   :  { %v5263_v25 = vpop.f32.mrf.mxu0 }
0x168a   :  { %v3412_v30 = vsel %vm376_vm2, %v5263_v25, -inf }
0x168b   :  { %3413 = vmax.xlane.f32.xlu1 %v3412_v30  ;;  %v3309_v32 = vpop.f32.mrf.mxu0 }
0x168c   :  { %v3409_v40 = vsel %vm376_vm2, %v3309_v32, -inf }
0x168d   :  { %3410 = vmax.xlane.f32.xlu0 %v3409_v40 }
0x16a4   :  { %v6228_v35 = vpop.f32.mrf.mxu1 }
0x16a6   :  { %v6230_v41 = vpop.f32.mrf.mxu1 }
0x16ac   :  { %v5270_v42 = vpop.f32.mrf.mxu1 }
0x16ad   :  { %v3418_v50 = vsel %vm376_vm2, %v5270_v42, -inf }
0x16ae   :  { %v3400_v43 = vpop.f32.mrf.mxu1 }
0x16af   :  { %v3415_v46 = vsel %vm376_vm2, %v3400_v43, -inf }
0x16b0   :  { %3416 = vmax.xlane.f32.xlu0 %v3415_v46 }
0x16b4   :  { %3419 = vmax.xlane.f32.xlu0 %v3418_v50 }
0x1714   :  { %v3414_v53 = vpop.xlane.xlu1 %3413 }
0x1715   :  { %v3422_v54 = vsub.f32 %v5263_v25, %v3414_v53 }
0x1716   :  { %v3411_v56 = vpop.xlane.xlu0 %3410 }
0x1717   :  { %v3427_v57 = vmul.f32 1.442695, %v3422_v54  ;;  %v3421_v62 = vsub.f32 %v3309_v32, %v3411_v56 }
0x1719   :  { %5498 = vpow2.f32 %v3427_v57  ;;  %v3425_v63 = vmul.f32 1.442695, %v3421_v62 }
0x171b   :  { %5500 = vpow2.f32 %v3425_v63 }
0x1726   :  { %v5499_v1 = vpop.eup %5498 }
0x1727   :  { %v3436_v58 = vsel %vm376_vm2, %v5499_v1, 0.0 }
0x1728   :  { %v5501_v44 = vpop.eup %5500  ;;  %3437 = vadd.xlane.f32.xlu0 %v3436_v58 }
0x1729   :  { %v3433_v39 = vsel %vm376_vm2, %v5501_v44, 0.0 }
0x172a   :  { %3434 = vadd.xlane.f32.xlu1 %v3433_v39 }
0x1739   :  { %v3417_v4 = vpop.xlane.xlu0 %3416 }
0x173a   :  { %v3423_v9 = vsub.f32 %v3400_v43, %v3417_v4 }
0x173b   :  { %3455 = vrot.lane.b32.xlu1 %v6071_v19, %s5557_s11 }
0x173c   :  { %v3429_v15 = vmul.f32 1.442695, %v3423_v9 }
0x173d   :  { %v3420_v45 = vpop.xlane.xlu0 %3419 }
0x173e   :  { %3453 = vrot.lane.b32.xlu0 %v6074_v48, %s5557_s11  ;;  %v3424_v5 = vsub.f32 %v5270_v42, %v3420_v45 }
0x173f   :  { %3542 = vrot.lane.b32.xlu1 %v6086_v29, %s5557_s11 }
0x1740   :  { %v3431_v61 = vmul.f32 1.442695, %v3424_v5 }
0x1742   :  { %3540 = vrot.lane.b32.xlu0 %v6089_v36, %s5557_s11  ;;  %5502 = vpow2.f32 %v3431_v61 }
0x1743   :  { %3633 = vrot.lane.b32.xlu1 %v6071_v19, %s5558_s12  ;;  %5504 = vpow2.f32 %v3429_v15 }
0x1746   :  { %3724 = vrot.lane.b32.xlu0 %v6086_v29, %s5558_s12 }
0x1747   :  { %3631 = vrot.lane.b32.xlu1 %v6074_v48, %s5558_s12 }
0x174b   :  { %3627 = vrot.lane.b32.xlu1 %v6079_v55, %s5559_s13 }
0x174f   :  { %3722 = vrot.lane.b32.xlu1 %v6089_v36, %s5558_s12  ;;  %v5503_v33 = vpop.eup %5502 }
0x1750   :  { %v3442_v6 = vsel %vm376_vm2, %v5503_v33, 0.0  ;;  %v5505_v8 = vpop.eup %5504 }
0x1751   :  { %v3439_v7 = vsel %vm376_vm2, %v5505_v8, 0.0 }
0x1765   :  { %3443 = vadd.xlane.f32.xlu0 %v3442_v6 }
0x1773   :  { %3440 = vadd.xlane.f32.xlu1 %v3439_v7 }
0x177b   :  { %3629 = vrot.lane.b32.xlu0 %v6105_v0, %s5559_s13 }
0x177f   :  { %3718 = vrot.lane.b32.xlu0 %v6096_v59, %s5559_s13 }
0x1784   :  { %3720 = vrot.lane.b32.xlu1 %v6114_v2, %s5559_s13 }
0x17b1   :  { %v3438_v55 = vpop.xlane.xlu0 %3437 }
0x17b2   :  { %5506 = vrcp.f32 %v3438_v55 }
0x17b3   :  { %v3435_v20 = vpop.xlane.xlu1 %3434 }
0x17b4   :  { %5508 = vrcp.f32 %v3435_v20 }
0x17b5   :  { %v3454_v12 = vpop.permute.xlu0 %3453 }
0x17b7   :  { %v3456_v14 = vpop.permute.xlu1 %3455 }
0x17b8   :  { %5271 = vmatprep.subr.mxu0 %v3456_v14 }
0x17b9   :  { %v3541_v21 = vpop.permute.xlu0 %3540  ;;  %5272 = vmatpush3.msra.mxu0 %v3456_v14 }
0x17ba   :  { %5273 = vmatprep.subr.mxu0 %v3454_v12 }
0x17bb   :  { %5274 = vmatpush3.msra.mxu0 %v3454_v12  ;;  %v3543_v22 = vpop.permute.xlu1 %3542 }
0x17bc   :  { %5278 = vmatprep.subr.mxu1 %v3543_v22 }
0x17bd   :  { %5279 = vmatpush3.msra.mxu1 %v3543_v22  ;;  %v3725_v0 = vpop.permute.xlu0 %3724 }
0x17be   :  { %5280 = vmatprep.subr.mxu1 %v3541_v21 }
0x17bf   :  { %5281 = vmatpush3.msra.mxu1 %v3541_v21  ;;  %v3634_v59 = vpop.permute.xlu1 %3633  ;;  %v5507_v23 = vpop.eup %5506 }
0x17c0   :  { %5285 = vmatprep.subr.msk.mxu0 %vm199_vm1, %v3634_v59  ;;  %5292 = vmatprep.subr.msk.mxu1 %vm199_vm1, %v3725_v0  ;;  %v3448_v25 = vmul.f32 %v5507_v23, %v5499_v1 }
0x17c1   :  { %v5509_v2 = vpop.eup %5508 }
0x17c2   :  { %v3446_v24 = vmul.f32 %v5509_v2, %v5501_v44 }
0x17c3   :  { %v3632_v51 = vpop.permute.xlu1 %3631 }
0x17c4   :  { %5275 = vmatprep.mubr.msk.f32.mxu0 %vm376_vm2, %v3446_v24 }
0x17c5   :  { %5276 = vmatmul.mubr.msk.f32.vlgmr.msra.gmra.mxu0 %vm376_vm2, %v3448_v25 }
0x17c6   :  { %5286 = vmatpush3.xpose.msk.msra.mxu0 %vm199_vm1, %v3634_v59 }
0x17c7   :  { %5287 = vmatprep.subr.msk.mxu0 %vm199_vm1, %v3632_v51  ;;  %v3628_v30 = vpop.permute.xlu1 %3627 }
0x17c8   :  { %5289 = vmatprep.mubr.msk.f32.mxu0 %vm199_vm1, %v3628_v30 }
0x17ca   :  { %5288 = vmatpush3.xpose.msk.msra.mxu0 %vm199_vm1, %v3632_v51 }
0x17cb   :  { %v3723_v42 = vpop.permute.xlu1 %3722 }
0x17ee   :  { %v3444_v32 = vpop.xlane.xlu0 %3443 }
0x17ef   :  { %5510 = vrcp.f32 %v3444_v32 }
0x17f2   :  { %v3630_v40 = vpop.permute.xlu0 %3629 }
0x17f3   :  { %5290 = vmatmul.mubr.msk.f32.vlgmr.msra.gmra.mxu0 %vm199_vm1, %v3630_v40 }
0x17f6   :  { %v3719_v56 = vpop.permute.xlu0 %3718 }
0x17fc   :  { %v3441_v43 = vpop.xlane.xlu1 %3440  ;;  %v5511_v46 = vpop.eup %5510 }
0x17fd   :  { %5512 = vrcp.f32 %v3441_v43  ;;  %v3452_v54 = vmul.f32 %v5511_v46, %v5503_v33 }
0x1800   :  { %v3721_v57 = vpop.permute.xlu1 %3720 }
0x180a   :  { %v5513_v50 = vpop.eup %5512 }
0x180b   :  { %v3450_v53 = vmul.f32 %v5513_v50, %v5505_v8 }
0x180d   :  { %5282 = vmatprep.mubr.msk.f32.mxu1 %vm376_vm2, %v3450_v53 }
0x180e   :  { %5283 = vmatmul.mubr.msk.f32.vlgmr.msra.gmra.mxu1 %vm376_vm2, %v3452_v54 }
0x180f   :  { %5293 = vmatpush3.xpose.msk.msra.mxu1 %vm199_vm1, %v3725_v0  ;;  %5296 = vmatprep.mubr.msk.f32.mxu1 %vm199_vm1, %v3719_v56 }
0x1810   :  { %5294 = vmatprep.subr.msk.mxu1 %vm199_vm1, %v3723_v42 }
0x1813   :  { %5295 = vmatpush3.xpose.msk.msra.mxu1 %vm199_vm1, %v3723_v42 }
0x1816   :  { %5297 = vmatmul.mubr.msk.f32.vlgmr.msra.gmra.mxu1 %vm199_vm1, %v3721_v57 }
0x1885   :  { %v5277_v62 = vpop.f32.mrf.mxu0 }
0x1887   :  { %v3531_v63 = vpop.f32.mrf.mxu0 }
0x18b3   :  { %v5291_v1 = vpop.f32.mrf.mxu0 }
0x18b4   :  { %v3812_v58 = vsel %vm376_vm2, %v5291_v1, -inf }
0x18b5   :  { %3813 = vmax.xlane.f32.xlu1 %v3812_v58  ;;  %v3709_v44 = vpop.f32.mrf.mxu0 }
0x18b6   :  { %v3809_v39 = vsel %vm376_vm2, %v3709_v44, -inf }
0x18b7   :  { %3810 = vmax.xlane.f32.xlu0 %v3809_v39 }
0x18ce   :  { %v6280_v4 = vpop.f32.mrf.mxu1 }
0x18d0   :  { %v3618_v45 = vpop.f32.mrf.mxu1 }
0x18d6   :  { %v5298_v5 = vpop.f32.mrf.mxu1 }
0x18d7   :  { %v3818_v15 = vsel %vm376_vm2, %v5298_v5, -inf }
0x18d8   :  { %v3800_v61 = vpop.f32.mrf.mxu1 }
0x18d9   :  { %v3815_v9 = vsel %vm376_vm2, %v3800_v61, -inf }
0x18da   :  { %3816 = vmax.xlane.f32.xlu0 %v3815_v9 }
0x18de   :  { %3819 = vmax.xlane.f32.xlu0 %v3818_v15 }
0x193e   :  { %v3814_v33 = vpop.xlane.xlu1 %3813 }
0x193f   :  { %v3822_v6 = vsub.f32 %v5291_v1, %v3814_v33 }
0x1940   :  { %v3811_v8 = vpop.xlane.xlu0 %3810 }
0x1941   :  { %v3827_v7 = vmul.f32 1.442695, %v3822_v6  ;;  %v3821_v55 = vsub.f32 %v3709_v44, %v3811_v8 }
0x1943   :  { %5514 = vpow2.f32 %v3827_v7  ;;  %v3825_v20 = vmul.f32 1.442695, %v3821_v55 }
0x1945   :  { %5516 = vpow2.f32 %v3825_v20 }
0x1950   :  { %v5515_v12 = vpop.eup %5514 }
0x1951   :  { %v3836_v14 = vsel %vm376_vm2, %v5515_v12, 0.0 }
0x1952   :  { %v5517_v21 = vpop.eup %5516  ;;  %3837 = vadd.xlane.f32.xlu0 %v3836_v14 }
0x1953   :  { %v3833_v22 = vsel %vm376_vm2, %v5517_v21, 0.0 }
0x1954   :  { %3834 = vadd.xlane.f32.xlu1 %v3833_v22 }
0x1963   :  { %v3817_v0 = vpop.xlane.xlu0 %3816 }
0x1964   :  { %v3823_v24 = vsub.f32 %v3800_v61, %v3817_v0 }
0x1965   :  { %3855 = vrot.lane.b32.xlu1 %v6071_v19, %s5560_s14 }
0x1966   :  { %v3829_v51 = vmul.f32 1.442695, %v3823_v24 }
0x1967   :  { %v3820_v59 = vpop.xlane.xlu0 %3819 }
0x1968   :  { %v3824_v23 = vsub.f32 %v5298_v5, %v3820_v59 }
0x1969   :  { %3942 = vrot.lane.b32.xlu1 %v6086_v29, %s5560_s14 }
0x196a   :  { %v3831_v2 = vmul.f32 1.442695, %v3824_v23 }
0x196c   :  { %5518 = vpow2.f32 %v3831_v2 }
0x196d   :  { %5520 = vpow2.f32 %v3829_v51 }
0x1979   :  { %v6290_v25 = vpop.eup %5518 }
0x197a   :  { %v3842_v30 = vsel %vm376_vm2, %v6290_v25, 0.0  ;;  %v5521_v32 = vpop.eup %5520 }
0x197b   :  { %3843 = vadd.xlane.f32.xlu0 %v3842_v30  ;;  %v3839_v40 = vsel %vm376_vm2, %v5521_v32, 0.0 }
0x198d   :  { %3840 = vadd.xlane.f32.xlu1 %v3839_v40 }
0x1991   :  { %3853 = vrot.lane.b32.xlu0 %v6074_v48, %s5560_s14 }
0x1995   :  { %4097 = vrot.lane.b32.xlu0 %v6019_v60, %s5561_s15 }
0x1999   :  { %4031 = vrot.lane.b32.xlu0 %v6224_v27, %s5562_s16 }
0x199d   :  { %4033 = vrot.lane.b32.xlu0 %v6222_v28, %s5562_s16 }
0x199e   :  { %3940 = vrot.lane.b32.xlu1 %v6089_v36, %s5560_s14 }
0x19a1   :  { %4049 = vrot.lane.b32.xlu0 %v5277_v62, %s5563_s17 }
0x19a2   :  { %4095 = vrot.lane.b32.xlu1 %v6026_v17, %s5561_s15 }
0x19a5   :  { %4091 = vrot.lane.b32.xlu0 %v6040_v3, %s5561_s15 }
0x19a6   :  { %4093 = vrot.lane.b32.xlu1 %v6033_v18, %s5561_s15 }
0x19a9   :  { %4035 = vrot.lane.b32.xlu0 %v6230_v41, %s5562_s16 }
0x19aa   :  { %4047 = vrot.lane.b32.xlu1 %v3531_v63, %s5563_s17 }
0x19ad   :  { %4051 = vrot.lane.b32.xlu0 %v3618_v45, %s5563_s17 }
0x19db   :  { %v3838_v18 = vpop.xlane.xlu0 %3837 }
0x19dd   :  { %v3835_v60 = vpop.xlane.xlu1 %3834 }
0x19de   :  { %5522 = vrcp.f32 %v3835_v60 }
0x19df   :  { %5524 = vrcp.f32 %v3838_v18 }
0x19e1   :  { %v3856_v19 = vpop.permute.xlu1 %3855 }
0x19e2   :  { %5299 = vmatprep.subr.mxu0 %v3856_v19 }
0x19e3   :  { %5300 = vmatpush3.msra.mxu0 %v3856_v19 }
0x19e5   :  { %v3943_v48 = vpop.permute.xlu1 %3942 }
0x19e6   :  { %5306 = vmatprep.subr.mxu1 %v3943_v48 }
0x19e7   :  { %5307 = vmatpush3.msra.mxu1 %v3943_v48 }
0x19eb   :  { %v5523_v17 = vpop.eup %5522 }
0x19ec   :  { %v3846_v3 = vmul.f32 %v5523_v17, %v5517_v21  ;;  %v5525_v36 = vpop.eup %5524 }
0x19ed   :  { %v3848_v27 = vmul.f32 %v5525_v36, %v5515_v12 }
0x19ee   :  { %5303 = vmatprep.mubr.msk.f32.mxu0 %vm376_vm2, %v3846_v3 }
0x1a04   :  { %v3844_v29 = vpop.xlane.xlu0 %3843 }
0x1a05   :  { %5526 = vrcp.f32 %v3844_v29 }
0x1a08   :  { %v3854_v28 = vpop.permute.xlu0 %3853 }
0x1a09   :  { %5301 = vmatprep.subr.mxu0 %v3854_v28 }
0x1a0a   :  { %5302 = vmatpush3.msra.mxu0 %v3854_v28 }
0x1a0b   :  { %5304 = vmatmul.mubr.msk.f32.vlgmr.msra.gmra.mxu0 %vm376_vm2, %v3848_v27 }
0x1a0c   :  { %v4098_v41 = vpop.permute.xlu0 %4097 }
0x1a0d   :  { %5313 = vmatprep.subr.mxu0 %v4098_v41 }
0x1a0e   :  { %5314 = vmatpush3.msra.mxu0 %v4098_v41 }
0x1a10   :  { %v4032_v42 = vpop.permute.xlu0 %4031 }
0x1a11   :  { %v4075_v15 = vsel %vm199_vm1, %v6168_v31, %v4032_v42 }
0x1a12   :  { %v5527_v63 = vpop.eup %5526 }
0x1a13   :  { %v3852_v39 = vmul.f32 %v5527_v63, %v6290_v25 }
0x1a14   :  { %v4034_v43 = vpop.permute.xlu0 %4033 }
0x1a15   :  { %v4076_v50 = vsel %vm199_vm1, %v6166_v16, %v4034_v43 }
0x1a16   :  { %v3841_v46 = vpop.xlane.xlu1 %3840 }
0x1a17   :  { %5528 = vrcp.f32 %v3841_v46 }
0x1a18   :  { %v4050_v53 = vpop.permute.xlu0 %4049 }
0x1a19   :  { %v4080_v54 = vsel %vm376_vm2, %v4076_v50, %v4050_v53 }
0x1a1a   :  { %v3941_v56 = vpop.permute.xlu1 %3940 }
0x1a1b   :  { %5308 = vmatprep.subr.mxu1 %v3941_v56 }
0x1a1c   :  { %5309 = vmatpush3.msra.mxu1 %v3941_v56  ;;  %v4092_v58 = vpop.permute.xlu0 %4091 }
0x1a1e   :  { %v4096_v57 = vpop.permute.xlu1 %4095 }
0x1a1f   :  { %5315 = vmatprep.subr.mxu0 %v4096_v57 }
0x1a20   :  { %5316 = vmatpush3.msra.mxu0 %v4096_v57  ;;  %v4036_v55 = vpop.permute.xlu0 %4035 }
0x1a21   :  { %v4077_v12 = vsel %vm199_vm1, %v6174_v38, %v4036_v55 }
0x1a22   :  { %v4094_v62 = vpop.permute.xlu1 %4093 }
0x1a23   :  { %5317 = vmatprep.subr.mxu0 %v4094_v62 }
0x1a24   :  { %v5529_v1 = vpop.eup %5528  ;;  %5318 = vmatpush3.msra.mxu0 %v4094_v62 }
0x1a25   :  { %v3850_v44 = vmul.f32 %v5529_v1, %v5521_v32  ;;  %5319 = vmatprep.subr.mxu0 %v4092_v58 }
0x1a26   :  { %5320 = vmatpush3.msra.mxu0 %v4092_v58  ;;  %v4048_v9 = vpop.permute.xlu1 %4047 }
0x1a27   :  { %5310 = vmatprep.mubr.msk.f32.mxu1 %vm376_vm2, %v3850_v44  ;;  %v4079_v33 = vsel %vm376_vm2, %v4075_v15, %v4048_v9  ;;  %v29_v9 = vld [vmem:[%s6485_s1 + $0x98] sm:$0xff] }
0x1a28   :  { %5311 = vmatmul.mubr.msk.f32.vlgmr.msra.gmra.mxu1 %vm376_vm2, %v3852_v39  ;;  %v35_v39 = vld [vmem:[%s6485_s1 + $0xc8] sm:$0xff] }
0x1a29   :  { %5327 = vmatprep.subr.mxu1 %v35_v39 }
0x1a2a   :  { %5328 = vmatpush3.msra.mxu1 %v35_v39 }
0x1acb   :  { %v5305_v16 = vpop.f32.mrf.mxu0 }
0x1acd   :  { %v3931_v45 = vpop.f32.mrf.mxu0 }
0x1ace   :  { %4063 = vrot.lane.b32.xlu1 %v3931_v45, %s5564_s18  ;;  %v5547_v45 = vld [vmem:[%s6485_s1 + $0x110] sm:$0x3] }
0x1ad2   :  { %4065 = vrot.lane.b32.xlu1 %v5305_v16, %s5564_s18  ;;  %v33_v16 = vld [vmem:[%s6485_s1 + $0xb8] sm:$0xff] }
0x1ad3   :  { %5329 = vmatprep.subr.mxu1 %v33_v16 }
0x1ad4   :  { %5330 = vmatpush3.msra.mxu1 %v33_v16 }
0x1ad6   :  { %4037 = vrot.lane.b32.xlu1 %v6228_v35, %s5562_s16 }
0x1ada   :  { %4053 = vrot.lane.b32.xlu1 %v6280_v4, %s5563_s17 }
0x1ae8   :  { %v5312_v5 = vpop.f32.mrf.mxu1 }
0x1ae9   :  { %4069 = vrot.lane.b32.xlu1 %v5312_v5, %s5564_s18  ;;  %v6373_v5 = vrot.slane %v5547_v45, %v5636_v13 }
0x1aea   :  { %v4018_v61 = vpop.f32.mrf.mxu1 }
0x1aeb   :  { %4067 = vrot.lane.b32.xlu0 %v4018_v61, %s5564_s18  ;;  %v31_v61 = vld [vmem:[%s6485_s1 + $0xa8] sm:$0xff] }
0x1aec   :  { %5331 = vmatprep.subr.mxu1 %v31_v61 }
0x1aed   :  { %5332 = vmatpush3.msra.mxu1 %v31_v61 }
0x1aee   :  { %5333 = vmatprep.subr.mxu1 %v29_v9 }
0x1aef   :  { %4104 = vrot.lane.b32.xlu0 %v6068_v52, %s5561_s15  ;;  %v4052_v52 = vpop.permute.xlu0 %4051  ;;  %5334 = vmatpush3.msra.mxu1 %v29_v9 }
0x1af0   :  { %v4081_v14 = vsel %vm376_vm2, %v4077_v12, %v4052_v52 }
0x1b40   :  { %v4064_v6 = vpop.permute.xlu1 %4063 }
0x1b41   :  { %v4083_v35 = vsel %vm1851_vm3, %v4079_v33, %v4064_v6 }
0x1b42   :  { %5321 = vmatprep.mubr.msk.f32.mxu0 %vm91_vm0, %v4083_v35 }
0x1b44   :  { %v4066_v4 = vpop.permute.xlu1 %4065 }
0x1b45   :  { %v4084_v8 = vsel %vm1851_vm3, %v4080_v54, %v4066_v4 }
0x1b46   :  { %5322 = vmatmul.mubr.msk.f32.vlgmr.msra.gmra.mxu0 %vm91_vm0, %v4084_v8 }
0x1b48   :  { %v4038_v7 = vpop.permute.xlu1 %4037 }
0x1b49   :  { %v4078_v21 = vsel %vm199_vm1, %v6172_v26, %v4038_v7 }
0x1b4c   :  { %v4054_v20 = vpop.permute.xlu1 %4053 }
0x1b4d   :  { %v4082_v0 = vsel %vm376_vm2, %v4078_v21, %v4054_v20 }
0x1b5b   :  { %v4070_v31 = vpop.permute.xlu1 %4069 }
0x1b5c   :  { %v4086_v23 = vsel %vm1851_vm3, %v4082_v0, %v4070_v31 }
0x1b5d   :  { %v4068_v22 = vpop.permute.xlu0 %4067 }
0x1b5e   :  { %v4085_v59 = vsel %vm1851_vm3, %v4081_v14, %v4068_v22 }
0x1b5f   :  { %5324 = vmatprep.mubr.msk.f32.mxu0 %vm91_vm0, %v4085_v59 }
0x1b60   :  { %5325 = vmatmul.mubr.msk.f32.gmra.mxu0 %vm91_vm0, %v4086_v23 }
0x1b61   :  { %v4105_v2 = vpop.permute.xlu0 %4104 }
0x1c06   :  { %v5323_v24 = vpop.f32.mrf.mxu0 }
0x1c07   :  { %v4191_v38 = vadd.f32 %v5323_v24, %v4105_v2 }
0x1c08   :  { %v4185_v51 = vpop.f32.mrf.mxu0 }
0x1c09   :  { %v4205_v25 = vadd.f32 %v4191_v38, %v6048_v34  ;;  %v4186_v30 = vadd.f32 %v4185_v51, %v4105_v2 }
0x1c0b   :  { %v4204_v26 = vadd.f32 %v4186_v30, %v6050_v37  ;;  %v4211_v32 = vsel %vm91_vm0, %v4205_v25, 0.0 }
0x1c0c   :  { %4212 = vadd.xlane.f32.xlu0 %v4211_v32 }
0x1c0d   :  { %v4208_v40 = vsel %vm91_vm0, %v4204_v26, 0.0 }
0x1c0e   :  { %4209 = vadd.xlane.f32.xlu1 %v4208_v40 }
0x1c20   :  { %v5326_v60 = vpop.f32.mrf.mxu0 }
0x1c21   :  { %v4201_v19 = vadd.f32 %v5326_v60, %v4105_v2 }
0x1c22   :  { %v4195_v48 = vpop.f32.mrf.mxu0 }
0x1c23   :  { %v4207_v17 = vadd.f32 %v4201_v19, %v6058_v49  ;;  %v4196_v3 = vadd.f32 %v4195_v48, %v4105_v2  ;;  %v39_v48 = vld [vmem:[%s6485_s1 + $0x100] sm:$0xff] }
0x1c24   :  { %5341 = vmatprep.subr.mxu0 %v39_v48 }
0x1c25   :  { %v4206_v18 = vadd.f32 %v4196_v3, %v6056_v47  ;;  %v4217_v29 = vsel %vm91_vm0, %v4207_v17, 0.0  ;;  %5342 = vmatpush3.msra.mxu0 %v39_v48  ;;  %v37_v3 = vld [vmem:[%s6485_s1 + $0xe0] sm:$0xff] }
0x1c26   :  { %4218 = vadd.xlane.f32.xlu1 %v4217_v29  ;;  %v6408_v29 = vld [vmem:[%s6485_s1 + $0x118] sm:$0x3] }
0x1c27   :  { %v4214_v34 = vsel %vm91_vm0, %v4206_v18, 0.0 }
0x1c28   :  { %4215 = vadd.xlane.f32.xlu0 %v4214_v34  ;;  %v4279_v34 = vrot.slane %v6408_v29, %v5630_v11 }
0x1c95   :  { %v4213_v37 = vpop.xlane.xlu0 %4212 }
0x1c96   :  { %v4221_v36 = vmul.f32 0.03125, %v4213_v37 }
0x1c97   :  { %v4210_v28 = vpop.xlane.xlu1 %4209 }
0x1c98   :  { %v4225_v27 = vsub.f32 %v4205_v25, %v4221_v36  ;;  %v4220_v41 = vmul.f32 0.03125, %v4210_v28 }
0x1c9a   :  { %v4224_v42 = vsub.f32 %v4204_v26, %v4220_v41  ;;  %v4229_v43 = vmul.f32 %v4225_v27, %v4225_v27 }
0x1c9c   :  { %v4235_v46 = vsel %vm91_vm0, %v4229_v43, 0.0  ;;  %v4228_v50 = vmul.f32 %v4224_v42, %v4224_v42 }
0x1c9d   :  { %4236 = vadd.xlane.f32.xlu1 %v4235_v46 }
0x1c9e   :  { %v4232_v49 = vsel %vm91_vm0, %v4228_v50, 0.0 }
0x1c9f   :  { %4233 = vadd.xlane.f32.xlu0 %v4232_v49 }
0x1caf   :  { %v4219_v47 = vpop.xlane.xlu1 %4218 }
0x1cb0   :  { %v4223_v53 = vmul.f32 0.03125, %v4219_v47 }
0x1cb1   :  { %v4216_v54 = vpop.xlane.xlu0 %4215 }
0x1cb2   :  { %v4227_v56 = vsub.f32 %v4207_v17, %v4223_v53  ;;  %v4222_v57 = vmul.f32 0.03125, %v4216_v54  ;;  %v38_v17 = vld [vmem:[%s6485_s1 + $0xf0] sm:$0xff] }
0x1cb3   :  { %5343 = vmatprep.subr.mxu0 %v38_v17 }
0x1cb4   :  { %v4226_v62 = vsub.f32 %v4206_v18, %v4222_v57  ;;  %v4231_v63 = vmul.f32 %v4227_v56, %v4227_v56  ;;  %5344 = vmatpush3.msra.mxu0 %v38_v17  ;;  %v36_v18 = vld [vmem:[%s6485_s1 + $0xd0] sm:$0xff]  ;;  %v43_v17 = vld [vmem:[%s6486_s2 + $0x8] sm:$0xff] }
0x1cb5   :  { %5345 = vmatprep.subr.mxu0 %v37_v3 }
0x1cb6   :  { %v4241_v1 = vsel %vm91_vm0, %v4231_v63, 0.0  ;;  %v4230_v58 = vmul.f32 %v4226_v62, %v4226_v62  ;;  %5346 = vmatpush3.msra.mxu0 %v37_v3  ;;  %v5548_v3 = vld [vmem:[%s6486_s2] sm:$0xff] }
0x1cb7   :  { %4242 = vadd.xlane.f32.xlu1 %v4241_v1  ;;  %5347 = vmatprep.subr.mxu0 %v36_v18 }
0x1cb8   :  { %v4238_v44 = vsel %vm91_vm0, %v4230_v58, 0.0  ;;  %5348 = vmatpush3.msra.mxu0 %v36_v18  ;;  %v4587_v18 = vrot.slane %v5548_v3, 2 }
0x1cb9   :  { %4239 = vadd.xlane.f32.xlu0 %v4238_v44 }
0x1cc8   :  { %4381 = vrot.lane.b32.xlu1 %v6373_v5, %s5551_s5 }
0x1ccf   :  { %4269 = vrot.lane.b32.xlu0 %v6373_v5, %s5550_s4 }
0x1d26   :  { %v4237_v15 = vpop.xlane.xlu1 %4236 }
0x1d27   :  { %v4245_v33 = vmul.f32 0.03125, %v4237_v15 }
0x1d28   :  { %v4234_v6 = vpop.xlane.xlu0 %4233 }
0x1d29   :  { %v4244_v35 = vmul.f32 0.03125, %v4234_v6  ;;  %v4249_v4 = vadd.f32 1e-05, %v4245_v33 }
0x1d2b   :  { %v4248_v8 = vadd.f32 1e-05, %v4244_v35  ;;  %5530 = vrsqrt.f32 %v4249_v4 }
0x1d2d   :  { %5532 = vrsqrt.f32 %v4248_v8 }
0x1d38   :  { %v5531_v7 = vpop.eup %5530 }
0x1d39   :  { %v4257_v31 = vmul.f32 %v5531_v7, %v4225_v27 }
0x1d3a   :  { %v5533_v55 = vpop.eup %5532 }
0x1d3b   :  { %v4256_v12 = vmul.f32 %v5533_v55, %v4224_v42  ;;  %v4265_v23 = vmul.f32 %v6373_v5, %v4257_v31 }
0x1d3d   :  { %v4264_v59 = vmul.f32 %v6373_v5, %v4256_v12 }
0x1d40   :  { %v4243_v20 = vpop.xlane.xlu1 %4242 }
0x1d41   :  { %v4247_v52 = vmul.f32 0.03125, %v4243_v20 }
0x1d42   :  { %v4240_v14 = vpop.xlane.xlu0 %4239 }
0x1d43   :  { %v4251_v21 = vadd.f32 1e-05, %v4247_v52  ;;  %v4246_v22 = vmul.f32 0.03125, %v4240_v14 }
0x1d44   :  { %v4382_v11 = vpop.permute.xlu1 %4381 }
0x1d45   :  { %5534 = vrsqrt.f32 %v4251_v21  ;;  %v4250_v0 = vadd.f32 1e-05, %v4246_v22 }
0x1d46   :  { %v4270_v2 = vpop.permute.xlu0 %4269 }
0x1d47   :  { %5536 = vrsqrt.f32 %v4250_v0  ;;  %v4272_v24 = vadd.f32 %v4270_v2, %v4264_v59  ;;  %v4273_v38 = vadd.f32 %v4270_v2, %v4265_v23 }
0x1d49   :  { %5335 = vmatprep.mubr.msk.f32.mxu1 %vm91_vm0, %v4272_v24 }
0x1d4a   :  { %5336 = vmatmul.mubr.msk.f32.vlgmr.msra.gmra.mxu1 %vm91_vm0, %v4273_v38 }
0x1d52   :  { %v5535_v51 = vpop.eup %5534 }
0x1d53   :  { %v4259_v25 = vmul.f32 %v5535_v51, %v4227_v56 }
0x1d54   :  { %v5537_v30 = vpop.eup %5536 }
0x1d55   :  { %v4258_v26 = vmul.f32 %v5537_v30, %v4226_v62  ;;  %v4267_v32 = vmul.f32 %v6373_v5, %v4259_v25  ;;  %v45_v30 = vld [vmem:[%s6486_s2 + $0x18] sm:$0xff] }
0x1d57   :  { %v4266_v40 = vmul.f32 %v6373_v5, %v4258_v26  ;;  %v4275_v19 = vadd.f32 %v4270_v2, %v4267_v32  ;;  %v6448_v26 = vld [vmem:[%s6486_s2 + $0x20] sm:$0x1f]  ;;  %v4592_v32 = vrot.slane %v45_v30, 2 }
0x1d59   :  { %v4274_v60 = vadd.f32 %v4270_v2, %v4266_v40  ;;  %v4594_v40 = vrot.slane %v6448_v26, 2 }
0x1d5b   :  { %5338 = vmatprep.mubr.msk.f32.mxu1 %vm91_vm0, %v4274_v60 }
0x1d5c   :  { %5339 = vmatmul.mubr.msk.f32.gmra.mxu1 %vm91_vm0, %v4275_v19 }
0x1e0a   :  { %v5337_v37 = vpop.f32.mrf.mxu1 }
0x1e0b   :  { %v4364_v36 = vadd.f32 %v5337_v37, %v4279_v34 }
0x1e0c   :  { %v4358_v28 = vpop.f32.mrf.mxu1 }
0x1e0d   :  { %v4359_v27 = vadd.f32 %v4358_v28, %v4279_v34  ;;  %v4378_v42 = vmax.f32 %v4364_v36, 0.0 }
0x1e0f   :  { %v4377_v41 = vmax.f32 %v4359_v27, 0.0 }
0x1e11   :  { %5349 = vmatprep.mubr.msk.f32.mxu0 %vm91_vm0, %v4377_v41 }
0x1e12   :  { %5350 = vmatmul.mubr.msk.f32.vlgmr.msra.gmra.mxu0 %vm91_vm0, %v4378_v42 }
0x1e1c   :  { %v5340_v43 = vpop.f32.mrf.mxu1 }
0x1e1d   :  { %v4374_v46 = vadd.f32 %v5340_v43, %v4279_v34 }
0x1e1e   :  { %v4368_v50 = vpop.f32.mrf.mxu1 }
0x1e1f   :  { %v4369_v49 = vadd.f32 %v4368_v50, %v4279_v34  ;;  %v4380_v53 = vmax.f32 %v4374_v46, 0.0  ;;  %v4588_v34 = vrot.slane %v43_v17, 2 }
0x1e21   :  { %v4379_v47 = vmax.f32 %v4369_v49, 0.0  ;;  %v4589_v28 = vsel %vm4586_vm4, %v4587_v18, %v4588_v34 }
0x1e23   :  { %5352 = vmatprep.mubr.msk.f32.mxu0 %vm91_vm0, %v4379_v47 }
0x1e24   :  { %5353 = vmatmul.mubr.msk.f32.gmra.mxu0 %vm91_vm0, %v4380_v53 }
0x1ed2   :  { %v5351_v54 = vpop.f32.mrf.mxu0 }
0x1ed3   :  { %v4468_v56 = vadd.f32 %v5351_v54, %v4382_v11 }
0x1ed4   :  { %v4462_v57 = vpop.f32.mrf.mxu0 }
0x1ed5   :  { %v4463_v62 = vadd.f32 %v4462_v57, %v4382_v11  ;;  %v4482_v63 = vadd.f32 %v4468_v56, %v4273_v38 }
0x1ed7   :  { %v4481_v1 = vadd.f32 %v4463_v62, %v4272_v24  ;;  %v4488_v58 = vsel %vm91_vm0, %v4482_v63, 0.0  ;;  %v4547_v62 = vrot.slane %v6408_v29, %v5636_v13 }
0x1ed8   :  { %4489 = vadd.xlane.f32.xlu0 %v4488_v58 }
0x1ed9   :  { %v4485_v44 = vsel %vm91_vm0, %v4481_v1, 0.0 }
0x1eda   :  { %4486 = vadd.xlane.f32.xlu1 %v4485_v44 }
0x1ee4   :  { %v5354_v39 = vpop.f32.mrf.mxu0 }
0x1ee5   :  { %v4478_v16 = vadd.f32 %v5354_v39, %v4382_v11 }
0x1ee6   :  { %v4472_v45 = vpop.f32.mrf.mxu0 }
0x1ee7   :  { %v4484_v61 = vadd.f32 %v4478_v16, %v4275_v19  ;;  %v4473_v9 = vadd.f32 %v4472_v45, %v4382_v11  ;;  %v5565_v19 = vmov 0.0  }
0x1ee8   :  { %5355 = vmatprep.subr.mxu1 %v5565_v19  ;;  %5363 = vmatprep.mubr.msk.f32.mxu1 %vm5566_vm5, %v5565_v19 }
0x1ee9   :  { %v4483_v15 = vadd.f32 %v4473_v9, %v4274_v60  ;;  %v4494_v33 = vsel %vm91_vm0, %v4484_v61, 0.0  ;;  %v44_v60 = vld [vmem:[%s6486_s2 + $0x10] sm:$0xff] }
0x1eea   :  { %4495 = vadd.xlane.f32.xlu1 %v4494_v33  ;;  %v4590_v48 = vrot.slane %v44_v60, 2  ;;  %v4575_v60 = vsub.s32 2, %v5627_v10 }
0x1eeb   :  { %v4491_v6 = vsel %vm91_vm0, %v4483_v15, 0.0 }
0x1eec   :  { %4492 = vadd.xlane.f32.xlu0 %v4491_v6  ;;  %v4593_v37 = vsel %vm4586_vm4, %v4590_v48, %v4592_v32  ;;  %v4591_v36 = vsel %vm4586_vm4, %v4588_v34, %v4590_v48 }
0x1f61   :  { %v4490_v35 = vpop.xlane.xlu0 %4489 }
0x1f62   :  { %v4498_v4 = vmul.f32 0.03125, %v4490_v35 }
0x1f63   :  { %v4487_v8 = vpop.xlane.xlu1 %4486 }
0x1f64   :  { %v6420_v7 = vsub.f32 %v4482_v63, %v4498_v4  ;;  %v4497_v55 = vmul.f32 0.03125, %v4487_v8 }
0x1f66   :  { %v6422_v20 = vsub.f32 %v4481_v1, %v4497_v55  ;;  %v4506_v52 = vmul.f32 %v6420_v7, %v6420_v7 }
0x1f68   :  { %v4512_v12 = vsel %vm91_vm0, %v4506_v52, 0.0  ;;  %v4505_v31 = vmul.f32 %v6422_v20, %v6422_v20 }
0x1f69   :  { %4513 = vadd.xlane.f32.xlu1 %v4512_v12 }
0x1f6a   :  { %v4509_v14 = vsel %vm91_vm0, %v4505_v31, 0.0 }
0x1f6b   :  { %4510 = vadd.xlane.f32.xlu0 %v4509_v14 }
0x1f73   :  { %v4496_v21 = vpop.xlane.xlu1 %4495 }
0x1f74   :  { %v4500_v22 = vmul.f32 0.03125, %v4496_v21 }
0x1f75   :  { %v4493_v0 = vpop.xlane.xlu0 %4492 }
0x1f76   :  { %v6430_v59 = vsub.f32 %v4484_v61, %v4500_v22  ;;  %v4499_v23 = vmul.f32 0.03125, %v4493_v0 }
0x1f78   :  { %v6432_v2 = vsub.f32 %v4483_v15, %v4499_v23  ;;  %v4508_v24 = vmul.f32 %v6430_v59, %v6430_v59 }
0x1f7a   :  { %v4518_v38 = vsel %vm91_vm0, %v4508_v24, 0.0  ;;  %v4507_v51 = vmul.f32 %v6432_v2, %v6432_v2 }
0x1f7b   :  { %4519 = vadd.xlane.f32.xlu1 %v4518_v38 }
0x1f7c   :  { %v4515_v25 = vsel %vm91_vm0, %v4507_v51, 0.0 }
0x1f7d   :  { %4516 = vadd.xlane.f32.xlu0 %v4515_v25 }
0x1f93   :  { %4537 = vrot.lane.b32.xlu0 %v6373_v5, %s5561_s15  ;;  %v4595_v5 = vsel %vm4586_vm4, %v4592_v32, %v4594_v40 }
0x1f94   :  { %5356 = vmatpush3.msra.mxu1 %v4595_v5  ;;  %v4675_v5 = vsub.s32 3, %v5627_v10 }
0x1f95   :  { %5357 = vmatprep.subr.mxu1 %v5565_v19 }
0x1f96   :  { %5358 = vmatpush3.msra.mxu1 %v4593_v37  ;;  %v4676_v3 = vrot.slane %v6448_v26, %v4675_v5 }
0x1f97   :  { %5359 = vmatprep.subr.mxu1 %v5565_v19 }
0x1f98   :  { %5360 = vmatpush3.msra.mxu1 %v4591_v36 }
0x1f99   :  { %5361 = vmatprep.subr.mxu1 %v5565_v19  ;;  %v4576_v19 = vrot.slane %v6448_v26, %v4575_v60 }
0x1f9a   :  { %5362 = vmatpush3.msra.mxu1 %v4589_v28  ;;  %v4684_v28 = vsub.s32 4, %v5627_v10 }
0x1ff2   :  { %v4514_v27 = vpop.xlane.xlu1 %4513 }
0x1ff3   :  { %v4522_v41 = vmul.f32 0.03125, %v4514_v27  ;;  %v4685_v27 = vrot.slane %v6448_v26, %v4684_v28 }
0x1ff4   :  { %v4511_v42 = vpop.xlane.xlu0 %4510 }
0x1ff5   :  { %v4526_v43 = vadd.f32 1e-05, %v4522_v41  ;;  %v4521_v46 = vmul.f32 0.03125, %v4511_v42 }
0x1ff7   :  { %v4525_v50 = vadd.f32 1e-05, %v4521_v46  ;;  %5538 = vrsqrt.f32 %v4526_v43 }
0x1ff9   :  { %5540 = vrsqrt.f32 %v4525_v50 }
0x2004   :  { %v4520_v49 = vpop.xlane.xlu1 %4519  ;;  %v5539_v47 = vpop.eup %5538 }
0x2005   :  { %v4524_v53 = vmul.f32 0.03125, %v4520_v49  ;;  %v4534_v58 = vmul.f32 %v5539_v47, %v6420_v7 }
0x2006   :  { %v5541_v11 = vpop.eup %5540  ;;  %v4517_v54 = vpop.xlane.xlu0 %4516 }
0x2007   :  { %v4528_v56 = vadd.f32 1e-05, %v4524_v53  ;;  %v4523_v57 = vmul.f32 0.03125, %v4517_v54  ;;  %v4533_v1 = vmul.f32 %v5541_v11, %v6422_v20 }
0x2009   :  { %5542 = vrsqrt.f32 %v4528_v56  ;;  %v4527_v63 = vadd.f32 1e-05, %v4523_v57 }
0x200a   :  { %v4538_v44 = vpop.permute.xlu0 %4537 }
0x200b   :  { %5544 = vrsqrt.f32 %v4527_v63  ;;  %v4540_v39 = vmul.f32 %v4538_v44, %v4533_v1  ;;  %v4541_v16 = vmul.f32 %v4538_v44, %v4534_v58 }
0x200d   :  { %v4548_v45 = vadd.f32 %v4547_v62, %v4540_v39  ;;  %v4549_v61 = vadd.f32 %v4547_v62, %v4541_v16 }
0x200f   :  { %v4552_v9 = vsel %vm91_vm0, %v4548_v45, 0.0  ;;  %v4553_v15 = vsel %vm91_vm0, %v4549_v61, 0.0 }
0x2010   :  { %v4554_v33 = vadd.f32 %v4553_v15, %v4552_v9 }
0x2012   :  { %v4555_v35 = vrot.slane %v4554_v33, 4 }
0x2014   :  { %v4556_v7 = vadd.f32 %v4555_v35, %v4554_v33 }
0x2016   :  { %v5543_v6 = vpop.eup %5542  ;;  %v4557_v12 = vrot.slane %v4556_v7, 2 }
0x2017   :  { %v4536_v13 = vmul.f32 %v5543_v6, %v6430_v59 }
0x2018   :  { %v5545_v29 = vpop.eup %5544  ;;  %v4558_v22 = vadd.f32 %v4557_v12, %v4556_v7 }
0x2019   :  { %v4535_v4 = vmul.f32 %v5545_v29, %v6432_v2  ;;  %v4543_v8 = vmul.f32 %v4538_v44, %v4536_v13 }
0x201a   :  { %v4559_v24 = vrot.slane %v4558_v22, 1 }
0x201b   :  { %v4542_v55 = vmul.f32 %v4538_v44, %v4535_v4  ;;  %v4551_v20 = vadd.f32 %v4547_v62, %v4543_v8 }
0x201c   :  { %v4560_v25 = vadd.f32 %v4559_v24, %v4558_v22 }
0x201d   :  { %v4550_v52 = vadd.f32 %v4547_v62, %v4542_v55  ;;  %v4562_v14 = vsel %vm91_vm0, %v4551_v20, 0.0 }
0x201e   :  { %v4571_v30 = vmul.f32 0.0625, %v4560_v25 }
0x201f   :  { %v4561_v31 = vsel %vm91_vm0, %v4550_v52, 0.0 }
0x2020   :  { %v4563_v21 = vadd.f32 %v4562_v14, %v4561_v31 }
0x2022   :  { %v4564_v0 = vrot.slane %v4563_v21, 4 }
0x2024   :  { %v4565_v23 = vadd.f32 %v4564_v0, %v4563_v21 }
0x2026   :  { %v4566_v38 = vrot.slane %v4565_v23, 2 }
0x2028   :  { %v4567_v59 = vadd.f32 %v4566_v38, %v4565_v23 }
0x202a   :  { %v4568_v51 = vrot.slane %v4567_v59, 1 }
0x202c   :  { %v4569_v2 = vadd.f32 %v4568_v51, %v4567_v59 }
0x202e   :  { %v4572_v32 = vmul.f32 0.0625, %v4569_v2 }
0x2030   :  { %v4580_v40 = vsel %vm4579_vm6, %v4572_v32, %v4571_v30 }
0x2031   :  { %5364 = vmatmul.mubr.msk.f32.vlgmr.msra.gmra.mxu1 %vm91_vm0, %v4580_v40 }
0x20f1   :  { %v4668_v48 = vpop.f32.mrf.mxu1 }
0x20f2   :  { %v4669_v17 = vadd.f32 %v4668_v48, %v4576_v19 }
0x20f3   :  { %v5365_v18 = vpop.f32.mrf.mxu1 }
0x20f4   :  { %v4672_v34 = vmax.f32 %v4669_v17, 0.0 }
0x20f6   :  { %v4677_v37 = vmul.f32 %v4676_v3, %v4672_v34 }
0x20f8   :  { %v4679_v36 = vsel %vm4678_vm7, %v4677_v37, 0.0 }
0x20f9   :  { %4680 = vadd.xlane.f32.xlu1 %v4679_v36 }
0x2182   :  { %v4681_v41 = vpop.xlane.xlu1 %4680 }
0x2183   :  { %v4686_v42 = vadd.f32 %v4685_v27, %v4681_v41 }
0x2185   :  { %4688 = vst.msk [vmem:[%s6487_s3] sm:$0x3] %vm4687_vm8, %v4686_v42 }

</bundles_post_ra>
